<compile_context>
chip_gen: v7x
topology: tpu7x:2x2x1
jax: 0.10.0
libtpu: 0.0.40
codegen_flags: <defaults>
</compile_context>

<pallas_src>
import functools

import jax
import jax.numpy as jnp
from jax.experimental import pallas as pl
from jax.experimental.pallas import tpu as pltpu

BN_EPS = 1e-5


def _round_up(a, b):
    return (a + b - 1) // b * b


@functools.lru_cache(maxsize=None)
def _hw_config():
    """Per-generation (row-tile cap, vmem_limit_bytes)."""
    vmem_bytes = None
    try:
        info = pltpu.get_tpu_info()
        vmem_bytes = getattr(info, "vmem_capacity_bytes", None)
    except Exception:
        vmem_bytes = None
    if vmem_bytes is not None and vmem_bytes > 96 * 1024 * 1024:
        # v5e / v6e: 128 MiB VMEM, HBM-bandwidth-bound -> big, dense DMAs.
        return 2048, 96 * 1024 * 1024
    # v7x (64 MiB VMEM per TensorCore) or unknown hardware: stay conservative.
    return 1024, 48 * 1024 * 1024


# ---------------------------------------------------------------------------
# In-kernel helpers
# ---------------------------------------------------------------------------
def _store_stats(st_ref, z, n_valid, tile):
    """Write per-channel sum / sum-of-squares of z=(tile,C) into st_ref=(1,2,C).

    When the last tile contains zero-padded rows (n_valid is not None) those
    rows are masked out — but only on that tile, so all other tiles skip the
    iota/where VPU work entirely.
    """
    def _write(zm):
        st_ref[0, 0:1, :] = jnp.sum(zm, axis=0, keepdims=True)
        st_ref[0, 1:2, :] = jnp.sum(zm * z, axis=0, keepdims=True)

    if n_valid is None:
        _write(z)
        return

    is_last = pl.program_id(0) == pl.num_programs(0) - 1

    @pl.when(jnp.logical_not(is_last))
    def _():
        _write(z)

    @pl.when(is_last)
    def _():
        rows = pl.program_id(0) * tile + jax.lax.broadcasted_iota(
            jnp.int32, (tile, 1), 0)
        _write(jnp.where(rows < n_valid, z, 0.0))


# ---------------------------------------------------------------------------
# Stage kernels
# ---------------------------------------------------------------------------
def _glu_stats_kernel(x_ref, w_ref, b_ref, wg_ref, bg_ref, y_ref, st_ref, *,
                      n_valid, tile):
    # conv1 / conv1_gates (in_channels=1 -> VPU lane broadcast) + GLU gate.
    x = x_ref[...]                                    # (tile, 1) f32
    h = x * w_ref[...] + b_ref[...]                   # (tile, 128)
    g = x * wg_ref[...] + bg_ref[...]
    gate = 0.5 * (jnp.tanh(0.5 * g) + 1.0)            # == sigmoid(g), EUP path
    a = h * gate
    _store_stats(st_ref, a, n_valid, tile)
    y_ref[...] = a.astype(y_ref.dtype)


def _conv_relu_conv_stats_kernel(x_ref, w1_ref, b1_ref, w2_ref, b2_ref,
                                 y_ref, st_ref, *, n_valid, tile):
    # bn1 is pre-folded into w1/b1 (no ReLU between bn1 and this conv), so the
    # bf16 activation feeds the MXU directly:
    # Conv(128->256)+ReLU -> Conv(256->512); emit stats for BatchNorm(512).
    d1 = jnp.dot(x_ref[...], w1_ref[...],
                 preferred_element_type=jnp.float32) + b1_ref[...]
    d1 = jnp.maximum(d1, 0.0)
    d2 = jnp.dot(d1.astype(jnp.bfloat16), w2_ref[...],
                 preferred_element_type=jnp.float32) + b2_ref[...]
    _store_stats(st_ref, d2, n_valid, tile)
    y_ref[...] = d2.astype(y_ref.dtype)


def _bn_relu_conv_stats_kernel(x_ref, sc_ref, sh_ref, w_ref, b_ref,
                               y_ref, st_ref, *, n_valid, tile):
    # Fused BN (scale/shift) + ReLU -> Conv (bf16 MXU matmul, f32 accum),
    # plus stats of the conv output for the following BatchNorm.
    x = x_ref[...].astype(jnp.float32)
    a = jnp.maximum(x * sc_ref[...] + sh_ref[...], 0.0)
    z = jnp.dot(a.astype(jnp.bfloat16), w_ref[...],
                preferred_element_type=jnp.float32) + b_ref[...]
    _store_stats(st_ref, z, n_valid, tile)
    y_ref[...] = z.astype(y_ref.dtype)


def _bn_relu_lastconv_kernel(x_ref, sc_ref, sh_ref, wl_ref, bl_ref, out_ref):
    # Fused BN + ReLU -> Conv(160->1) as a lane reduction (a 1-lane matmul
    # would waste the whole MXU pass).
    x = x_ref[...].astype(jnp.float32)
    a = jnp.maximum(x * sc_ref[...] + sh_ref[...], 0.0)
    out_ref[...] = jnp.sum(a * wl_ref[...], axis=-1, keepdims=True) + bl_ref[...]


# ---------------------------------------------------------------------------
# BlockSpec / call helpers
# ---------------------------------------------------------------------------
def _row_spec(tile, c):
    return pl.BlockSpec((tile, c), lambda i: (i, 0))


def _const_spec(shape):
    # Block index never changes -> DMA'd once per call by the pipeline.
    return pl.BlockSpec(shape, lambda i: (0,) * len(shape))


def _stats_spec(c):
    return pl.BlockSpec((1, 2, c), lambda i: (i, 0, 0))


def _compiler_params(vmem_limit):
    return pltpu.CompilerParams(
        dimension_semantics=("parallel",),
        vmem_limit_bytes=vmem_limit,
    )


def _cost(flops, bytes_accessed, transcendentals=0):
    return pl.CostEstimate(flops=int(flops), transcendentals=int(transcendentals),
                           bytes_accessed=int(bytes_accessed))


def _bn_fold(stats, n, gamma, beta):
    """Fold training-mode BatchNorm1d into a per-channel scale/shift.

    stats: (n_tiles, 2, C) per-tile (sum, sum_sq);  n: number of valid rows.
    """
    s = jnp.sum(stats[:, 0, :], axis=0)
    sq = jnp.sum(stats[:, 1, :], axis=0)
    mean = s / n
    var = jnp.maximum(sq / n - mean * mean, 0.0)      # biased variance
    scale = gamma * jax.lax.rsqrt(var + BN_EPS)       # (1, C)
    shift = beta - mean * scale                       # (1, C)
    return scale, shift


# ---------------------------------------------------------------------------
# Forward pass
# ---------------------------------------------------------------------------
def generator_f0(x, p):
    """x: (B, T) float32 -> (B, T) float32 (matches torch forward, training-mode BN)."""
    B, T = x.shape
    N = B * T

    tile_cap, vmem_limit = _hw_config()
    # >= 2 row tiles whenever N > 16 so the "parallel" axis spans both v7x
    # TensorCores; multiples of 16 keep bf16 sublane packing aligned.
    tile = max(16, min(tile_cap, _round_up(-(-N // 2), 16)))
    n_pad = _round_up(N, tile)
    n_tiles = n_pad // tile
    grid = (n_tiles,)
    # Padding (if any) is < tile rows, i.e. confined to the last grid tile.
    n_valid = None if n_pad == N else N

    xf = x.reshape(N, 1).astype(jnp.float32)
    if n_pad != N:
        xf = jnp.pad(xf, ((0, n_pad - N), (0, 0)))

    f32, bf16 = jnp.float32, jnp.bfloat16
    cparams = _compiler_params(vmem_limit)

    def stage_out(c):
        return (jax.ShapeDtypeStruct((n_pad, c), bf16),
                jax.ShapeDtypeStruct((n_tiles, 2, c), f32))

    # ---- stage 1: conv1 * sigmoid(conv1_gates), stats for bn1 --------------
    act, st = pl.pallas_call(
        functools.partial(_glu_stats_kernel, n_valid=n_valid, tile=tile),
        grid=grid,
        in_specs=[_row_spec(tile, 1)] + [_const_spec((1, 128))] * 4,
        out_specs=(_row_spec(tile, 128), _stats_spec(128)),
        out_shape=stage_out(128),
        compiler_params=cparams,
        cost_estimate=_cost(8 * n_pad * 128, 4 * n_pad + 2 * n_pad * 128,
                            transcendentals=n_pad * 128),
    )(xf, p["w1"], p["b1"], p["w1g"], p["b1g"])

    # ---- stage 2: bn1 (folded into conv) -> Conv(128->256)+ReLU -> Conv(256->512)
    sc, sh = _bn_fold(st, N, p["bn1_g"], p["bn1_b"])
    w1_f32 = p["wd1"].astype(f32)
    w1_fold = (sc.reshape(-1, 1) * w1_f32).astype(bf16)       # (128, 256) bf16
    b1_fold = p["bd1"] + sh @ w1_f32                          # (1, 256) f32
    act, st = pl.pallas_call(
        functools.partial(_conv_relu_conv_stats_kernel, n_valid=n_valid, tile=tile),
        grid=grid,
        in_specs=[_row_spec(tile, 128),
                  _const_spec((128, 256)), _const_spec((1, 256)),
                  _const_spec((256, 512)), _const_spec((1, 512))],
        out_specs=(_row_spec(tile, 512), _stats_spec(512)),
        out_shape=stage_out(512),
        compiler_params=cparams,
        cost_estimate=_cost(2 * n_pad * (128 * 256 + 256 * 512),
                            2 * n_pad * (128 + 512) + 2 * (128 * 256 + 256 * 512)),
    )(act, w1_fold, b1_fold, p["wd2"], p["bd2"])

    # ---- stages 3-6: fused BN+ReLU -> Conv, stats for the next BN ----------
    prev_gamma, prev_beta = p["bnd2_g"], p["bnd2_b"]
    chain = [
        (p["wd3"], p["bd3"], p["bnd3_g"], p["bnd3_b"]),   # 512 -> 1024
        (p["wu1"], p["bu1"], p["bnu1_g"], p["bnu1_b"]),   # 1024 -> 512
        (p["wu2"], p["bu2"], p["bnu2_g"], p["bnu2_b"]),   # 512 -> 256
        (p["wu3"], p["bu3"], p["bnu3_g"], p["bnu3_b"]),   # 256 -> 160
    ]
    for w, b, nxt_gamma, nxt_beta in chain:
        c_in, c_out = int(w.shape[0]), int(w.shape[1])
        sc, sh = _bn_fold(st, N, prev_gamma, prev_beta)
        act, st = pl.pallas_call(
            functools.partial(_bn_relu_conv_stats_kernel, n_valid=n_valid, tile=tile),
            grid=grid,
            in_specs=[_row_spec(tile, c_in), _const_spec((1, c_in)),
                      _const_spec((1, c_in)), _const_spec((c_in, c_out)),
                      _const_spec((1, c_out))],
            out_specs=(_row_spec(tile, c_out), _stats_spec(c_out)),
            out_shape=stage_out(c_out),
            compiler_params=cparams,
            cost_estimate=_cost(2 * n_pad * c_in * c_out,
                                2 * n_pad * (c_in + c_out) + 2 * c_in * c_out),
        )(act, sc, sh, w, b)
        prev_gamma, prev_beta = nxt_gamma, nxt_beta

    # ---- stage 7: bnu3 + ReLU -> Conv(160->1) as a lane reduction ----------
    sc, sh = _bn_fold(st, N, prev_gamma, prev_beta)
    out = pl.pallas_call(
        _bn_relu_lastconv_kernel,
        grid=grid,
        in_specs=[_row_spec(tile, 160), _const_spec((1, 160)), _const_spec((1, 160)),
                  _const_spec((1, 160)), _const_spec((1, 1))],
        out_specs=_row_spec(tile, 1),
        out_shape=jax.ShapeDtypeStruct((n_pad, 1), f32),
        compiler_params=cparams,
        cost_estimate=_cost(5 * n_pad * 160, 2 * n_pad * 160 + 4 * n_pad),
    )(act, sc, sh, p["wl"], p["bl"])

    return out[:N, 0].reshape(B, T)


# ---------------------------------------------------------------------------
# Deterministic synthetic parameters (shapes from Generator_f0.__init__).
# Matmul weights are stored in bf16 (MXU-native); biases / BN affine / the
# in_channels=1 and out_channels=1 layers stay f32.
# ---------------------------------------------------------------------------
def make_params(key):
    def dense(k, cin, cout, dtype=jnp.float32):
        kw, kb = jax.random.split(k)
        scale = 1.0 / jnp.sqrt(jnp.float32(cin))
        w = (jax.random.normal(kw, (cin, cout), jnp.float32) * scale).astype(dtype)
        b = jax.random.normal(kb, (1, cout), jnp.float32) * scale
        return w, b

    def bn(k, c):
        kg, kb = jax.random.split(k)
        gamma = 1.0 + 0.1 * jax.random.normal(kg, (1, c), jnp.float32)
        beta = 0.1 * jax.random.normal(kb, (1, c), jnp.float32)
        return gamma, beta

    ks = jax.random.split(key, 16)
    p = {}
    p["w1"], p["b1"] = dense(ks[0], 1, 128)                       # conv1
    p["w1g"], p["b1g"] = dense(ks[1], 1, 128)                     # conv1_gates
    p["bn1_g"], p["bn1_b"] = bn(ks[2], 128)                       # bn1
    p["wd1"], p["bd1"] = dense(ks[3], 128, 256, jnp.bfloat16)     # downSample[0]
    p["wd2"], p["bd2"] = dense(ks[4], 256, 512, jnp.bfloat16)     # downSample[2]
    p["bnd2_g"], p["bnd2_b"] = bn(ks[5], 512)                     # downSample[3]
    p["wd3"], p["bd3"] = dense(ks[6], 512, 1024, jnp.bfloat16)    # downSample[5]
    p["bnd3_g"], p["bnd3_b"] = bn(ks[7], 1024)                    # downSample[6]
    p["wu1"], p["bu1"] = dense(ks[8], 1024, 512, jnp.bfloat16)    # upSample[0]
    p["bnu1_g"], p["bnu1_b"] = bn(ks[9], 512)                     # upSample[1]
    p["wu2"], p["bu2"] = dense(ks[10], 512, 256, jnp.bfloat16)    # upSample[3]
    p["bnu2_g"], p["bnu2_b"] = bn(ks[11], 256)                    # upSample[4]
    p["wu3"], p["bu3"] = dense(ks[12], 256, 160, jnp.bfloat16)    # upSample[6]
    p["bnu3_g"], p["bnu3_b"] = bn(ks[13], 160)                    # upSample[7]
    wl, bl = dense(ks[14], 160, 1)                                # lastConvLayer
    p["wl"] = wl.reshape(1, 160)     # lane-wise for the in-kernel reduction
    p["bl"] = bl.reshape(1, 1)
    return p


if __name__ == "__main__":
    key = jax.random.PRNGKey(0)
    kx, kp = jax.random.split(key)

    B, T = 2, 16
    x = jax.random.normal(kx, (B, T), jnp.float32)
    params = make_params(kp)

    y = jax.jit(generator_f0)(x, params)
    y = jax.block_until_ready(y)

    assert y.shape == (B, T), y.shape
    assert bool(jnp.all(jnp.isfinite(y)))
    print("KERNEL_OK")
</pallas_src>

<mosaic_0001>
module attributes {stable_mosaic.version = 11 : i64} {
  func.func @_glu_stats_kernel(%arg0: i32, %arg1: memref<16x1xf32, #tpu.memory_space<vmem>>, %arg2: memref<1x128xf32, #tpu.memory_space<vmem>>, %arg3: memref<1x128xf32, #tpu.memory_space<vmem>>, %arg4: memref<1x128xf32, #tpu.memory_space<vmem>>, %arg5: memref<1x128xf32, #tpu.memory_space<vmem>>, %arg6: memref<16x128xbf16, #tpu.memory_space<vmem>>, %arg7: memref<1x2x128xf32, #tpu.memory_space<vmem>>) attributes {dimension_semantics = [#tpu.dimension_semantics<parallel>], iteration_bounds = array<i64: 2>, scalar_prefetch = 0 : i64, scratch_operands = 0 : i64, tpu.core_type = #tpu.core_type<tc>, window_params = [{transform_indices = @transform_0, window_bounds = array<i64: 16, 1>}, {pipeline_mode = #tpu.pipeline_mode<synchronous>, transform_indices = @transform_1, window_bounds = array<i64: 1, 128>}, {pipeline_mode = #tpu.pipeline_mode<synchronous>, transform_indices = @transform_2, window_bounds = array<i64: 1, 128>}, {pipeline_mode = #tpu.pipeline_mode<synchronous>, transform_indices = @transform_3, window_bounds = array<i64: 1, 128>}, {pipeline_mode = #tpu.pipeline_mode<synchronous>, transform_indices = @transform_4, window_bounds = array<i64: 1, 128>}, {transform_indices = @transform_5, window_bounds = array<i64: 16, 128>}, {transform_indices = @transform_6, window_bounds = array<i64: 1, 2, 128>}]} {
    %c0 = arith.constant 0 : index
    %c0_0 = arith.constant 0 : index
    %0 = vector.load %arg1[%c0, %c0_0] : memref<16x1xf32, #tpu.memory_space<vmem>>, vector<16x1xf32>
    %c0_1 = arith.constant 0 : index
    %c0_2 = arith.constant 0 : index
    %1 = vector.load %arg2[%c0_1, %c0_2] : memref<1x128xf32, #tpu.memory_space<vmem>>, vector<1x128xf32>
    %2 = vector.broadcast %0 : vector<16x1xf32> to vector<16x128xf32>
    %3 = vector.broadcast %1 : vector<1x128xf32> to vector<16x128xf32>
    %4 = arith.mulf %2, %3 : vector<16x128xf32>
    %c0_3 = arith.constant 0 : index
    %c0_4 = arith.constant 0 : index
    %5 = vector.load %arg3[%c0_3, %c0_4] : memref<1x128xf32, #tpu.memory_space<vmem>>, vector<1x128xf32>
    %6 = vector.broadcast %5 : vector<1x128xf32> to vector<16x128xf32>
    %7 = arith.addf %4, %6 : vector<16x128xf32>
    %c0_5 = arith.constant 0 : index
    %c0_6 = arith.constant 0 : index
    %8 = vector.load %arg4[%c0_5, %c0_6] : memref<1x128xf32, #tpu.memory_space<vmem>>, vector<1x128xf32>
    %9 = vector.broadcast %0 : vector<16x1xf32> to vector<16x128xf32>
    %10 = vector.broadcast %8 : vector<1x128xf32> to vector<16x128xf32>
    %11 = arith.mulf %9, %10 : vector<16x128xf32>
    %c0_7 = arith.constant 0 : index
    %c0_8 = arith.constant 0 : index
    %12 = vector.load %arg5[%c0_7, %c0_8] : memref<1x128xf32, #tpu.memory_space<vmem>>, vector<1x128xf32>
    %13 = vector.broadcast %12 : vector<1x128xf32> to vector<16x128xf32>
    %14 = arith.addf %11, %13 : vector<16x128xf32>
    %cst = arith.constant 5.000000e-01 : f32
    %15 = vector.broadcast %cst : f32 to vector<16x128xf32>
    %16 = arith.mulf %15, %14 : vector<16x128xf32>
    %17 = math.tanh %16 : vector<16x128xf32>
    %cst_9 = arith.constant 1.000000e+00 : f32
    %18 = vector.broadcast %cst_9 : f32 to vector<16x128xf32>
    %19 = arith.addf %17, %18 : vector<16x128xf32>
    %cst_10 = arith.constant 5.000000e-01 : f32
    %20 = vector.broadcast %cst_10 : f32 to vector<16x128xf32>
    %21 = arith.mulf %20, %19 : vector<16x128xf32>
    %22 = arith.mulf %7, %21 : vector<16x128xf32>
    %cst_11 = arith.constant dense<0.000000e+00> : vector<128xf32>
    %23 = vector.multi_reduction <add>, %22, %cst_11 [0] : vector<16x128xf32> to vector<128xf32>
    %24 = vector.shape_cast %23 : vector<128xf32> to vector<1x128xf32>
    %c0_12 = arith.constant 0 : index
    %c0_13 = arith.constant 0 : index
    %c0_14 = arith.constant 0 : index
    %25 = vector.load %arg7[%c0_12, %c0_13, %c0_14] : memref<1x2x128xf32, #tpu.memory_space<vmem>>, vector<1x1x128xf32>
    %26 = vector.shape_cast %25 : vector<1x1x128xf32> to vector<1x128xf32>
    %27 = vector.shape_cast %24 : vector<1x128xf32> to vector<1x1x128xf32>
    tpu.vector_store %arg7[%c0_12, %c0_13, %c0_14], %27 {strides = array<i32>} : memref<1x2x128xf32, #tpu.memory_space<vmem>>, vector<1x1x128xf32>,
    %28 = arith.mulf %22, %22 : vector<16x128xf32>
    %cst_15 = arith.constant dense<0.000000e+00> : vector<128xf32>
    %29 = vector.multi_reduction <add>, %28, %cst_15 [0] : vector<16x128xf32> to vector<128xf32>
    %30 = vector.shape_cast %29 : vector<128xf32> to vector<1x128xf32>
    %c0_16 = arith.constant 0 : index
    %c1 = arith.constant 1 : index
    %c0_17 = arith.constant 0 : index
    %31 = vector.load %arg7[%c0_16, %c1, %c0_17] : memref<1x2x128xf32, #tpu.memory_space<vmem>>, vector<1x1x128xf32>
    %32 = vector.shape_cast %31 : vector<1x1x128xf32> to vector<1x128xf32>
    %33 = vector.shape_cast %30 : vector<1x128xf32> to vector<1x1x128xf32>
    tpu.vector_store %arg7[%c0_16, %c1, %c0_17], %33 {strides = array<i32>} : memref<1x2x128xf32, #tpu.memory_space<vmem>>, vector<1x1x128xf32>,
    %34 = arith.truncf %22 : vector<16x128xf32> to vector<16x128xbf16>
    %c0_18 = arith.constant 0 : index
    %c0_19 = arith.constant 0 : index
    %35 = vector.load %arg6[%c0_18, %c0_19] : memref<16x128xbf16, #tpu.memory_space<vmem>>, vector<16x128xbf16>
    tpu.vector_store %arg6[%c0_18, %c0_19], %34 {strides = array<i32>} : memref<16x128xbf16, #tpu.memory_space<vmem>>, vector<16x128xbf16>,
    return
  }
  func.func @transform_0(%arg0: i32) -> (i32, i32) {
    %c0_i32 = arith.constant 0 : i32
    %c0_i32_0 = arith.constant 0 : i32
    return %arg0, %c0_i32 : i32, i32
  }
  func.func @transform_1(%arg0: i32) -> (i32, i32) {
    %c0_i32 = arith.constant 0 : i32
    %c0_i32_0 = arith.constant 0 : i32
    %c0_i32_1 = arith.constant 0 : i32
    return %c0_i32, %c0_i32_0 : i32, i32
  }
  func.func @transform_2(%arg0: i32) -> (i32, i32) {
    %c0_i32 = arith.constant 0 : i32
    %c0_i32_0 = arith.constant 0 : i32
    %c0_i32_1 = arith.constant 0 : i32
    return %c0_i32, %c0_i32_0 : i32, i32
  }
  func.func @transform_3(%arg0: i32) -> (i32, i32) {
    %c0_i32 = arith.constant 0 : i32
    %c0_i32_0 = arith.constant 0 : i32
    %c0_i32_1 = arith.constant 0 : i32
    return %c0_i32, %c0_i32_0 : i32, i32
  }
  func.func @transform_4(%arg0: i32) -> (i32, i32) {
    %c0_i32 = arith.constant 0 : i32
    %c0_i32_0 = arith.constant 0 : i32
    %c0_i32_1 = arith.constant 0 : i32
    return %c0_i32, %c0_i32_0 : i32, i32
  }
  func.func @transform_5(%arg0: i32) -> (i32, i32) {
    %c0_i32 = arith.constant 0 : i32
    %c0_i32_0 = arith.constant 0 : i32
    return %arg0, %c0_i32 : i32, i32
  }
  func.func @transform_6(%arg0: i32) -> (i32, i32, i32) {
    %c0_i32 = arith.constant 0 : i32
    %c0_i32_0 = arith.constant 0 : i32
    %c0_i32_1 = arith.constant 0 : i32
    return %arg0, %c0_i32, %c0_i32_0 : i32, i32, i32
  }
}

module attributes {stable_mosaic.version = 11 : i64} {
  func.func @_conv_relu_conv_stats_kernel(%arg0: i32, %arg1: memref<16x128xbf16, #tpu.memory_space<vmem>>, %arg2: memref<128x256xbf16, #tpu.memory_space<vmem>>, %arg3: memref<1x256xf32, #tpu.memory_space<vmem>>, %arg4: memref<256x512xbf16, #tpu.memory_space<vmem>>, %arg5: memref<1x512xf32, #tpu.memory_space<vmem>>, %arg6: memref<16x512xbf16, #tpu.memory_space<vmem>>, %arg7: memref<1x2x512xf32, #tpu.memory_space<vmem>>) attributes {dimension_semantics = [#tpu.dimension_semantics<parallel>], iteration_bounds = array<i64: 2>, scalar_prefetch = 0 : i64, scratch_operands = 0 : i64, tpu.core_type = #tpu.core_type<tc>, window_params = [{transform_indices = @transform_0, window_bounds = array<i64: 16, 128>}, {pipeline_mode = #tpu.pipeline_mode<synchronous>, transform_indices = @transform_1, window_bounds = array<i64: 128, 256>}, {pipeline_mode = #tpu.pipeline_mode<synchronous>, transform_indices = @transform_2, window_bounds = array<i64: 1, 256>}, {pipeline_mode = #tpu.pipeline_mode<synchronous>, transform_indices = @transform_3, window_bounds = array<i64: 256, 512>}, {pipeline_mode = #tpu.pipeline_mode<synchronous>, transform_indices = @transform_4, window_bounds = array<i64: 1, 512>}, {transform_indices = @transform_5, window_bounds = array<i64: 16, 512>}, {transform_indices = @transform_6, window_bounds = array<i64: 1, 2, 512>}]} {
    %c0 = arith.constant 0 : index
    %c0_0 = arith.constant 0 : index
    %0 = vector.load %arg1[%c0, %c0_0] : memref<16x128xbf16, #tpu.memory_space<vmem>>, vector<16x128xbf16>
    %c0_1 = arith.constant 0 : index
    %c0_2 = arith.constant 0 : index
    %1 = vector.load %arg2[%c0_1, %c0_2] : memref<128x256xbf16, #tpu.memory_space<vmem>>, vector<128x256xbf16>
    %cst = arith.constant dense<0.000000e+00> : vector<16x256xf32>
    %2 = tpu.matmul %0, %1, %cst {dimension_numbers = #tpu.dot_dimension_numbers<[1], [0], [0], [1], [0, 0, 1, 1], [], []>} : vector<16x128xbf16>, vector<128x256xbf16>, vector<16x256xf32> -> vector<16x256xf32>
    %c0_3 = arith.constant 0 : index
    %c0_4 = arith.constant 0 : index
    %3 = vector.load %arg3[%c0_3, %c0_4] : memref<1x256xf32, #tpu.memory_space<vmem>>, vector<1x256xf32>
    %4 = vector.broadcast %3 : vector<1x256xf32> to vector<16x256xf32>
    %5 = arith.addf %2, %4 : vector<16x256xf32>
    %cst_5 = arith.constant 0.000000e+00 : f32
    %6 = vector.broadcast %cst_5 : f32 to vector<16x256xf32>
    %7 = arith.maximumf %5, %6 : vector<16x256xf32>
    %8 = arith.truncf %7 : vector<16x256xf32> to vector<16x256xbf16>
    %c0_6 = arith.constant 0 : index
    %c0_7 = arith.constant 0 : index
    %9 = vector.load %arg4[%c0_6, %c0_7] : memref<256x512xbf16, #tpu.memory_space<vmem>>, vector<256x512xbf16>
    %cst_8 = arith.constant dense<0.000000e+00> : vector<16x512xf32>
    %10 = tpu.matmul %8, %9, %cst_8 {dimension_numbers = #tpu.dot_dimension_numbers<[1], [0], [0], [1], [0, 0, 1, 1], [], []>} : vector<16x256xbf16>, vector<256x512xbf16>, vector<16x512xf32> -> vector<16x512xf32>
    %c0_9 = arith.constant 0 : index
    %c0_10 = arith.constant 0 : index
    %11 = vector.load %arg5[%c0_9, %c0_10] : memref<1x512xf32, #tpu.memory_space<vmem>>, vector<1x512xf32>
    %12 = vector.broadcast %11 : vector<1x512xf32> to vector<16x512xf32>
    %13 = arith.addf %10, %12 : vector<16x512xf32>
    %cst_11 = arith.constant dense<0.000000e+00> : vector<512xf32>
    %14 = vector.multi_reduction <add>, %13, %cst_11 [0] : vector<16x512xf32> to vector<512xf32>
    %15 = vector.shape_cast %14 : vector<512xf32> to vector<1x512xf32>
    %c0_12 = arith.constant 0 : index
    %c0_13 = arith.constant 0 : index
    %c0_14 = arith.constant 0 : index
    %16 = vector.load %arg7[%c0_12, %c0_13, %c0_14] : memref<1x2x512xf32, #tpu.memory_space<vmem>>, vector<1x1x512xf32>
    %17 = vector.shape_cast %16 : vector<1x1x512xf32> to vector<1x512xf32>
    %18 = vector.shape_cast %15 : vector<1x512xf32> to vector<1x1x512xf32>
    tpu.vector_store %arg7[%c0_12, %c0_13, %c0_14], %18 {strides = array<i32>} : memref<1x2x512xf32, #tpu.memory_space<vmem>>, vector<1x1x512xf32>,
    %19 = arith.mulf %13, %13 : vector<16x512xf32>
    %cst_15 = arith.constant dense<0.000000e+00> : vector<512xf32>
    %20 = vector.multi_reduction <add>, %19, %cst_15 [0] : vector<16x512xf32> to vector<512xf32>
    %21 = vector.shape_cast %20 : vector<512xf32> to vector<1x512xf32>
    %c0_16 = arith.constant 0 : index
    %c1 = arith.constant 1 : index
    %c0_17 = arith.constant 0 : index
    %22 = vector.load %arg7[%c0_16, %c1, %c0_17] : memref<1x2x512xf32, #tpu.memory_space<vmem>>, vector<1x1x512xf32>
    %23 = vector.shape_cast %22 : vector<1x1x512xf32> to vector<1x512xf32>
    %24 = vector.shape_cast %21 : vector<1x512xf32> to vector<1x1x512xf32>
    tpu.vector_store %arg7[%c0_16, %c1, %c0_17], %24 {strides = array<i32>} : memref<1x2x512xf32, #tpu.memory_space<vmem>>, vector<1x1x512xf32>,
    %25 = arith.truncf %13 : vector<16x512xf32> to vector<16x512xbf16>
    %c0_18 = arith.constant 0 : index
    %c0_19 = arith.constant 0 : index
    %26 = vector.load %arg6[%c0_18, %c0_19] : memref<16x512xbf16, #tpu.memory_space<vmem>>, vector<16x512xbf16>
    tpu.vector_store %arg6[%c0_18, %c0_19], %25 {strides = array<i32>} : memref<16x512xbf16, #tpu.memory_space<vmem>>, vector<16x512xbf16>,
    return
  }
  func.func @transform_0(%arg0: i32) -> (i32, i32) {
    %c0_i32 = arith.constant 0 : i32
    %c0_i32_0 = arith.constant 0 : i32
    return %arg0, %c0_i32 : i32, i32
  }
  func.func @transform_1(%arg0: i32) -> (i32, i32) {
    %c0_i32 = arith.constant 0 : i32
    %c0_i32_0 = arith.constant 0 : i32
    %c0_i32_1 = arith.constant 0 : i32
    return %c0_i32, %c0_i32_0 : i32, i32
  }
  func.func @transform_2(%arg0: i32) -> (i32, i32) {
    %c0_i32 = arith.constant 0 : i32
    %c0_i32_0 = arith.constant 0 : i32
    %c0_i32_1 = arith.constant 0 : i32
    return %c0_i32, %c0_i32_0 : i32, i32
  }
  func.func @transform_3(%arg0: i32) -> (i32, i32) {
    %c0_i32 = arith.constant 0 : i32
    %c0_i32_0 = arith.constant 0 : i32
    %c0_i32_1 = arith.constant 0 : i32
    return %c0_i32, %c0_i32_0 : i32, i32
  }
  func.func @transform_4(%arg0: i32) -> (i32, i32) {
    %c0_i32 = arith.constant 0 : i32
    %c0_i32_0 = arith.constant 0 : i32
    %c0_i32_1 = arith.constant 0 : i32
    return %c0_i32, %c0_i32_0 : i32, i32
  }
  func.func @transform_5(%arg0: i32) -> (i32, i32) {
    %c0_i32 = arith.constant 0 : i32
    %c0_i32_0 = arith.constant 0 : i32
    return %arg0, %c0_i32 : i32, i32
  }
  func.func @transform_6(%arg0: i32) -> (i32, i32, i32) {
    %c0_i32 = arith.constant 0 : i32
    %c0_i32_0 = arith.constant 0 : i32
    %c0_i32_1 = arith.constant 0 : i32
    return %arg0, %c0_i32, %c0_i32_0 : i32, i32, i32
  }
}

module attributes {stable_mosaic.version = 11 : i64} {
  func.func @_bn_relu_conv_stats_kernel(%arg0: i32, %arg1: memref<16x512xbf16, #tpu.memory_space<vmem>>, %arg2: memref<1x512xf32, #tpu.memory_space<vmem>>, %arg3: memref<1x512xf32, #tpu.memory_space<vmem>>, %arg4: memref<512x1024xbf16, #tpu.memory_space<vmem>>, %arg5: memref<1x1024xf32, #tpu.memory_space<vmem>>, %arg6: memref<16x1024xbf16, #tpu.memory_space<vmem>>, %arg7: memref<1x2x1024xf32, #tpu.memory_space<vmem>>) attributes {dimension_semantics = [#tpu.dimension_semantics<parallel>], iteration_bounds = array<i64: 2>, scalar_prefetch = 0 : i64, scratch_operands = 0 : i64, tpu.core_type = #tpu.core_type<tc>, window_params = [{transform_indices = @transform_0, window_bounds = array<i64: 16, 512>}, {pipeline_mode = #tpu.pipeline_mode<synchronous>, transform_indices = @transform_1, window_bounds = array<i64: 1, 512>}, {pipeline_mode = #tpu.pipeline_mode<synchronous>, transform_indices = @transform_2, window_bounds = array<i64: 1, 512>}, {pipeline_mode = #tpu.pipeline_mode<synchronous>, transform_indices = @transform_3, window_bounds = array<i64: 512, 1024>}, {pipeline_mode = #tpu.pipeline_mode<synchronous>, transform_indices = @transform_4, window_bounds = array<i64: 1, 1024>}, {transform_indices = @transform_5, window_bounds = array<i64: 16, 1024>}, {transform_indices = @transform_6, window_bounds = array<i64: 1, 2, 1024>}]} {
    %c0 = arith.constant 0 : index
    %c0_0 = arith.constant 0 : index
    %0 = vector.load %arg1[%c0, %c0_0] : memref<16x512xbf16, #tpu.memory_space<vmem>>, vector<16x512xbf16>
    %1 = arith.extf %0 : vector<16x512xbf16> to vector<16x512xf32>
    %c0_1 = arith.constant 0 : index
    %c0_2 = arith.constant 0 : index
    %2 = vector.load %arg2[%c0_1, %c0_2] : memref<1x512xf32, #tpu.memory_space<vmem>>, vector<1x512xf32>
    %3 = vector.broadcast %2 : vector<1x512xf32> to vector<16x512xf32>
    %4 = arith.mulf %1, %3 : vector<16x512xf32>
    %c0_3 = arith.constant 0 : index
    %c0_4 = arith.constant 0 : index
    %5 = vector.load %arg3[%c0_3, %c0_4] : memref<1x512xf32, #tpu.memory_space<vmem>>, vector<1x512xf32>
    %6 = vector.broadcast %5 : vector<1x512xf32> to vector<16x512xf32>
    %7 = arith.addf %4, %6 : vector<16x512xf32>
    %cst = arith.constant 0.000000e+00 : f32
    %8 = vector.broadcast %cst : f32 to vector<16x512xf32>
    %9 = arith.maximumf %7, %8 : vector<16x512xf32>
    %10 = arith.truncf %9 : vector<16x512xf32> to vector<16x512xbf16>
    %c0_5 = arith.constant 0 : index
    %c0_6 = arith.constant 0 : index
    %11 = vector.load %arg4[%c0_5, %c0_6] : memref<512x1024xbf16, #tpu.memory_space<vmem>>, vector<512x1024xbf16>
    %cst_7 = arith.constant dense<0.000000e+00> : vector<16x1024xf32>
    %12 = tpu.matmul %10, %11, %cst_7 {dimension_numbers = #tpu.dot_dimension_numbers<[1], [0], [0], [1], [0, 0, 1, 1], [], []>} : vector<16x512xbf16>, vector<512x1024xbf16>, vector<16x1024xf32> -> vector<16x1024xf32>
    %c0_8 = arith.constant 0 : index
    %c0_9 = arith.constant 0 : index
    %13 = vector.load %arg5[%c0_8, %c0_9] : memref<1x1024xf32, #tpu.memory_space<vmem>>, vector<1x1024xf32>
    %14 = vector.broadcast %13 : vector<1x1024xf32> to vector<16x1024xf32>
    %15 = arith.addf %12, %14 : vector<16x1024xf32>
    %cst_10 = arith.constant dense<0.000000e+00> : vector<1024xf32>
    %16 = vector.multi_reduction <add>, %15, %cst_10 [0] : vector<16x1024xf32> to vector<1024xf32>
    %17 = vector.shape_cast %16 : vector<1024xf32> to vector<1x1024xf32>
    %c0_11 = arith.constant 0 : index
    %c0_12 = arith.constant 0 : index
    %c0_13 = arith.constant 0 : index
    %18 = vector.load %arg7[%c0_11, %c0_12, %c0_13] : memref<1x2x1024xf32, #tpu.memory_space<vmem>>, vector<1x1x1024xf32>
    %19 = vector.shape_cast %18 : vector<1x1x1024xf32> to vector<1x1024xf32>
    %20 = vector.shape_cast %17 : vector<1x1024xf32> to vector<1x1x1024xf32>
    tpu.vector_store %arg7[%c0_11, %c0_12, %c0_13], %20 {strides = array<i32>} : memref<1x2x1024xf32, #tpu.memory_space<vmem>>, vector<1x1x1024xf32>,
    %21 = arith.mulf %15, %15 : vector<16x1024xf32>
    %cst_14 = arith.constant dense<0.000000e+00> : vector<1024xf32>
    %22 = vector.multi_reduction <add>, %21, %cst_14 [0] : vector<16x1024xf32> to vector<1024xf32>
    %23 = vector.shape_cast %22 : vector<1024xf32> to vector<1x1024xf32>
    %c0_15 = arith.constant 0 : index
    %c1 = arith.constant 1 : index
    %c0_16 = arith.constant 0 : index
    %24 = vector.load %arg7[%c0_15, %c1, %c0_16] : memref<1x2x1024xf32, #tpu.memory_space<vmem>>, vector<1x1x1024xf32>
    %25 = vector.shape_cast %24 : vector<1x1x1024xf32> to vector<1x1024xf32>
    %26 = vector.shape_cast %23 : vector<1x1024xf32> to vector<1x1x1024xf32>
    tpu.vector_store %arg7[%c0_15, %c1, %c0_16], %26 {strides = array<i32>} : memref<1x2x1024xf32, #tpu.memory_space<vmem>>, vector<1x1x1024xf32>,
    %27 = arith.truncf %15 : vector<16x1024xf32> to vector<16x1024xbf16>
    %c0_17 = arith.constant 0 : index
    %c0_18 = arith.constant 0 : index
    %28 = vector.load %arg6[%c0_17, %c0_18] : memref<16x1024xbf16, #tpu.memory_space<vmem>>, vector<16x1024xbf16>
    tpu.vector_store %arg6[%c0_17, %c0_18], %27 {strides = array<i32>} : memref<16x1024xbf16, #tpu.memory_space<vmem>>, vector<16x1024xbf16>,
    return
  }
  func.func @transform_0(%arg0: i32) -> (i32, i32) {
    %c0_i32 = arith.constant 0 : i32
    %c0_i32_0 = arith.constant 0 : i32
    return %arg0, %c0_i32 : i32, i32
  }
  func.func @transform_1(%arg0: i32) -> (i32, i32) {
    %c0_i32 = arith.constant 0 : i32
    %c0_i32_0 = arith.constant 0 : i32
    %c0_i32_1 = arith.constant 0 : i32
    return %c0_i32, %c0_i32_0 : i32, i32
  }
  func.func @transform_2(%arg0: i32) -> (i32, i32) {
    %c0_i32 = arith.constant 0 : i32
    %c0_i32_0 = arith.constant 0 : i32
    %c0_i32_1 = arith.constant 0 : i32
    return %c0_i32, %c0_i32_0 : i32, i32
  }
  func.func @transform_3(%arg0: i32) -> (i32, i32) {
    %c0_i32 = arith.constant 0 : i32
    %c0_i32_0 = arith.constant 0 : i32
    %c0_i32_1 = arith.constant 0 : i32
    return %c0_i32, %c0_i32_0 : i32, i32
  }
  func.func @transform_4(%arg0: i32) -> (i32, i32) {
    %c0_i32 = arith.constant 0 : i32
    %c0_i32_0 = arith.constant 0 : i32
    %c0_i32_1 = arith.constant 0 : i32
    return %c0_i32, %c0_i32_0 : i32, i32
  }
  func.func @transform_5(%arg0: i32) -> (i32, i32) {
    %c0_i32 = arith.constant 0 : i32
    %c0_i32_0 = arith.constant 0 : i32
    return %arg0, %c0_i32 : i32, i32
  }
  func.func @transform_6(%arg0: i32) -> (i32, i32, i32) {
    %c0_i32 = arith.constant 0 : i32
    %c0_i32_0 = arith.constant 0 : i32
    %c0_i32_1 = arith.constant 0 : i32
    return %arg0, %c0_i32, %c0_i32_0 : i32, i32, i32
  }
}

module attributes {stable_mosaic.version = 11 : i64} {
  func.func @_bn_relu_conv_stats_kernel(%arg0: i32, %arg1: memref<16x1024xbf16, #tpu.memory_space<vmem>>, %arg2: memref<1x1024xf32, #tpu.memory_space<vmem>>, %arg3: memref<1x1024xf32, #tpu.memory_space<vmem>>, %arg4: memref<1024x512xbf16, #tpu.memory_space<vmem>>, %arg5: memref<1x512xf32, #tpu.memory_space<vmem>>, %arg6: memref<16x512xbf16, #tpu.memory_space<vmem>>, %arg7: memref<1x2x512xf32, #tpu.memory_space<vmem>>) attributes {dimension_semantics = [#tpu.dimension_semantics<parallel>], iteration_bounds = array<i64: 2>, scalar_prefetch = 0 : i64, scratch_operands = 0 : i64, tpu.core_type = #tpu.core_type<tc>, window_params = [{transform_indices = @transform_0, window_bounds = array<i64: 16, 1024>}, {pipeline_mode = #tpu.pipeline_mode<synchronous>, transform_indices = @transform_1, window_bounds = array<i64: 1, 1024>}, {pipeline_mode = #tpu.pipeline_mode<synchronous>, transform_indices = @transform_2, window_bounds = array<i64: 1, 1024>}, {pipeline_mode = #tpu.pipeline_mode<synchronous>, transform_indices = @transform_3, window_bounds = array<i64: 1024, 512>}, {pipeline_mode = #tpu.pipeline_mode<synchronous>, transform_indices = @transform_4, window_bounds = array<i64: 1, 512>}, {transform_indices = @transform_5, window_bounds = array<i64: 16, 512>}, {transform_indices = @transform_6, window_bounds = array<i64: 1, 2, 512>}]} {
    %c0 = arith.constant 0 : index
    %c0_0 = arith.constant 0 : index
    %0 = vector.load %arg1[%c0, %c0_0] : memref<16x1024xbf16, #tpu.memory_space<vmem>>, vector<16x1024xbf16>
    %1 = arith.extf %0 : vector<16x1024xbf16> to vector<16x1024xf32>
    %c0_1 = arith.constant 0 : index
    %c0_2 = arith.constant 0 : index
    %2 = vector.load %arg2[%c0_1, %c0_2] : memref<1x1024xf32, #tpu.memory_space<vmem>>, vector<1x1024xf32>
    %3 = vector.broadcast %2 : vector<1x1024xf32> to vector<16x1024xf32>
    %4 = arith.mulf %1, %3 : vector<16x1024xf32>
    %c0_3 = arith.constant 0 : index
    %c0_4 = arith.constant 0 : index
    %5 = vector.load %arg3[%c0_3, %c0_4] : memref<1x1024xf32, #tpu.memory_space<vmem>>, vector<1x1024xf32>
    %6 = vector.broadcast %5 : vector<1x1024xf32> to vector<16x1024xf32>
    %7 = arith.addf %4, %6 : vector<16x1024xf32>
    %cst = arith.constant 0.000000e+00 : f32
    %8 = vector.broadcast %cst : f32 to vector<16x1024xf32>
    %9 = arith.maximumf %7, %8 : vector<16x1024xf32>
    %10 = arith.truncf %9 : vector<16x1024xf32> to vector<16x1024xbf16>
    %c0_5 = arith.constant 0 : index
    %c0_6 = arith.constant 0 : index
    %11 = vector.load %arg4[%c0_5, %c0_6] : memref<1024x512xbf16, #tpu.memory_space<vmem>>, vector<1024x512xbf16>
    %cst_7 = arith.constant dense<0.000000e+00> : vector<16x512xf32>
    %12 = tpu.matmul %10, %11, %cst_7 {dimension_numbers = #tpu.dot_dimension_numbers<[1], [0], [0], [1], [0, 0, 1, 1], [], []>} : vector<16x1024xbf16>, vector<1024x512xbf16>, vector<16x512xf32> -> vector<16x512xf32>
    %c0_8 = arith.constant 0 : index
    %c0_9 = arith.constant 0 : index
    %13 = vector.load %arg5[%c0_8, %c0_9] : memref<1x512xf32, #tpu.memory_space<vmem>>, vector<1x512xf32>
    %14 = vector.broadcast %13 : vector<1x512xf32> to vector<16x512xf32>
    %15 = arith.addf %12, %14 : vector<16x512xf32>
    %cst_10 = arith.constant dense<0.000000e+00> : vector<512xf32>
    %16 = vector.multi_reduction <add>, %15, %cst_10 [0] : vector<16x512xf32> to vector<512xf32>
    %17 = vector.shape_cast %16 : vector<512xf32> to vector<1x512xf32>
    %c0_11 = arith.constant 0 : index
    %c0_12 = arith.constant 0 : index
    %c0_13 = arith.constant 0 : index
    %18 = vector.load %arg7[%c0_11, %c0_12, %c0_13] : memref<1x2x512xf32, #tpu.memory_space<vmem>>, vector<1x1x512xf32>
    %19 = vector.shape_cast %18 : vector<1x1x512xf32> to vector<1x512xf32>
    %20 = vector.shape_cast %17 : vector<1x512xf32> to vector<1x1x512xf32>
    tpu.vector_store %arg7[%c0_11, %c0_12, %c0_13], %20 {strides = array<i32>} : memref<1x2x512xf32, #tpu.memory_space<vmem>>, vector<1x1x512xf32>,
    %21 = arith.mulf %15, %15 : vector<16x512xf32>
    %cst_14 = arith.constant dense<0.000000e+00> : vector<512xf32>
    %22 = vector.multi_reduction <add>, %21, %cst_14 [0] : vector<16x512xf32> to vector<512xf32>
    %23 = vector.shape_cast %22 : vector<512xf32> to vector<1x512xf32>
    %c0_15 = arith.constant 0 : index
    %c1 = arith.constant 1 : index
    %c0_16 = arith.constant 0 : index
    %24 = vector.load %arg7[%c0_15, %c1, %c0_16] : memref<1x2x512xf32, #tpu.memory_space<vmem>>, vector<1x1x512xf32>
    %25 = vector.shape_cast %24 : vector<1x1x512xf32> to vector<1x512xf32>
    %26 = vector.shape_cast %23 : vector<1x512xf32> to vector<1x1x512xf32>
    tpu.vector_store %arg7[%c0_15, %c1, %c0_16], %26 {strides = array<i32>} : memref<1x2x512xf32, #tpu.memory_space<vmem>>, vector<1x1x512xf32>,
    %27 = arith.truncf %15 : vector<16x512xf32> to vector<16x512xbf16>
    %c0_17 = arith.constant 0 : index
    %c0_18 = arith.constant 0 : index
    %28 = vector.load %arg6[%c0_17, %c0_18] : memref<16x512xbf16, #tpu.memory_space<vmem>>, vector<16x512xbf16>
    tpu.vector_store %arg6[%c0_17, %c0_18], %27 {strides = array<i32>} : memref<16x512xbf16, #tpu.memory_space<vmem>>, vector<16x512xbf16>,
    return
  }
  func.func @transform_0(%arg0: i32) -> (i32, i32) {
    %c0_i32 = arith.constant 0 : i32
    %c0_i32_0 = arith.constant 0 : i32
    return %arg0, %c0_i32 : i32, i32
  }
  func.func @transform_1(%arg0: i32) -> (i32, i32) {
    %c0_i32 = arith.constant 0 : i32
    %c0_i32_0 = arith.constant 0 : i32
    %c0_i32_1 = arith.constant 0 : i32
    return %c0_i32, %c0_i32_0 : i32, i32
  }
  func.func @transform_2(%arg0: i32) -> (i32, i32) {
    %c0_i32 = arith.constant 0 : i32
    %c0_i32_0 = arith.constant 0 : i32
    %c0_i32_1 = arith.constant 0 : i32
    return %c0_i32, %c0_i32_0 : i32, i32
  }
  func.func @transform_3(%arg0: i32) -> (i32, i32) {
    %c0_i32 = arith.constant 0 : i32
    %c0_i32_0 = arith.constant 0 : i32
    %c0_i32_1 = arith.constant 0 : i32
    return %c0_i32, %c0_i32_0 : i32, i32
  }
  func.func @transform_4(%arg0: i32) -> (i32, i32) {
    %c0_i32 = arith.constant 0 : i32
    %c0_i32_0 = arith.constant 0 : i32
    %c0_i32_1 = arith.constant 0 : i32
    return %c0_i32, %c0_i32_0 : i32, i32
  }
  func.func @transform_5(%arg0: i32) -> (i32, i32) {
    %c0_i32 = arith.constant 0 : i32
    %c0_i32_0 = arith.constant 0 : i32
    return %arg0, %c0_i32 : i32, i32
  }
  func.func @transform_6(%arg0: i32) -> (i32, i32, i32) {
    %c0_i32 = arith.constant 0 : i32
    %c0_i32_0 = arith.constant 0 : i32
    %c0_i32_1 = arith.constant 0 : i32
    return %arg0, %c0_i32, %c0_i32_0 : i32, i32, i32
  }
}

module attributes {stable_mosaic.version = 11 : i64} {
  func.func @_bn_relu_conv_stats_kernel(%arg0: i32, %arg1: memref<16x512xbf16, #tpu.memory_space<vmem>>, %arg2: memref<1x512xf32, #tpu.memory_space<vmem>>, %arg3: memref<1x512xf32, #tpu.memory_space<vmem>>, %arg4: memref<512x256xbf16, #tpu.memory_space<vmem>>, %arg5: memref<1x256xf32, #tpu.memory_space<vmem>>, %arg6: memref<16x256xbf16, #tpu.memory_space<vmem>>, %arg7: memref<1x2x256xf32, #tpu.memory_space<vmem>>) attributes {dimension_semantics = [#tpu.dimension_semantics<parallel>], iteration_bounds = array<i64: 2>, scalar_prefetch = 0 : i64, scratch_operands = 0 : i64, tpu.core_type = #tpu.core_type<tc>, window_params = [{transform_indices = @transform_0, window_bounds = array<i64: 16, 512>}, {pipeline_mode = #tpu.pipeline_mode<synchronous>, transform_indices = @transform_1, window_bounds = array<i64: 1, 512>}, {pipeline_mode = #tpu.pipeline_mode<synchronous>, transform_indices = @transform_2, window_bounds = array<i64: 1, 512>}, {pipeline_mode = #tpu.pipeline_mode<synchronous>, transform_indices = @transform_3, window_bounds = array<i64: 512, 256>}, {pipeline_mode = #tpu.pipeline_mode<synchronous>, transform_indices = @transform_4, window_bounds = array<i64: 1, 256>}, {transform_indices = @transform_5, window_bounds = array<i64: 16, 256>}, {transform_indices = @transform_6, window_bounds = array<i64: 1, 2, 256>}]} {
    %c0 = arith.constant 0 : index
    %c0_0 = arith.constant 0 : index
    %0 = vector.load %arg1[%c0, %c0_0] : memref<16x512xbf16, #tpu.memory_space<vmem>>, vector<16x512xbf16>
    %1 = arith.extf %0 : vector<16x512xbf16> to vector<16x512xf32>
    %c0_1 = arith.constant 0 : index
    %c0_2 = arith.constant 0 : index
    %2 = vector.load %arg2[%c0_1, %c0_2] : memref<1x512xf32, #tpu.memory_space<vmem>>, vector<1x512xf32>
    %3 = vector.broadcast %2 : vector<1x512xf32> to vector<16x512xf32>
    %4 = arith.mulf %1, %3 : vector<16x512xf32>
    %c0_3 = arith.constant 0 : index
    %c0_4 = arith.constant 0 : index
    %5 = vector.load %arg3[%c0_3, %c0_4] : memref<1x512xf32, #tpu.memory_space<vmem>>, vector<1x512xf32>
    %6 = vector.broadcast %5 : vector<1x512xf32> to vector<16x512xf32>
    %7 = arith.addf %4, %6 : vector<16x512xf32>
    %cst = arith.constant 0.000000e+00 : f32
    %8 = vector.broadcast %cst : f32 to vector<16x512xf32>
    %9 = arith.maximumf %7, %8 : vector<16x512xf32>
    %10 = arith.truncf %9 : vector<16x512xf32> to vector<16x512xbf16>
    %c0_5 = arith.constant 0 : index
    %c0_6 = arith.constant 0 : index
    %11 = vector.load %arg4[%c0_5, %c0_6] : memref<512x256xbf16, #tpu.memory_space<vmem>>, vector<512x256xbf16>
    %cst_7 = arith.constant dense<0.000000e+00> : vector<16x256xf32>
    %12 = tpu.matmul %10, %11, %cst_7 {dimension_numbers = #tpu.dot_dimension_numbers<[1], [0], [0], [1], [0, 0, 1, 1], [], []>} : vector<16x512xbf16>, vector<512x256xbf16>, vector<16x256xf32> -> vector<16x256xf32>
    %c0_8 = arith.constant 0 : index
    %c0_9 = arith.constant 0 : index
    %13 = vector.load %arg5[%c0_8, %c0_9] : memref<1x256xf32, #tpu.memory_space<vmem>>, vector<1x256xf32>
    %14 = vector.broadcast %13 : vector<1x256xf32> to vector<16x256xf32>
    %15 = arith.addf %12, %14 : vector<16x256xf32>
    %cst_10 = arith.constant dense<0.000000e+00> : vector<256xf32>
    %16 = vector.multi_reduction <add>, %15, %cst_10 [0] : vector<16x256xf32> to vector<256xf32>
    %17 = vector.shape_cast %16 : vector<256xf32> to vector<1x256xf32>
    %c0_11 = arith.constant 0 : index
    %c0_12 = arith.constant 0 : index
    %c0_13 = arith.constant 0 : index
    %18 = vector.load %arg7[%c0_11, %c0_12, %c0_13] : memref<1x2x256xf32, #tpu.memory_space<vmem>>, vector<1x1x256xf32>
    %19 = vector.shape_cast %18 : vector<1x1x256xf32> to vector<1x256xf32>
    %20 = vector.shape_cast %17 : vector<1x256xf32> to vector<1x1x256xf32>
    tpu.vector_store %arg7[%c0_11, %c0_12, %c0_13], %20 {strides = array<i32>} : memref<1x2x256xf32, #tpu.memory_space<vmem>>, vector<1x1x256xf32>,
    %21 = arith.mulf %15, %15 : vector<16x256xf32>
    %cst_14 = arith.constant dense<0.000000e+00> : vector<256xf32>
    %22 = vector.multi_reduction <add>, %21, %cst_14 [0] : vector<16x256xf32> to vector<256xf32>
    %23 = vector.shape_cast %22 : vector<256xf32> to vector<1x256xf32>
    %c0_15 = arith.constant 0 : index
    %c1 = arith.constant 1 : index
    %c0_16 = arith.constant 0 : index
    %24 = vector.load %arg7[%c0_15, %c1, %c0_16] : memref<1x2x256xf32, #tpu.memory_space<vmem>>, vector<1x1x256xf32>
    %25 = vector.shape_cast %24 : vector<1x1x256xf32> to vector<1x256xf32>
    %26 = vector.shape_cast %23 : vector<1x256xf32> to vector<1x1x256xf32>
    tpu.vector_store %arg7[%c0_15, %c1, %c0_16], %26 {strides = array<i32>} : memref<1x2x256xf32, #tpu.memory_space<vmem>>, vector<1x1x256xf32>,
    %27 = arith.truncf %15 : vector<16x256xf32> to vector<16x256xbf16>
    %c0_17 = arith.constant 0 : index
    %c0_18 = arith.constant 0 : index
    %28 = vector.load %arg6[%c0_17, %c0_18] : memref<16x256xbf16, #tpu.memory_space<vmem>>, vector<16x256xbf16>
    tpu.vector_store %arg6[%c0_17, %c0_18], %27 {strides = array<i32>} : memref<16x256xbf16, #tpu.memory_space<vmem>>, vector<16x256xbf16>,
    return
  }
  func.func @transform_0(%arg0: i32) -> (i32, i32) {
    %c0_i32 = arith.constant 0 : i32
    %c0_i32_0 = arith.constant 0 : i32
    return %arg0, %c0_i32 : i32, i32
  }
  func.func @transform_1(%arg0: i32) -> (i32, i32) {
    %c0_i32 = arith.constant 0 : i32
    %c0_i32_0 = arith.constant 0 : i32
    %c0_i32_1 = arith.constant 0 : i32
    return %c0_i32, %c0_i32_0 : i32, i32
  }
  func.func @transform_2(%arg0: i32) -> (i32, i32) {
    %c0_i32 = arith.constant 0 : i32
    %c0_i32_0 = arith.constant 0 : i32
    %c0_i32_1 = arith.constant 0 : i32
    return %c0_i32, %c0_i32_0 : i32, i32
  }
  func.func @transform_3(%arg0: i32) -> (i32, i32) {
    %c0_i32 = arith.constant 0 : i32
    %c0_i32_0 = arith.constant 0 : i32
    %c0_i32_1 = arith.constant 0 : i32
    return %c0_i32, %c0_i32_0 : i32, i32
  }
  func.func @transform_4(%arg0: i32) -> (i32, i32) {
    %c0_i32 = arith.constant 0 : i32
    %c0_i32_0 = arith.constant 0 : i32
    %c0_i32_1 = arith.constant 0 : i32
    return %c0_i32, %c0_i32_0 : i32, i32
  }
  func.func @transform_5(%arg0: i32) -> (i32, i32) {
    %c0_i32 = arith.constant 0 : i32
    %c0_i32_0 = arith.constant 0 : i32
    return %arg0, %c0_i32 : i32, i32
  }
  func.func @transform_6(%arg0: i32) -> (i32, i32, i32) {
    %c0_i32 = arith.constant 0 : i32
    %c0_i32_0 = arith.constant 0 : i32
    %c0_i32_1 = arith.constant 0 : i32
    return %arg0, %c0_i32, %c0_i32_0 : i32, i32, i32
  }
}

module attributes {stable_mosaic.version = 11 : i64} {
  func.func @_bn_relu_conv_stats_kernel(%arg0: i32, %arg1: memref<16x256xbf16, #tpu.memory_space<vmem>>, %arg2: memref<1x256xf32, #tpu.memory_space<vmem>>, %arg3: memref<1x256xf32, #tpu.memory_space<vmem>>, %arg4: memref<256x160xbf16, #tpu.memory_space<vmem>>, %arg5: memref<1x160xf32, #tpu.memory_space<vmem>>, %arg6: memref<16x160xbf16, #tpu.memory_space<vmem>>, %arg7: memref<1x2x160xf32, #tpu.memory_space<vmem>>) attributes {dimension_semantics = [#tpu.dimension_semantics<parallel>], iteration_bounds = array<i64: 2>, scalar_prefetch = 0 : i64, scratch_operands = 0 : i64, tpu.core_type = #tpu.core_type<tc>, window_params = [{transform_indices = @transform_0, window_bounds = array<i64: 16, 256>}, {pipeline_mode = #tpu.pipeline_mode<synchronous>, transform_indices = @transform_1, window_bounds = array<i64: 1, 256>}, {pipeline_mode = #tpu.pipeline_mode<synchronous>, transform_indices = @transform_2, window_bounds = array<i64: 1, 256>}, {pipeline_mode = #tpu.pipeline_mode<synchronous>, transform_indices = @transform_3, window_bounds = array<i64: 256, 160>}, {pipeline_mode = #tpu.pipeline_mode<synchronous>, transform_indices = @transform_4, window_bounds = array<i64: 1, 160>}, {transform_indices = @transform_5, window_bounds = array<i64: 16, 160>}, {transform_indices = @transform_6, window_bounds = array<i64: 1, 2, 160>}]} {
    %c0 = arith.constant 0 : index
    %c0_0 = arith.constant 0 : index
    %0 = vector.load %arg1[%c0, %c0_0] : memref<16x256xbf16, #tpu.memory_space<vmem>>, vector<16x256xbf16>
    %1 = arith.extf %0 : vector<16x256xbf16> to vector<16x256xf32>
    %c0_1 = arith.constant 0 : index
    %c0_2 = arith.constant 0 : index
    %2 = vector.load %arg2[%c0_1, %c0_2] : memref<1x256xf32, #tpu.memory_space<vmem>>, vector<1x256xf32>
    %3 = vector.broadcast %2 : vector<1x256xf32> to vector<16x256xf32>
    %4 = arith.mulf %1, %3 : vector<16x256xf32>
    %c0_3 = arith.constant 0 : index
    %c0_4 = arith.constant 0 : index
    %5 = vector.load %arg3[%c0_3, %c0_4] : memref<1x256xf32, #tpu.memory_space<vmem>>, vector<1x256xf32>
    %6 = vector.broadcast %5 : vector<1x256xf32> to vector<16x256xf32>
    %7 = arith.addf %4, %6 : vector<16x256xf32>
    %cst = arith.constant 0.000000e+00 : f32
    %8 = vector.broadcast %cst : f32 to vector<16x256xf32>
    %9 = arith.maximumf %7, %8 : vector<16x256xf32>
    %10 = arith.truncf %9 : vector<16x256xf32> to vector<16x256xbf16>
    %c0_5 = arith.constant 0 : index
    %c0_6 = arith.constant 0 : index
    %11 = vector.load %arg4[%c0_5, %c0_6] : memref<256x160xbf16, #tpu.memory_space<vmem>>, vector<256x160xbf16>
    %cst_7 = arith.constant dense<0.000000e+00> : vector<16x160xf32>
    %12 = tpu.matmul %10, %11, %cst_7 {dimension_numbers = #tpu.dot_dimension_numbers<[1], [0], [0], [1], [0, 0, 1, 1], [], []>} : vector<16x256xbf16>, vector<256x160xbf16>, vector<16x160xf32> -> vector<16x160xf32>
    %c0_8 = arith.constant 0 : index
    %c0_9 = arith.constant 0 : index
    %13 = vector.load %arg5[%c0_8, %c0_9] : memref<1x160xf32, #tpu.memory_space<vmem>>, vector<1x160xf32>
    %14 = vector.broadcast %13 : vector<1x160xf32> to vector<16x160xf32>
    %15 = arith.addf %12, %14 : vector<16x160xf32>
    %cst_10 = arith.constant dense<0.000000e+00> : vector<160xf32>
    %16 = vector.multi_reduction <add>, %15, %cst_10 [0] : vector<16x160xf32> to vector<160xf32>
    %17 = vector.shape_cast %16 : vector<160xf32> to vector<1x160xf32>
    %c0_11 = arith.constant 0 : index
    %c0_12 = arith.constant 0 : index
    %c0_13 = arith.constant 0 : index
    %18 = vector.load %arg7[%c0_11, %c0_12, %c0_13] : memref<1x2x160xf32, #tpu.memory_space<vmem>>, vector<1x1x160xf32>
    %19 = vector.shape_cast %18 : vector<1x1x160xf32> to vector<1x160xf32>
    %20 = vector.shape_cast %17 : vector<1x160xf32> to vector<1x1x160xf32>
    tpu.vector_store %arg7[%c0_11, %c0_12, %c0_13], %20 {strides = array<i32>} : memref<1x2x160xf32, #tpu.memory_space<vmem>>, vector<1x1x160xf32>,
    %21 = arith.mulf %15, %15 : vector<16x160xf32>
    %cst_14 = arith.constant dense<0.000000e+00> : vector<160xf32>
    %22 = vector.multi_reduction <add>, %21, %cst_14 [0] : vector<16x160xf32> to vector<160xf32>
    %23 = vector.shape_cast %22 : vector<160xf32> to vector<1x160xf32>
    %c0_15 = arith.constant 0 : index
    %c1 = arith.constant 1 : index
    %c0_16 = arith.constant 0 : index
    %24 = vector.load %arg7[%c0_15, %c1, %c0_16] : memref<1x2x160xf32, #tpu.memory_space<vmem>>, vector<1x1x160xf32>
    %25 = vector.shape_cast %24 : vector<1x1x160xf32> to vector<1x160xf32>
    %26 = vector.shape_cast %23 : vector<1x160xf32> to vector<1x1x160xf32>
    tpu.vector_store %arg7[%c0_15, %c1, %c0_16], %26 {strides = array<i32>} : memref<1x2x160xf32, #tpu.memory_space<vmem>>, vector<1x1x160xf32>,
    %27 = arith.truncf %15 : vector<16x160xf32> to vector<16x160xbf16>
    %c0_17 = arith.constant 0 : index
    %c0_18 = arith.constant 0 : index
    %28 = vector.load %arg6[%c0_17, %c0_18] : memref<16x160xbf16, #tpu.memory_space<vmem>>, vector<16x160xbf16>
    tpu.vector_store %arg6[%c0_17, %c0_18], %27 {strides = array<i32>} : memref<16x160xbf16, #tpu.memory_space<vmem>>, vector<16x160xbf16>,
    return
  }
  func.func @transform_0(%arg0: i32) -> (i32, i32) {
    %c0_i32 = arith.constant 0 : i32
    %c0_i32_0 = arith.constant 0 : i32
    return %arg0, %c0_i32 : i32, i32
  }
  func.func @transform_1(%arg0: i32) -> (i32, i32) {
    %c0_i32 = arith.constant 0 : i32
    %c0_i32_0 = arith.constant 0 : i32
    %c0_i32_1 = arith.constant 0 : i32
    return %c0_i32, %c0_i32_0 : i32, i32
  }
  func.func @transform_2(%arg0: i32) -> (i32, i32) {
    %c0_i32 = arith.constant 0 : i32
    %c0_i32_0 = arith.constant 0 : i32
    %c0_i32_1 = arith.constant 0 : i32
    return %c0_i32, %c0_i32_0 : i32, i32
  }
  func.func @transform_3(%arg0: i32) -> (i32, i32) {
    %c0_i32 = arith.constant 0 : i32
    %c0_i32_0 = arith.constant 0 : i32
    %c0_i32_1 = arith.constant 0 : i32
    return %c0_i32, %c0_i32_0 : i32, i32
  }
  func.func @transform_4(%arg0: i32) -> (i32, i32) {
    %c0_i32 = arith.constant 0 : i32
    %c0_i32_0 = arith.constant 0 : i32
    %c0_i32_1 = arith.constant 0 : i32
    return %c0_i32, %c0_i32_0 : i32, i32
  }
  func.func @transform_5(%arg0: i32) -> (i32, i32) {
    %c0_i32 = arith.constant 0 : i32
    %c0_i32_0 = arith.constant 0 : i32
    return %arg0, %c0_i32 : i32, i32
  }
  func.func @transform_6(%arg0: i32) -> (i32, i32, i32) {
    %c0_i32 = arith.constant 0 : i32
    %c0_i32_0 = arith.constant 0 : i32
    %c0_i32_1 = arith.constant 0 : i32
    return %arg0, %c0_i32, %c0_i32_0 : i32, i32, i32
  }
}

module attributes {stable_mosaic.version = 11 : i64} {
  func.func @_bn_relu_lastconv_kernel(%arg0: i32, %arg1: memref<16x160xbf16, #tpu.memory_space<vmem>>, %arg2: memref<1x160xf32, #tpu.memory_space<vmem>>, %arg3: memref<1x160xf32, #tpu.memory_space<vmem>>, %arg4: memref<1x160xf32, #tpu.memory_space<vmem>>, %arg5: memref<1x1xf32, #tpu.memory_space<vmem>>, %arg6: memref<16x1xf32, #tpu.memory_space<vmem>>) attributes {dimension_semantics = [#tpu.dimension_semantics<parallel>], iteration_bounds = array<i64: 2>, scalar_prefetch = 0 : i64, scratch_operands = 0 : i64, tpu.core_type = #tpu.core_type<tc>, window_params = [{transform_indices = @transform_0, window_bounds = array<i64: 16, 160>}, {pipeline_mode = #tpu.pipeline_mode<synchronous>, transform_indices = @transform_1, window_bounds = array<i64: 1, 160>}, {pipeline_mode = #tpu.pipeline_mode<synchronous>, transform_indices = @transform_2, window_bounds = array<i64: 1, 160>}, {pipeline_mode = #tpu.pipeline_mode<synchronous>, transform_indices = @transform_3, window_bounds = array<i64: 1, 160>}, {pipeline_mode = #tpu.pipeline_mode<synchronous>, transform_indices = @transform_4, window_bounds = array<i64: 1, 1>}, {transform_indices = @transform_5, window_bounds = array<i64: 16, 1>}]} {
    %c0 = arith.constant 0 : index
    %c0_0 = arith.constant 0 : index
    %0 = vector.load %arg1[%c0, %c0_0] : memref<16x160xbf16, #tpu.memory_space<vmem>>, vector<16x160xbf16>
    %1 = arith.extf %0 : vector<16x160xbf16> to vector<16x160xf32>
    %c0_1 = arith.constant 0 : index
    %c0_2 = arith.constant 0 : index
    %2 = vector.load %arg2[%c0_1, %c0_2] : memref<1x160xf32, #tpu.memory_space<vmem>>, vector<1x160xf32>
    %3 = vector.broadcast %2 : vector<1x160xf32> to vector<16x160xf32>
    %4 = arith.mulf %1, %3 : vector<16x160xf32>
    %c0_3 = arith.constant 0 : index
    %c0_4 = arith.constant 0 : index
    %5 = vector.load %arg3[%c0_3, %c0_4] : memref<1x160xf32, #tpu.memory_space<vmem>>, vector<1x160xf32>
    %6 = vector.broadcast %5 : vector<1x160xf32> to vector<16x160xf32>
    %7 = arith.addf %4, %6 : vector<16x160xf32>
    %cst = arith.constant 0.000000e+00 : f32
    %8 = vector.broadcast %cst : f32 to vector<16x160xf32>
    %9 = arith.maximumf %7, %8 : vector<16x160xf32>
    %c0_5 = arith.constant 0 : index
    %c0_6 = arith.constant 0 : index
    %10 = vector.load %arg4[%c0_5, %c0_6] : memref<1x160xf32, #tpu.memory_space<vmem>>, vector<1x160xf32>
    %11 = vector.broadcast %10 : vector<1x160xf32> to vector<16x160xf32>
    %12 = arith.mulf %9, %11 : vector<16x160xf32>
    %cst_7 = arith.constant dense<0.000000e+00> : vector<16xf32>
    %13 = vector.multi_reduction <add>, %12, %cst_7 [1] : vector<16x160xf32> to vector<16xf32>
    %14 = vector.shape_cast %13 : vector<16xf32> to vector<16x1xf32>
    %c0_8 = arith.constant 0 : index
    %c0_9 = arith.constant 0 : index
    %15 = vector.load %arg5[%c0_8, %c0_9] : memref<1x1xf32, #tpu.memory_space<vmem>>, vector<1x1xf32>
    %16 = vector.broadcast %15 : vector<1x1xf32> to vector<16x1xf32>
    %17 = arith.addf %14, %16 : vector<16x1xf32>
    %c0_10 = arith.constant 0 : index
    %c0_11 = arith.constant 0 : index
    %18 = vector.load %arg6[%c0_10, %c0_11] : memref<16x1xf32, #tpu.memory_space<vmem>>, vector<16x1xf32>
    tpu.vector_store %arg6[%c0_10, %c0_11], %17 {strides = array<i32>} : memref<16x1xf32, #tpu.memory_space<vmem>>, vector<16x1xf32>,
    return
  }
  func.func @transform_0(%arg0: i32) -> (i32, i32) {
    %c0_i32 = arith.constant 0 : i32
    %c0_i32_0 = arith.constant 0 : i32
    return %arg0, %c0_i32 : i32, i32
  }
  func.func @transform_1(%arg0: i32) -> (i32, i32) {
    %c0_i32 = arith.constant 0 : i32
    %c0_i32_0 = arith.constant 0 : i32
    %c0_i32_1 = arith.constant 0 : i32
    return %c0_i32, %c0_i32_0 : i32, i32
  }
  func.func @transform_2(%arg0: i32) -> (i32, i32) {
    %c0_i32 = arith.constant 0 : i32
    %c0_i32_0 = arith.constant 0 : i32
    %c0_i32_1 = arith.constant 0 : i32
    return %c0_i32, %c0_i32_0 : i32, i32
  }
  func.func @transform_3(%arg0: i32) -> (i32, i32) {
    %c0_i32 = arith.constant 0 : i32
    %c0_i32_0 = arith.constant 0 : i32
    %c0_i32_1 = arith.constant 0 : i32
    return %c0_i32, %c0_i32_0 : i32, i32
  }
  func.func @transform_4(%arg0: i32) -> (i32, i32) {
    %c0_i32 = arith.constant 0 : i32
    %c0_i32_0 = arith.constant 0 : i32
    %c0_i32_1 = arith.constant 0 : i32
    return %c0_i32, %c0_i32_0 : i32, i32
  }
  func.func @transform_5(%arg0: i32) -> (i32, i32) {
    %c0_i32 = arith.constant 0 : i32
    %c0_i32_0 = arith.constant 0 : i32
    return %arg0, %c0_i32 : i32, i32
  }
}

</mosaic_0001>

<bundles_post_ra>
// kernel: generator_f0.7
= control target key start
LH: loop header
LB: loop body
LE: loop exit
PB: predicated region body
PF: predicated region fallthrough
CT: control target
= control target key end

     0   :  { %s522_s21 = smov 0   ;;  %s563_s0 = inlined_call_operand.vmem [shape: f32[32,1], index: 0, kind: input, shape index: {}]   ;;  %s564_s1 = inlined_call_operand.vmem [shape: f32[1,128], index: 1, kind: input, shape index: {}]   ;;  %s565_s2 = inlined_call_operand.vmem [shape: f32[1,128], index: 2, kind: input, shape index: {}]   ;;  %s566_s3 = inlined_call_operand.vmem [shape: f32[1,128], index: 3, kind: input, shape index: {}]   ;;  %s567_s4 = inlined_call_operand.vmem [shape: f32[1,128], index: 4, kind: input, shape index: {}]   ;;  %s568_s5 = inlined_call_operand.vmem [shape: bf16[32,128], index: 5, kind: output, shape index: {0}]   ;;  %s569_s6 = inlined_call_operand.vmem [shape: f32[2,2,128], index: 6, kind: output, shape index: {1}]  }
   0x1 LB: > { %s528_s22 = sadd.s32 4294967295, %s484_s21   ;;  %p443_p0 = scmp.ge.s32.totalorder %s484_s21, 1  ;;  %s484_s21 = sphi %s522_s21, %s17_s21  }
   0x2   : > { %p216_p1 = scmp.lt.s32.totalorder %s484_s21, 3 }
   0x4   : > { %p217_p2 = pnand %p443_p0, %p216_p1 }
   0x5   : > { %s444_s23 = sshll.u32 (!%p217_p2), %s528_s22, 1  ;;  %v486_v0 = vmov (!%p217_p2), 0   ;;  %v451_v3 = vld [vmem:[%s566_s3] ss:$0 sm:$0xff] (!%p217_p2)  ;;  %p262_p4 = scmp.lt.s32.totalorder (!%p217_p2), %s528_s22, 1 }
   0x6   : > { %220 = sbr.rel (%p217_p2) target bundleno = 189 (0xbd), region = 40  ;;  %473 = vset.pattern.permute.xlu0 (!%p217_p2), %v486_v0  ;;  %p251_p3 = scmp.lt.s32.totalorder (!%p217_p2), %s444_s23, 3  ;;  %v452_v5 = vld [vmem:[%s567_s4] ss:$0 sm:$0xff] (!%p217_p2) }
   0x7   : > { %v449_v13 = vld [vmem:[%s564_s1] ss:$0 sm:$0xff] (!%p217_p2) }
   0x8   : > { %v450_v17 = vld [vmem:[%s565_s2] ss:$0 sm:$0xff] (!%p217_p2) }
   0xd   : > { %s571_s23 = smov (!%p251_p3, %s444_s23), 3  ;;  %s573_s22 = smov (!%p262_p4, %s528_s22), 1 }
   0xe   : > { %s445_s24 = sshll.u32 %s571_s23, 3  ;;  %s447_s12 = sshll.u32 %s571_s23, 2 }
   0xf   : > { %s254_s27 = scalar_lea.vmem %s563_s0, %s445_s24  ;;  %s260_s15 = scalar_lea.vmem %s568_s5, %s447_s12 }
  0x10   : > { %v266_v1 = vld [vmem:[%s254_s27] sm:$0xff]  ;;  %v267_v2 = vld [vmem:[%s254_s27 + $0x8] sm:$0xff]  ;;  %s448_s16 = sshll.u32 %s573_s22, 1 }
  0x11   : > { %271 = vperm.xlu0 %473, %v266_v1   ;;  %s265_s19 = scalar_lea.vmem %s569_s6, %s448_s16 }
  0x15   : > { %276 = vperm.xlu0 %473, %v267_v2  }
  0x90   : > { %v272_v4 = vpop.permute.xlu0 %271 }
  0x91   : > { %v303_v6 = vmul.f32 %v451_v3, %v272_v4  ;;  %v285_v15 = vmul.f32 %v449_v13, %v272_v4 }
  0x93   : > { %v312_v7 = vadd.f32 %v452_v5, %v303_v6  ;;  %v294_v21 = vadd.f32 %v450_v17, %v285_v15 }
  0x94   : > { %v277_v8 = vpop.permute.xlu0 %276 }
  0x95   : > { %v314_v9 = vmul.f32 0.5, %v312_v7  ;;  %v304_v10 = vmul.f32 %v451_v3, %v277_v8  ;;  %v286_v19 = vmul.f32 %v449_v13, %v277_v8 }
  0x97   : > { %474 = vtanh.f32 %v314_v9  ;;  %v313_v11 = vadd.f32 %v452_v5, %v304_v10  ;;  %v295_v24 = vadd.f32 %v450_v17, %v286_v19 }
  0x99   : > { %v315_v12 = vmul.f32 0.5, %v313_v11 }
  0x9b   : > { %476 = vtanh.f32 %v315_v12 }
  0xa1   : > { %v475_v14 = vpop.eup %474 }
  0xa2   : > { %v318_v16 = vadd.f32 1.0, %v475_v14 }
  0xa4   : > { %v320_v18 = vmul.f32 0.5, %v318_v16 }
  0xa5   : > { %v477_v20 = vpop.eup %476 }
  0xa6   : > { %v319_v22 = vadd.f32 1.0, %v477_v20  ;;  %v322_v23 = vmul.f32 %v320_v18, %v294_v21 }
  0xa8   : > { %v321_v25 = vmul.f32 0.5, %v319_v22  ;;  %v332_v27 = vmul.f32 %v322_v23, %v322_v23 }
  0xaa   : > { %v323_v26 = vmul.f32 %v321_v25, %v295_v24 }
  0xac   : > { %v324_v28 = vadd.f32 %v323_v26, %v322_v23  ;;  %v333_v29 = vmul.f32 %v323_v26, %v323_v26  ;;  %v462_v30 = vpack.c.bf16 %v323_v26, %v322_v23 }
  0xae   : > { %v325_v31 = vrot.slane %v324_v28, 4  ;;  %v334_v32 = vadd.f32 %v333_v29, %v332_v27  ;;  %463 = vst [vmem:[%s260_s15] sm:$0xff] %v462_v30  }
  0xb0   : > { %v326_v33 = vadd.f32 %v325_v31, %v324_v28  ;;  %v335_v34 = vrot.slane %v334_v32, 4 }
  0xb2   : > { %v327_v35 = vrot.slane %v326_v33, 2  ;;  %v336_v36 = vadd.f32 %v335_v34, %v334_v32 }
  0xb4   : > { %v328_v37 = vadd.f32 %v327_v35, %v326_v33  ;;  %v337_v38 = vrot.slane %v336_v36, 2 }
  0xb6   : > { %v329_v39 = vrot.slane %v328_v37, 1  ;;  %v338_v40 = vadd.f32 %v337_v38, %v336_v36 }
  0xb8   : > { %v330_v41 = vadd.f32 %v329_v39, %v328_v37  ;;  %v339_v42 = vrot.slane %v338_v40, 1 }
  0xba   : > { %331 = vst [vmem:[%s265_s19] sm:$0x1] %v330_v41  ;;  %v340_v43 = vadd.f32 %v339_v42, %v338_v40 }
  0xbc   : > { %341 = vst [vmem:[%s265_s19 + $0x1] sm:$0x1] %v340_v43 }
  0xbd PF: > { %s17_s21 = sadd.s32 1, %s484_s21  }
  0xbe   : > { %p14_p5 = scmp.ge.s32.totalorder %s17_s21, 4  }
  0xc0   :  { %16 = sbr.rel (!%p14_p5) target bundleno = 1 (0x1), region = 82 }

// kernel: generator_f0.8
= control target key start
LH: loop header
LB: loop body
LE: loop exit
PB: predicated region body
PF: predicated region fallthrough
CT: control target
= control target key end

     0   :  { %12 = vsyncpa [#allocation3], 0  ;;  %s1535_s21 = smov 0   ;;  %s1684_s0 = inlined_call_operand.vmem [shape: bf16[32,128], index: 0, kind: input, shape index: {}]   ;;  %s1685_s1 = inlined_call_operand.vmem [shape: bf16[128,256], index: 1, kind: input, shape index: {}]   ;;  %s1686_s2 = inlined_call_operand.vmem [shape: f32[1,256], index: 2, kind: input, shape index: {}]   ;;  %s1687_s3 = inlined_call_operand.hbm [shape: bf16[256,512], index: 3, kind: input, shape index: {}]   ;;  %s1688_s4 = inlined_call_operand.vmem [shape: f32[1,512], index: 4, kind: input, shape index: {}]   ;;  %s1689_s5 = inlined_call_operand.vmem [shape: bf16[32,512], index: 5, kind: output, shape index: {0}]   ;;  %s1690_s6 = inlined_call_operand.vmem [shape: f32[2,2,512], index: 6, kind: output, shape index: {1}]  }
   0x1 LB: > { %s1541_s22 = sadd.s32 4294967295, %s1493_s21   ;;  %p1205_p0 = scmp.ge.s32.totalorder %s1493_s21, 1  ;;  %s1493_s21 = sphi %s1535_s21, %s18_s21  }
   0x2   : > { %p185_p1 = scmp.lt.s32.totalorder %s1493_s21, 3  ;;  %s1495_s23 = smov [#allocation2]  }
   0x3   : > { %s203_s24 = sshll.u32 %s1495_s23, 4  ;;  %p1691_p3 = scmp.eq.s32.totalorder %s1541_s22, 0  ;;  %s204_s24 = int_to_ptr.vmem [resolvable:$true] %s203_s24 }
   0x4   : > { %p1545_p2 = pnand %p1205_p0, %p185_p1  ;;  %s1455_s29 = scalar_lea.hbm %s1687_s3, 8192 }
   0x5   : > { %p1456_p6 = scmp.ne.s32.totalorder %s1687_s3, %s1455_s29  ;;  %p1462_p10 = scmp.lt.u32.totalorder %s1455_s29, %s1687_s3 }
   0x6   : > { %s1693_s25 = scalar_select %p1545_p2, 1, 0 }
   0x7   : > { %p1315_p4 = pneg %p1545_p2 }
   0x9   : > { %p1554_p5 = pnand %p1691_p3, %p1315_p4 }
   0xb   : > { %p1457_p7 = pneg %p1554_p5 }
   0xd   : > { %p1458_p8 = pnand %p1457_p7, %p1456_p6 }
   0xf   : > { %p1459_p9 = pneg %p1458_p8 }
  0x11   : > { %p1464_p11 = pnand %p1462_p10, %p1459_p9 }
  0x13   : > { %1467 = shalt.err (!%p1464_p11)
}
  0x14   : > { %s1468_s10 = scalar_lea.vmem %s204_s24, 8192  ;;  %p1476_p1 = scmp.lt.s32.totalorder %s204_s24, %s204_s24 }
  0x15   : > { %p1469_p12 = scmp.ne.s32.totalorder %s204_s24, %s1468_s10  ;;  %p1477_p4 = scmp.lt.s32.totalorder %s1468_s10, %s1468_s10 }
  0x17   : > { %p1471_p13 = pnand %p1469_p12, %p1457_p7  ;;  %p1478_p3 = por %p1477_p4, %p1476_p1 }
  0x19   : > { %p1472_p0 = pneg %p1471_p13 }
  0x1b   : > { %p1479_p2 = pnand %p1478_p3, %p1472_p0 }
  0x1d   : > { %1482 = shalt.err (!%p1479_p2)
}
  0x1e   : > { %s1496_s11 = smov 256   ;;  %s1497_s12 = smov 16  }
  0x1f   : > { %1318 = dma.hbm_to_vmem [thread:$0]  (!%p1554_p5), %s1687_s3, 8192, %s204_s24, [#allocation3], %s1496_s11, %s1496_s11, %s1497_s12  }
  0x20   : > { %p1695_p6 = scmp.ne.s32.totalorder %s1693_s25, 0 }
  0x21   : > { %p1696_p8 = scmp.eq.s32.totalorder (!%p1695_p6), %s1541_s22, 0 }
  0x22   : > { %231 = sbr.rel (%p1695_p6) target bundleno = 543 (0x21f), region = 40 }
  0x29   : > { %1488 = dma.done.wait (%p1696_p8), [#allocation3], 8192   ;;  %p1697_p7 = pmov %p1696_p8 }
  0x2a   : > { %v1498_v0 = vmov 0   ;;  %s1210_s15 = sshll.u32 %s1541_s22, 1  ;;  %v1334_v1 = vld [vmem:[%s1685_s1 + $0x4] ss:$8 sps:$4 sm:$0xff]   ;;  %v1336_v2 = vld [vmem:[%s1685_s1] ss:$8 sps:$4 sm:$0xff]  }
  0x2b   : > { %1490 = vsyncadd (%p1697_p7), [#allocation3], 4294959104  ;;  %434 = vmatprep.mubr.bf16.mxu0 %v1498_v0  ;;  %p268_p2 = scmp.lt.s32.totalorder %s1210_s15, 3  ;;  %402 = vmatprep.subr.bf16.mxu0 %v1334_v1  ;;  %v1337_v3 = vld [vmem:[%s1685_s1 + $0x14] ss:$8 sps:$4 sm:$0xff]   ;;  %p280_p3 = scmp.lt.s32.totalorder %s1541_s22, 1 }
  0x2c   : > { %403 = vmatpush1.bf16.msra.mxu0 %v1336_v2  ;;  %v1339_v4 = vld [vmem:[%s1685_s1 + $0x10] ss:$8 sps:$4 sm:$0xff]   ;;  %v1340_v5 = vld [vmem:[%s1685_s1 + $0x24] ss:$8 sps:$4 sm:$0xff]   ;;  %v1342_v6 = vld [vmem:[%s1685_s1 + $0x20] ss:$8 sps:$4 sm:$0xff]  }
  0x2d   : > { %s1699_s15 = smov (!%p268_p2, %s1210_s15), 3  ;;  %404 = vmatprep.subr.bf16.mxu0 %v1337_v3  ;;  %v1343_v7 = vld [vmem:[%s1685_s1 + $0x34] ss:$8 sps:$4 sm:$0xff]   ;;  %v1345_v8 = vld [vmem:[%s1685_s1 + $0x30] ss:$8 sps:$4 sm:$0xff]   ;;  %s1701_s22 = smov (!%p280_p3, %s1541_s22), 1 }
  0x2e   : > { %s1211_s28 = sshll.u32 %s1699_s15, 2  ;;  %v1346_v9 = vld [vmem:[%s1685_s1 + $0x44] ss:$8 sps:$4 sm:$0xff]   ;;  %v1348_v11 = vld [vmem:[%s1685_s1 + $0x40] ss:$8 sps:$4 sm:$0xff]   ;;  %s1305_s13 = sshll.u32 %s1699_s15, 4 }
  0x2f   : > { %s1608_s11 = scalar_lea.vmem %s1684_s0, %s1211_s28  ;;  %v1359_v10 = vld [vmem:[#allocation2 + $0x4] ss:$16 sps:$4 sm:$0xff]   ;;  %v1364_v12 = vld [vmem:[#allocation2] ss:$16 sps:$4 sm:$0xff]   ;;  %v1363_v26 = vld [vmem:[#allocation2 + $0xc] ss:$16 sps:$4 sm:$0xff]   ;;  %s1657_s17 = scalar_lea.vmem %s1689_s5, %s1305_s13 }
  0x30   : > { %405 = vmatpush1.bf16.msra.mxu0 %v1339_v4  ;;  %857 = vmatprep.subr.bf16.mxu1 %v1359_v10  ;;  %v1365_v13 = vld [vmem:[#allocation2 + $0x24] ss:$16 sps:$4 sm:$0xff]   ;;  %v1370_v15 = vld [vmem:[#allocation2 + $0x20] ss:$16 sps:$4 sm:$0xff]   ;;  %v1361_v30 = vld [vmem:[#allocation2 + $0x8] ss:$16 sps:$4 sm:$0xff]  }
  0x31   : > { %406 = vmatprep.subr.bf16.mxu0 %v1340_v5  ;;  %v1349_v14 = vld [vmem:[%s1685_s1 + $0x54] ss:$8 sps:$4 sm:$0xff]   ;;  %858 = vmatpush1.bf16.msra.mxu1 %v1364_v12  ;;  %v1351_v17 = vld [vmem:[%s1685_s1 + $0x50] ss:$8 sps:$4 sm:$0xff]   ;;  %v1352_v18 = vld [vmem:[%s1685_s1 + $0x64] ss:$8 sps:$4 sm:$0xff]  }
  0x32   : > { %859 = vmatprep.subr.bf16.mxu1 %v1365_v13  ;;  %v1371_v16 = vld [vmem:[#allocation2 + $0x44] ss:$16 sps:$4 sm:$0xff]   ;;  %v1376_v19 = vld [vmem:[#allocation2 + $0x40] ss:$16 sps:$4 sm:$0xff]   ;;  %v1369_v31 = vld [vmem:[#allocation2 + $0x2c] ss:$16 sps:$4 sm:$0xff]  }
  0x33   : > { %v1377_v20 = vld [vmem:[#allocation2 + $0x64] ss:$16 sps:$4 sm:$0xff]   ;;  %v1354_v21 = vld [vmem:[%s1685_s1 + $0x60] ss:$8 sps:$4 sm:$0xff]   ;;  %v1357_v25 = vld [vmem:[%s1685_s1 + $0x70] ss:$8 sps:$4 sm:$0xff]  }
  0x34   : > { %407 = vmatpush1.bf16.msra.mxu0 %v1342_v6  ;;  %v1355_v22 = vld [vmem:[%s1685_s1 + $0x74] ss:$8 sps:$4 sm:$0xff]   ;;  %v1382_v23 = vld [vmem:[#allocation2 + $0x60] ss:$16 sps:$4 sm:$0xff]   ;;  %v1367_v34 = vld [vmem:[#allocation2 + $0x28] ss:$16 sps:$4 sm:$0xff]  }
  0x35   : > { %408 = vmatprep.subr.bf16.mxu0 %v1343_v7  ;;  %860 = vmatpush1.bf16.msra.mxu1 %v1370_v15  ;;  %v1383_v24 = vld [vmem:[#allocation2 + $0x84] ss:$16 sps:$4 sm:$0xff]   ;;  %v1388_v27 = vld [vmem:[#allocation2 + $0x80] ss:$16 sps:$4 sm:$0xff]   ;;  %v1375_v35 = vld [vmem:[#allocation2 + $0x4c] ss:$16 sps:$4 sm:$0xff]  }
  0x36   : > { %861 = vmatprep.subr.bf16.mxu1 %v1371_v16  ;;  %v1389_v28 = vld [vmem:[#allocation2 + $0xa4] ss:$16 sps:$4 sm:$0xff]   ;;  %v1394_v32 = vld [vmem:[#allocation2 + $0xa0] ss:$16 sps:$4 sm:$0xff]   ;;  %v1373_v38 = vld [vmem:[#allocation2 + $0x48] ss:$16 sps:$4 sm:$0xff]  }
  0x37   : > { %v1358_v29 = vld [vmem:[%s1608_s11] sm:$0xff]   ;;  %v1381_v39 = vld [vmem:[#allocation2 + $0x6c] ss:$16 sps:$4 sm:$0xff]   ;;  %v1379_v42 = vld [vmem:[#allocation2 + $0x68] ss:$16 sps:$4 sm:$0xff]   ;;  %s1306_s15 = sshll.u32 %s1701_s22, 3 }
  0x38   : > { %409 = vmatpush1.bf16.msra.mxu0 %v1345_v8  ;;  %v1395_v33 = vld [vmem:[#allocation2 + $0xc4] ss:$16 sps:$4 sm:$0xff]   ;;  %v1400_v36 = vld [vmem:[#allocation2 + $0xc0] ss:$16 sps:$4 sm:$0xff]   ;;  %v1387_v43 = vld [vmem:[#allocation2 + $0x8c] ss:$16 sps:$4 sm:$0xff]   ;;  %s284_s20 = scalar_lea.vmem %s1690_s6, %s1306_s15 }
  0x39   : > { %410 = vmatprep.subr.bf16.mxu0 %v1346_v9  ;;  %862 = vmatpush1.bf16.msra.mxu1 %v1376_v19  ;;  %v1401_v37 = vld [vmem:[#allocation2 + $0xe4] ss:$16 sps:$4 sm:$0xff]   ;;  %v1406_v40 = vld [vmem:[#allocation2 + $0xe0] ss:$16 sps:$4 sm:$0xff]   ;;  %v1385_v46 = vld [vmem:[#allocation2 + $0x88] ss:$16 sps:$4 sm:$0xff]  }
  0x3a   : > { %863 = vmatprep.subr.bf16.mxu1 %v1377_v20  ;;  %v1407_v41 = vld [vmem:[#allocation2 + $0x104] ss:$16 sps:$4 sm:$0xff]   ;;  %v1412_v44 = vld [vmem:[#allocation2 + $0x100] ss:$16 sps:$4 sm:$0xff]   ;;  %v1393_v47 = vld [vmem:[#allocation2 + $0xac] ss:$16 sps:$4 sm:$0xff]  }
  0x3b   : > { %v1413_v45 = vld [vmem:[#allocation2 + $0x124] ss:$16 sps:$4 sm:$0xff]   ;;  %v1418_v48 = vld [vmem:[#allocation2 + $0x120] ss:$16 sps:$4 sm:$0xff]   ;;  %v1391_v50 = vld [vmem:[#allocation2 + $0xa8] ss:$16 sps:$4 sm:$0xff]  }
  0x3c   : > { %411 = vmatpush1.bf16.msra.mxu0 %v1348_v11  ;;  %v1419_v49 = vld [vmem:[#allocation2 + $0x144] ss:$16 sps:$4 sm:$0xff]   ;;  %v1399_v51 = vld [vmem:[#allocation2 + $0xcc] ss:$16 sps:$4 sm:$0xff]   ;;  %v1424_v52 = vld [vmem:[#allocation2 + $0x140] ss:$16 sps:$4 sm:$0xff]  }
  0x3d   : > { %412 = vmatprep.subr.bf16.mxu0 %v1349_v14  ;;  %864 = vmatpush1.bf16.msra.mxu1 %v1382_v23  ;;  %v1425_v53 = vld [vmem:[#allocation2 + $0x164] ss:$16 sps:$4 sm:$0xff]   ;;  %v1397_v54 = vld [vmem:[#allocation2 + $0xc8] ss:$16 sps:$4 sm:$0xff]   ;;  %v1405_v55 = vld [vmem:[#allocation2 + $0xec] ss:$16 sps:$4 sm:$0xff]  }
  0x3e   : > { %865 = vmatprep.subr.bf16.mxu1 %v1383_v24  ;;  %v1430_v56 = vld [vmem:[#allocation2 + $0x160] ss:$16 sps:$4 sm:$0xff]   ;;  %v1431_v57 = vld [vmem:[#allocation2 + $0x184] ss:$16 sps:$4 sm:$0xff]   ;;  %v1403_v58 = vld [vmem:[#allocation2 + $0xe8] ss:$16 sps:$4 sm:$0xff]  }
  0x3f   : > { %v1411_v59 = vld [vmem:[#allocation2 + $0x10c] ss:$16 sps:$4 sm:$0xff]   ;;  %v1436_v60 = vld [vmem:[#allocation2 + $0x180] ss:$16 sps:$4 sm:$0xff]   ;;  %v1437_v61 = vld [vmem:[#allocation2 + $0x1a4] ss:$16 sps:$4 sm:$0xff]  }
  0x40   : > { %413 = vmatpush1.bf16.msra.mxu0 %v1351_v17  ;;  %v1409_v62 = vld [vmem:[#allocation2 + $0x108] ss:$16 sps:$4 sm:$0xff]   ;;  %v1417_v63 = vld [vmem:[#allocation2 + $0x12c] ss:$16 sps:$4 sm:$0xff]   ;;  %v1442_v9 = vld [vmem:[#allocation2 + $0x1a0] ss:$16 sps:$4 sm:$0xff]  }
  0x41   : > { %414 = vmatprep.subr.bf16.mxu0 %v1352_v18  ;;  %866 = vmatpush1.bf16.msra.mxu1 %v1388_v27  ;;  %v1415_v0 = vld [vmem:[#allocation2 + $0x128] ss:$16 sps:$4 sm:$0xff]   ;;  %v1423_v1 = vld [vmem:[#allocation2 + $0x14c] ss:$16 sps:$4 sm:$0xff]   ;;  %v1443_v10 = vld [vmem:[#allocation2 + $0x1c4] ss:$16 sps:$4 sm:$0xff]   ;;  %v306_v18 = vlaneseq }
  0x42   : > { %867 = vmatprep.subr.bf16.mxu1 %v1389_v28  ;;  %v1421_v2 = vld [vmem:[#allocation2 + $0x148] ss:$16 sps:$4 sm:$0xff]   ;;  %v1429_v3 = vld [vmem:[#allocation2 + $0x16c] ss:$16 sps:$4 sm:$0xff]   ;;  %v1448_v13 = vld [vmem:[#allocation2 + $0x1c0] ss:$16 sps:$4 sm:$0xff]  }
  0x43   : > { %v1427_v4 = vld [vmem:[#allocation2 + $0x168] ss:$16 sps:$4 sm:$0xff]   ;;  %v1435_v5 = vld [vmem:[#allocation2 + $0x18c] ss:$16 sps:$4 sm:$0xff]   ;;  %v1449_v14 = vld [vmem:[#allocation2 + $0x1e4] ss:$16 sps:$4 sm:$0xff]  }
  0x44   : > { %415 = vmatpush1.bf16.msra.mxu0 %v1354_v21  ;;  %v1433_v6 = vld [vmem:[#allocation2 + $0x188] ss:$16 sps:$4 sm:$0xff]   ;;  %v1441_v7 = vld [vmem:[#allocation2 + $0x1ac] ss:$16 sps:$4 sm:$0xff]   ;;  %v1454_v17 = vld [vmem:[#allocation2 + $0x1e0] ss:$16 sps:$4 sm:$0xff]  }
  0x45   : > { %416 = vmatprep.subr.bf16.mxu0 %v1355_v22  ;;  %868 = vmatpush1.bf16.msra.mxu1 %v1394_v32  ;;  %v1439_v8 = vld [vmem:[#allocation2 + $0x1a8] ss:$16 sps:$4 sm:$0xff]   ;;  %v1447_v11 = vld [vmem:[#allocation2 + $0x1cc] ss:$16 sps:$4 sm:$0xff]   ;;  %v1639_v19 = vshrl.u32 %v306_v18, 7  ;;  %vm1002_vm0 = vcmp.lt.s32.totalorder %v306_v18, 512 }
  0x46   : > { %869 = vmatprep.subr.bf16.mxu1 %v1395_v33  ;;  %v1445_v12 = vld [vmem:[#allocation2 + $0x1c8] ss:$16 sps:$4 sm:$0xff]   ;;  %v1453_v15 = vld [vmem:[#allocation2 + $0x1ec] ss:$16 sps:$4 sm:$0xff]   ;;  %v304_v21 = vld [vmem:[%s1686_s2] sm:$0x3] }
  0x47   : > { %v1451_v16 = vld [vmem:[#allocation2 + $0x1e8] ss:$16 sps:$4 sm:$0xff]   ;;  %v308_v20 = vsub.s32 0, %v1639_v19  ;;  %v312_v22 = vsub.s32 1, %v1639_v19 }
  0x48   : > { %417 = vmatpush1.bf16.msra.mxu0 %v1357_v25 }
  0x49   : > { %900 = vmatprep.subr.bf16.mxu0 %v1363_v26  ;;  %870 = vmatpush1.bf16.msra.mxu1 %v1400_v36  ;;  %v309_v23 = vrot.slane %v304_v21, %v308_v20  ;;  %v313_v24 = vrot.slane %v304_v21, %v312_v22 }
  0x4a   : > { %871 = vmatprep.subr.bf16.mxu1 %v1401_v37 }
  0x4b   : > { %435 = vmatmul.mubr.bf16.vlgmr.msra.gmra.mrb[0].mxu0 %v1358_v29 }
  0x4c   : > { %901 = vmatpush1.bf16.msra.mxu0 %v1361_v30 }
  0x4d   : > { %902 = vmatprep.subr.bf16.mxu0 %v1369_v31  ;;  %872 = vmatpush1.bf16.msra.mxu1 %v1406_v40  ;;  %v515_v40 = vld [vmem:[%s1688_s4] sm:$0xf] }
  0x4e   : > { %873 = vmatprep.subr.bf16.mxu1 %v1407_v41  ;;  %v531_v41 = vsub.s32 3, %v1639_v19 }
  0x50   : > { %903 = vmatpush1.bf16.msra.mxu0 %v1367_v34 }
  0x51   : > { %904 = vmatprep.subr.bf16.mxu0 %v1375_v35  ;;  %874 = vmatpush1.bf16.msra.mxu1 %v1412_v44  ;;  %v524_v44 = vrot.slane %v515_v40, %v312_v22 }
  0x52   : > { %875 = vmatprep.subr.bf16.mxu1 %v1413_v45  ;;  %v532_v45 = vrot.slane %v515_v40, %v531_v41 }
  0x54   : > { %905 = vmatpush1.bf16.msra.mxu0 %v1373_v38 }
  0x55   : > { %906 = vmatprep.subr.bf16.mxu0 %v1381_v39  ;;  %876 = vmatpush1.bf16.msra.mxu1 %v1418_v48  ;;  %v527_v39 = vsub.s32 2, %v1639_v19 }
  0x56   : > { %877 = vmatprep.subr.bf16.mxu1 %v1419_v49 }
  0x58   : > { %907 = vmatpush1.bf16.msra.mxu0 %v1379_v42  ;;  %v520_v42 = vrot.slane %v515_v40, %v308_v20 }
  0x59   : > { %908 = vmatprep.subr.bf16.mxu0 %v1387_v43  ;;  %878 = vmatpush1.bf16.msra.mxu1 %v1424_v52  ;;  %v528_v43 = vrot.slane %v515_v40, %v527_v39 }
  0x5a   : > { %879 = vmatprep.subr.bf16.mxu1 %v1425_v53 }
  0x5c   : > { %909 = vmatpush1.bf16.msra.mxu0 %v1385_v46  ;;  %v1499_v46 = vmov 1966171168  }
  0x5d   : > { %910 = vmatprep.subr.bf16.mxu0 %v1393_v47  ;;  %880 = vmatpush1.bf16.msra.mxu1 %v1430_v56  ;;  %v1651_v47 = vunpack.c.l.s4 %v1499_v46 }
  0x5e   : > { %881 = vmatprep.subr.bf16.mxu1 %v1431_v57 }
  0x60   : > { %911 = vmatpush1.bf16.msra.mxu0 %v1391_v50 }
  0x61   : > { %912 = vmatprep.subr.bf16.mxu0 %v1399_v51  ;;  %882 = vmatpush1.bf16.msra.mxu1 %v1436_v60 }
  0x62   : > { %883 = vmatprep.subr.bf16.mxu1 %v1437_v61 }
  0x64   : > { %913 = vmatpush1.bf16.msra.mxu0 %v1397_v54 }
  0x65   : > { %914 = vmatprep.subr.bf16.mxu0 %v1405_v55  ;;  %884 = vmatpush1.bf16.msra.mxu1 %v1442_v9 }
  0x66   : > { %885 = vmatprep.subr.bf16.mxu1 %v1443_v10 }
  0x68   : > { %915 = vmatpush1.bf16.msra.mxu0 %v1403_v58  ;;  %v979_v58 = vunpack.c.0.s8 %v1651_v47 }
  0x69   : > { %916 = vmatprep.subr.bf16.mxu0 %v1411_v59  ;;  %886 = vmatpush1.bf16.msra.mxu1 %v1448_v13 }
  0x6a   : > { %887 = vmatprep.subr.bf16.mxu1 %v1449_v14 }
  0x6c   : > { %917 = vmatpush1.bf16.msra.mxu0 %v1409_v62 }
  0x6d   : > { %918 = vmatprep.subr.bf16.mxu0 %v1417_v63  ;;  %888 = vmatpush1.bf16.msra.mxu1 %v1454_v17 }
  0x70   : > { %919 = vmatpush1.bf16.msra.mxu0 %v1415_v0 }
  0x71   : > { %920 = vmatprep.subr.bf16.mxu0 %v1423_v1 }
  0x74   : > { %921 = vmatpush1.bf16.msra.mxu0 %v1421_v2 }
  0x75   : > { %922 = vmatprep.subr.bf16.mxu0 %v1429_v3 }
  0x78   : > { %923 = vmatpush1.bf16.msra.mxu0 %v1427_v4 }
  0x79   : > { %924 = vmatprep.subr.bf16.mxu0 %v1435_v5 }
  0x7c   : > { %925 = vmatpush1.bf16.msra.mxu0 %v1433_v6 }
  0x7d   : > { %926 = vmatprep.subr.bf16.mxu0 %v1441_v7 }
  0x80   : > { %927 = vmatpush1.bf16.msra.mxu0 %v1439_v8 }
  0x81   : > { %928 = vmatprep.subr.bf16.mxu0 %v1447_v11 }
  0x84   : > { %929 = vmatpush1.bf16.msra.mxu0 %v1445_v12 }
  0x85   : > { %930 = vmatprep.subr.bf16.mxu0 %v1453_v15 }
  0x88   : > { %931 = vmatpush1.bf16.msra.mxu0 %v1451_v16 }
 0x11e   : > { %v436_v25 = vpop.f32.mrb[0].mxu0 }
 0x11f   : > { %v437_v26 = vadd.f32 %v436_v25, %v309_v23  ;;  %v438_v27 = vpop.f32.mrb[1].mxu0 }
 0x120   : > { %v439_v28 = vadd.f32 %v438_v27, %v313_v24  ;;  %v440_v29 = vpop.f32.mrb[2].mxu0 }
 0x121   : > { %v441_v30 = vadd.f32 %v440_v29, %v309_v23  ;;  %v442_v31 = vpop.f32.mrb[3].mxu0  ;;  %v445_v33 = vmax.f32 %v437_v26, 0.0 }
 0x122   : > { %v443_v32 = vadd.f32 %v442_v31, %v313_v24  ;;  %v446_v35 = vmax.f32 %v439_v28, 0.0 }
 0x123   : > { %v447_v34 = vmax.f32 %v441_v30, 0.0 }
 0x124   : > { %v448_v36 = vmax.f32 %v443_v32, 0.0 }
 0x125   : > { %v449_v37 = vpack.c.bf16 %v447_v34, %v445_v33 }
 0x126   : > { %v450_v38 = vpack.c.bf16 %v448_v36, %v446_v35 }
 0x128   : > { %889 = vmatprep.mubr.bf16.mxu1 %v450_v38  ;;  %932 = vmatprep.mubr.bf16.mxu0 %v450_v38 }
 0x129   : > { %890 = vmatmul.mubr.bf16.vlgmr.msra.gmra.mrb[0].mxu1 %v449_v37  ;;  %933 = vmatmul.mubr.bf16.vlgmr.msra.gmra.mrb[4].mxu0 %v449_v37 }
 0x1fc   : > { %v891_v48 = vpop.f32.mrb[0].mxu1  ;;  %v934_v49 = vpop.f32.mrb[4].mxu0 }
 0x1fd   : > { %v892_v50 = vadd.f32 %v891_v48, %v520_v42  ;;  %v935_v51 = vadd.f32 %v934_v49, %v528_v43  ;;  %v893_v52 = vpop.f32.mrb[1].mxu1  ;;  %v936_v53 = vpop.f32.mrb[5].mxu0 }
 0x1fe   : > { %v894_v54 = vadd.f32 %v893_v52, %v524_v44  ;;  %v937_v55 = vadd.f32 %v936_v53, %v532_v45  ;;  %v895_v56 = vpop.f32.mrb[2].mxu1  ;;  %v938_v57 = vpop.f32.mrb[6].mxu0 }
 0x1ff   : > { %v896_v59 = vadd.f32 %v895_v56, %v520_v42  ;;  %v1660_v60 = vadd.f32 %v938_v57, %v528_v43  ;;  %v897_v61 = vpop.f32.mrb[3].mxu1  ;;  %v940_v62 = vpop.f32.mrb[7].mxu0  ;;  %v1005_v63 = vmul.f32 %v892_v50, %v892_v50  ;;  %v1007_v0 = vmul.f32 %v935_v51, %v935_v51 }
 0x200   : > { %v1307_v1 = vpack.c.bf16 %v894_v54, %v892_v50  ;;  %v1308_v2 = vpack.c.bf16 %v937_v55, %v935_v51  ;;  %v1006_v7 = vmul.f32 %v894_v54, %v894_v54  ;;  %v1008_v8 = vmul.f32 %v937_v55, %v937_v55 }
 0x201   : > { %v943_v3 = vadd.f32 %v896_v59, %v892_v50  ;;  %v1009_v4 = vmul.f32 %v896_v59, %v896_v59  ;;  %v957_v5 = vadd.f32 %v1660_v60, %v935_v51  ;;  %v1011_v6 = vmul.f32 %v1660_v60, %v1660_v60 }
 0x202   : > { %1096 = vst [vmem:[%s1657_s17] sm:$0xff] %v1307_v1  ;;  %1097 = vst [vmem:[%s1657_s17 + $0x8] sm:$0xff] %v1308_v2  ;;  %v898_v9 = vadd.f32 %v897_v61, %v524_v44  ;;  %v941_v10 = vadd.f32 %v940_v62, %v532_v45 }
 0x203   : > { %v944_v11 = vrot.slane %v943_v3, 4  ;;  %v1013_v12 = vadd.f32 %v1009_v4, %v1005_v63  ;;  %v958_v13 = vrot.slane %v957_v5, 4  ;;  %v1027_v14 = vadd.f32 %v1011_v6, %v1007_v0 }
 0x204   : > { %v950_v15 = vadd.f32 %v898_v9, %v894_v54  ;;  %v1010_v16 = vmul.f32 %v898_v9, %v898_v9  ;;  %v1309_v17 = vpack.c.bf16 %v898_v9, %v896_v59  ;;  %v964_v20 = vadd.f32 %v941_v10, %v937_v55 }
 0x205   : > { %v945_v21 = vadd.f32 %v944_v11, %v943_v3  ;;  %v1014_v22 = vrot.slane %v1013_v12, 4  ;;  %v959_v23 = vadd.f32 %v958_v13, %v957_v5  ;;  %v1028_v24 = vrot.slane %v1027_v14, 4 }
 0x206   : > { %v951_v25 = vrot.slane %v950_v15, 4  ;;  %v1020_v26 = vadd.f32 %v1010_v16, %v1006_v7  ;;  %1098 = vst [vmem:[%s1657_s17 + $0x10] sm:$0xff] %v1309_v17  ;;  %v965_v27 = vrot.slane %v964_v20, 4  ;;  %v1012_v28 = vmul.f32 %v941_v10, %v941_v10 }
 0x207   : > { %v946_v29 = vrot.slane %v945_v21, 2  ;;  %v1015_v30 = vadd.f32 %v1014_v22, %v1013_v12  ;;  %v960_v31 = vrot.slane %v959_v23, 2  ;;  %v1029_v32 = vadd.f32 %v1028_v24, %v1027_v14 }
 0x208   : > { %v952_v33 = vadd.f32 %v951_v25, %v950_v15  ;;  %v1021_v34 = vrot.slane %v1020_v26, 4  ;;  %v966_v35 = vadd.f32 %v965_v27, %v964_v20  ;;  %v1034_v36 = vadd.f32 %v1012_v28, %v1008_v8 }
 0x209   : > { %v947_v37 = vadd.f32 %v946_v29, %v945_v21  ;;  %v1016_v38 = vrot.slane %v1015_v30, 2  ;;  %v961_v39 = vadd.f32 %v960_v31, %v959_v23  ;;  %v1030_v40 = vrot.slane %v1029_v32, 2 }
 0x20a   : > { %v953_v41 = vrot.slane %v952_v33, 2  ;;  %v1022_v42 = vadd.f32 %v1021_v34, %v1020_v26  ;;  %v967_v43 = vrot.slane %v966_v35, 2  ;;  %v1035_v44 = vrot.slane %v1034_v36, 4 }
 0x20b   : > { %v948_v45 = vrot.slane %v947_v37, 1  ;;  %v1017_v46 = vadd.f32 %v1016_v38, %v1015_v30  ;;  %v962_v48 = vrot.slane %v961_v39, 1  ;;  %v1031_v49 = vadd.f32 %v1030_v40, %v1029_v32 }
 0x20c   : > { %v954_v50 = vadd.f32 %v953_v41, %v952_v33  ;;  %v1023_v51 = vrot.slane %v1022_v42, 2  ;;  %v968_v52 = vadd.f32 %v967_v43, %v966_v35  ;;  %v1036_v53 = vadd.f32 %v1035_v44, %v1034_v36 }
 0x20d   : > { %v949_v54 = vadd.f32 %v948_v45, %v947_v37  ;;  %v1018_v55 = vrot.slane %v1017_v46, 1  ;;  %v963_v56 = vadd.f32 %v962_v48, %v961_v39  ;;  %v1032_v57 = vrot.slane %v1031_v49, 1 }
 0x20e   : > { %v955_v59 = vrot.slane %v954_v50, 1  ;;  %v1024_v61 = vadd.f32 %v1023_v51, %v1022_v42  ;;  %v969_v62 = vrot.slane %v968_v52, 1  ;;  %v1037_v63 = vrot.slane %v1036_v53, 2 }
 0x20f   : > { %v982_v0 = vsub.s32 %v979_v58, %v1639_v19  ;;  %v1019_v1 = vadd.f32 %v1018_v55, %v1017_v46  ;;  %v1310_v2 = vpack.c.bf16 %v941_v10, %v1660_v60  ;;  %v1033_v7 = vadd.f32 %v1032_v57, %v1031_v49 }
 0x210   : > { %v956_v3 = vadd.f32 %v955_v59, %v954_v50  ;;  %v1025_v4 = vrot.slane %v1024_v61, 1  ;;  %v970_v5 = vadd.f32 %v969_v62, %v968_v52  ;;  %v1038_v6 = vadd.f32 %v1037_v63, %v1036_v53 }
 0x211   : > { %1099 = vst [vmem:[%s1657_s17 + $0x18] sm:$0xff] %v1310_v2 }
 0x212   : > { %v975_v8 = vcombine.low %v949_v54, %v956_v3  ;;  %v1026_v9 = vadd.f32 %v1025_v4, %v1024_v61  ;;  %v976_v11 = vcombine.low %v963_v56, %v970_v5  ;;  %v1039_v12 = vrot.slane %v1038_v6, 1 }
 0x214   : > { %v983_v13 = vrot.slane %v975_v8, %v982_v0  ;;  %v1045_v14 = vcombine.low %v1019_v1, %v1026_v9  ;;  %v990_v47 = vrot.slane %v976_v11, %v982_v0  ;;  %v1040_v19 = vadd.f32 %v1039_v12, %v1038_v6 }
 0x216   : > { %v1053_v58 = vrot.slane %v1045_v14, %v982_v0  ;;  %v991_v15 = vcombine.low %v983_v13, %v990_v47  ;;  %v1046_v60 = vcombine.low %v1033_v7, %v1040_v19 }
 0x218   : > { %v998_v10 = vrot.slane %v991_v15, %v982_v0  ;;  %v1060_v16 = vrot.slane %v1046_v60, %v982_v0 }
 0x21a   : > { %1004 = vst.msk [vmem:[%s284_s20] ss:$2 sm:$0xf] %vm1002_vm0, %v998_v10  ;;  %v1061_v17 = vcombine.low %v1053_v58, %v1060_v16 }
 0x21c   : > { %v1068_v20 = vrot.slane %v1061_v17, %v982_v0 }
 0x21e   : > { %1298 = vst.msk [vmem:[%s284_s20 + $0x1] ss:$2 sm:$0xf] %vm1002_vm0, %v1068_v20 }
 0x21f PF: > { %s18_s21 = sadd.s32 1, %s1493_s21  }
 0x220   : > { %p15_p5 = scmp.ge.s32.totalorder %s18_s21, 4  }
 0x222   :  { %17 = sbr.rel (!%p15_p5) target bundleno = 1 (0x1), region = 88 }
 0x229   :  { %1140 = vsyncpa [#allocation3], 1 }
 0x22a   :  { %1142 = vsyncpa [#allocation3 + $0x1], 1 }

// kernel: generator_f0.9
= control target key start
LH: loop header
LB: loop body
LE: loop exit
PB: predicated region body
PF: predicated region fallthrough
CT: control target
= control target key end

     0   :  { %12 = vsyncpa [#allocation3], 0  ;;  %s3126_s21 = smov 0   ;;  %s3349_s0 = inlined_call_operand.vmem [shape: bf16[32,512], index: 0, kind: input, shape index: {}]   ;;  %s3350_s1 = inlined_call_operand.vmem [shape: f32[1,512], index: 1, kind: input, shape index: {}]   ;;  %s3351_s2 = inlined_call_operand.vmem [shape: f32[1,512], index: 2, kind: input, shape index: {}]   ;;  %s3352_s3 = inlined_call_operand.hbm [shape: bf16[512,1024], index: 3, kind: input, shape index: {}]   ;;  %s3353_s4 = inlined_call_operand.vmem [shape: f32[1,1024], index: 4, kind: input, shape index: {}]   ;;  %s3354_s5 = inlined_call_operand.vmem [shape: bf16[32,1024], index: 5, kind: output, shape index: {0}]   ;;  %s3355_s6 = inlined_call_operand.vmem [shape: f32[2,2,1024], index: 6, kind: output, shape index: {1}]  }
   0x1 LB: > { %s3132_s22 = sadd.s32 4294967295, %s3085_s21   ;;  %p2702_p0 = scmp.ge.s32.totalorder %s3085_s21, 1  ;;  %s3085_s21 = sphi %s3126_s21, %s18_s21  }
   0x2   : > { %p185_p1 = scmp.lt.s32.totalorder %s3085_s21, 3  ;;  %s3087_s23 = smov [#allocation2]  }
   0x3   : > { %s203_s24 = sshll.u32 %s3087_s23, 4  ;;  %p3356_p3 = scmp.eq.s32.totalorder %s3132_s22, 0  ;;  %s204_s24 = int_to_ptr.vmem [resolvable:$true] %s203_s24 }
   0x4   : > { %p3136_p2 = pnand %p2702_p0, %p185_p1  ;;  %s3047_s29 = scalar_lea.hbm %s3352_s3, 32768 }
   0x5   : > { %p3048_p6 = scmp.ne.s32.totalorder %s3352_s3, %s3047_s29  ;;  %p3054_p10 = scmp.lt.u32.totalorder %s3047_s29, %s3352_s3 }
   0x6   : > { %s3358_s25 = scalar_select %p3136_p2, 1, 0 }
   0x7   : > { %p3029_p4 = pneg %p3136_p2 }
   0x9   : > { %p3145_p5 = pnand %p3356_p3, %p3029_p4 }
   0xb   : > { %p3049_p7 = pneg %p3145_p5 }
   0xd   : > { %p3050_p8 = pnand %p3049_p7, %p3048_p6 }
   0xf   : > { %p3051_p9 = pneg %p3050_p8 }
  0x11   : > { %p3056_p11 = pnand %p3054_p10, %p3051_p9 }
  0x13   : > { %3059 = shalt.err (!%p3056_p11)
}
  0x14   : > { %s3060_s10 = scalar_lea.vmem %s204_s24, 32768  ;;  %p3068_p1 = scmp.lt.s32.totalorder %s204_s24, %s204_s24 }
  0x15   : > { %p3061_p12 = scmp.ne.s32.totalorder %s204_s24, %s3060_s10  ;;  %p3069_p4 = scmp.lt.s32.totalorder %s3060_s10, %s3060_s10 }
  0x17   : > { %p3063_p13 = pnand %p3061_p12, %p3049_p7  ;;  %p3070_p3 = por %p3069_p4, %p3068_p1 }
  0x19   : > { %p3064_p0 = pneg %p3063_p13 }
  0x1b   : > { %p3071_p2 = pnand %p3070_p3, %p3064_p0 }
  0x1d   : > { %3074 = shalt.err (!%p3071_p2)
}
  0x1e   : > { %s3088_s11 = smov 512   ;;  %s3089_s12 = smov 32  }
  0x1f   : > { %3032 = dma.hbm_to_vmem [thread:$0]  (!%p3145_p5), %s3352_s3, 32768, %s204_s24, [#allocation3], %s3088_s11, %s3088_s11, %s3089_s12  }
  0x20   : > { %p3360_p6 = scmp.ne.s32.totalorder %s3358_s25, 0 }
  0x21   : > { %p3361_p8 = scmp.eq.s32.totalorder (!%p3360_p6), %s3132_s22, 0 }
  0x22   : > { %232 = sbr.rel (%p3360_p6) target bundleno = 550 (0x226), region = 40 }
  0x29   : > { %3080 = dma.done.wait (%p3361_p8), [#allocation3], 32768   ;;  %p3362_p7 = pmov %p3361_p8 }
  0x2a   : > { %v372_v0 = vld [vmem:[#allocation2] sm:$0xff]  ;;  %v373_v2 = vld [vmem:[#allocation2 + $0x8] sm:$0xff]  ;;  %s2707_s15 = sshll.u32 %s3132_s22, 1  ;;  %v302_v34 = vlaneseq  ;;  %p283_p3 = scmp.lt.s32.totalorder %s3132_s22, 1 }
  0x2b   : > { %3082 = vsyncadd (%p3362_p7), [#allocation3], 4294934528  ;;  %v376_v1 = vld [vmem:[#allocation2 + $0x20] sm:$0xff]  ;;  %v377_v4 = vld [vmem:[#allocation2 + $0x28] sm:$0xff]  ;;  %p270_p2 = scmp.lt.s32.totalorder %s2707_s15, 3 }
  0x2c   : > { %v2716_v3 = vcombine.high %v372_v0, %v376_v1  ;;  %v2715_v5 = vcombine.low %v372_v0, %v376_v1  ;;  %v380_v6 = vld [vmem:[#allocation2 + $0x40] sm:$0xff]  ;;  %v2718_v8 = vcombine.high %v373_v2, %v377_v4  ;;  %v2717_v9 = vcombine.low %v373_v2, %v377_v4  ;;  %v381_v11 = vld [vmem:[#allocation2 + $0x48] sm:$0xff]  ;;  %s3366_s22 = smov (!%p283_p3, %s3132_s22), 1 }
  0x2d   : > { %v384_v7 = vld [vmem:[#allocation2 + $0x60] sm:$0xff]  ;;  %v385_v12 = vld [vmem:[#allocation2 + $0x68] sm:$0xff]  ;;  %s3364_s15 = smov (!%p270_p2, %s2707_s15), 3  ;;  %v3175_v43 = vshrl.u32 %v302_v34, 7  ;;  %s2984_s8 = sshll.u32 %s3366_s22, 4 }
  0x2e   : > { %v2724_v10 = vcombine.high %v380_v6, %v384_v7  ;;  %v388_v13 = vld [vmem:[#allocation2 + $0x80] sm:$0xff]  ;;  %1950 = vmatprep.subr.bf16.mxu0 %v2716_v3  ;;  %v2726_v14 = vcombine.high %v381_v11, %v385_v12  ;;  %v389_v16 = vld [vmem:[#allocation2 + $0x88] sm:$0xff]  ;;  %2036 = vmatprep.subr.bf16.mxu1 %v2718_v8  ;;  %v2723_v18 = vcombine.low %v380_v6, %v384_v7  ;;  %s2982_s16 = sshll.u32 %s3364_s15, 4  ;;  %s2983_s28 = sshll.u32 %s3364_s15, 5 }
  0x2f   : > { %v392_v15 = vld [vmem:[#allocation2 + $0xa0] sm:$0xff]  ;;  %v393_v17 = vld [vmem:[#allocation2 + $0xa8] sm:$0xff]  ;;  %1951 = vmatpush1.bf16.msra.mxu0 %v2715_v5  ;;  %2037 = vmatpush1.bf16.msra.mxu1 %v2717_v9  ;;  %v2725_v19 = vcombine.low %v381_v11, %v385_v12  ;;  %s3180_s19 = scalar_lea.vmem %s3349_s0, %s2982_s16  ;;  %v3183_v52 = vsub.s32 1, %v3175_v43  ;;  %s3275_s7 = scalar_lea.vmem %s3354_s5, %s2983_s28 }
  0x30   : > { %1952 = vmatprep.subr.bf16.mxu0 %v2724_v10  ;;  %v2732_v20 = vcombine.high %v388_v13, %v392_v15  ;;  %2038 = vmatprep.subr.bf16.mxu1 %v2726_v14  ;;  %v2734_v21 = vcombine.high %v389_v16, %v393_v17  ;;  %v396_v22 = vld [vmem:[#allocation2 + $0xc0] sm:$0xff]  ;;  %v397_v24 = vld [vmem:[#allocation2 + $0xc8] sm:$0xff]  ;;  %v2731_v26 = vcombine.low %v388_v13, %v392_v15  ;;  %v3189_v58 = vld [vmem:[%s3180_s19 + $0x10] sm:$0xff]  ;;  %s287_s11 = scalar_lea.vmem %s3355_s6, %s2984_s8 }
  0x31   : > { %v400_v23 = vld [vmem:[#allocation2 + $0xe0] sm:$0xff]  ;;  %v401_v25 = vld [vmem:[#allocation2 + $0xe8] sm:$0xff]  ;;  %v2733_v27 = vcombine.low %v389_v16, %v393_v17  ;;  %v297_v62 = vunpack.c.h.bf16 %v3189_v58 }
  0x32   : > { %v2740_v28 = vcombine.high %v396_v22, %v400_v23  ;;  %v2742_v29 = vcombine.high %v397_v24, %v401_v25  ;;  %v404_v30 = vld [vmem:[#allocation2 + $0x100] sm:$0xff]  ;;  %v405_v32 = vld [vmem:[#allocation2 + $0x108] sm:$0xff]  ;;  %v2739_v35 = vcombine.low %v396_v22, %v400_v23  ;;  %v2741_v36 = vcombine.low %v397_v24, %v401_v25 }
  0x33   : > { %1953 = vmatpush1.bf16.msra.mxu0 %v2723_v18  ;;  %2039 = vmatpush1.bf16.msra.mxu1 %v2725_v19  ;;  %v408_v31 = vld [vmem:[#allocation2 + $0x120] sm:$0xff]  ;;  %v409_v33 = vld [vmem:[#allocation2 + $0x128] sm:$0xff] }
  0x34   : > { %1954 = vmatprep.subr.bf16.mxu0 %v2732_v20  ;;  %2040 = vmatprep.subr.bf16.mxu1 %v2734_v21  ;;  %v2748_v37 = vcombine.high %v404_v30, %v408_v31  ;;  %v2750_v38 = vcombine.high %v405_v32, %v409_v33  ;;  %v412_v39 = vld [vmem:[#allocation2 + $0x140] sm:$0xff]  ;;  %v413_v41 = vld [vmem:[#allocation2 + $0x148] sm:$0xff]  ;;  %v2747_v44 = vcombine.low %v404_v30, %v408_v31 }
  0x35   : > { %v416_v40 = vld [vmem:[#allocation2 + $0x160] sm:$0xff]  ;;  %v417_v42 = vld [vmem:[#allocation2 + $0x168] sm:$0xff]  ;;  %v2749_v45 = vcombine.low %v405_v32, %v409_v33 }
  0x36   : > { %v2756_v46 = vcombine.high %v412_v39, %v416_v40  ;;  %v2758_v47 = vcombine.high %v413_v41, %v417_v42  ;;  %v420_v48 = vld [vmem:[#allocation2 + $0x180] sm:$0xff]  ;;  %v421_v50 = vld [vmem:[#allocation2 + $0x188] sm:$0xff]  ;;  %v2755_v53 = vcombine.low %v412_v39, %v416_v40  ;;  %v2757_v54 = vcombine.low %v413_v41, %v417_v42 }
  0x37   : > { %1955 = vmatpush1.bf16.msra.mxu0 %v2731_v26  ;;  %2041 = vmatpush1.bf16.msra.mxu1 %v2733_v27  ;;  %v424_v49 = vld [vmem:[#allocation2 + $0x1a0] sm:$0xff]  ;;  %v425_v51 = vld [vmem:[#allocation2 + $0x1a8] sm:$0xff] }
  0x38   : > { %1956 = vmatprep.subr.bf16.mxu0 %v2740_v28  ;;  %2042 = vmatprep.subr.bf16.mxu1 %v2742_v29  ;;  %v2764_v55 = vcombine.high %v420_v48, %v424_v49  ;;  %v428_v56 = vld [vmem:[#allocation2 + $0x1c0] sm:$0xff]  ;;  %v2766_v59 = vcombine.high %v421_v50, %v425_v51  ;;  %v429_v1 = vld [vmem:[#allocation2 + $0x1c8] sm:$0xff]  ;;  %v2763_v5 = vcombine.low %v420_v48, %v424_v49 }
  0x39   : > { %v3186_v57 = vld [vmem:[%s3180_s19] sm:$0xff]  ;;  %v433_v2 = vld [vmem:[#allocation2 + $0x1e8] sm:$0xff]  ;;  %v2765_v6 = vcombine.low %v421_v50, %v425_v51  ;;  %v3212_v51 = vsub.s32 2, %v3175_v43 }
  0x3a   : > { %v432_v60 = vld [vmem:[#allocation2 + $0x1e0] sm:$0xff]  ;;  %v293_v61 = vunpack.c.h.bf16 %v3186_v57  ;;  %v2774_v10 = vcombine.high %v429_v1, %v433_v2  ;;  %v437_v13 = vld [vmem:[#allocation2 + $0x208] sm:$0xff]  ;;  %v2773_v18 = vcombine.low %v429_v1, %v433_v2  ;;  %v3220_v2 = vsub.s32 3, %v3175_v43 }
  0x3b   : > { %1957 = vmatpush1.bf16.msra.mxu0 %v2739_v35  ;;  %2043 = vmatpush1.bf16.msra.mxu1 %v2741_v36  ;;  %v3196_v63 = vld [vmem:[%s3350_s1] sm:$0xf]  ;;  %v2772_v7 = vcombine.high %v428_v56, %v432_v60  ;;  %v441_v14 = vld [vmem:[#allocation2 + $0x228] sm:$0xff]  ;;  %v2771_v17 = vcombine.low %v428_v56, %v432_v60  ;;  %v291_v60 = vld [vmem:[%s3180_s19 + $0x18] sm:$0xff] }
  0x3c   : > { %1958 = vmatprep.subr.bf16.mxu0 %v2748_v37  ;;  %2044 = vmatprep.subr.bf16.mxu1 %v2750_v38  ;;  %v3201_v0 = vld [vmem:[%s3351_s2] sm:$0xf]  ;;  %v309_v3 = vrot.slane %v3196_v63, %v3183_v52  ;;  %v2782_v22 = vcombine.high %v437_v13, %v441_v14  ;;  %v445_v25 = vld [vmem:[#allocation2 + $0x248] sm:$0xff]  ;;  %v2781_v29 = vcombine.low %v437_v13, %v441_v14 }
  0x3d   : > { %v339_v4 = vrot.slane %v3201_v0, %v3183_v52  ;;  %v436_v11 = vld [vmem:[#allocation2 + $0x200] sm:$0xff]  ;;  %v449_v26 = vld [vmem:[#allocation2 + $0x268] sm:$0xff]  ;;  %v343_v13 = vrot.slane %v3201_v0, %v3212_v51 }
  0x3e   : > { %v323_v8 = vmul.f32 %v309_v3, %v293_v61  ;;  %v327_v9 = vmul.f32 %v309_v3, %v297_v62  ;;  %v440_v12 = vld [vmem:[#allocation2 + $0x220] sm:$0xff]  ;;  %v2790_v31 = vcombine.high %v445_v25, %v449_v26  ;;  %v453_v34 = vld [vmem:[#allocation2 + $0x288] sm:$0xff]  ;;  %v2789_v37 = vcombine.low %v445_v25, %v449_v26 }
  0x3f   : > { %1959 = vmatpush1.bf16.msra.mxu0 %v2747_v44  ;;  %2045 = vmatpush1.bf16.msra.mxu1 %v2749_v45  ;;  %v2780_v19 = vcombine.high %v436_v11, %v440_v12  ;;  %v444_v23 = vld [vmem:[#allocation2 + $0x240] sm:$0xff]  ;;  %v2779_v28 = vcombine.low %v436_v11, %v440_v12  ;;  %v457_v35 = vld [vmem:[#allocation2 + $0x2a8] sm:$0xff]  ;;  %v296_v11 = vunpack.c.l.bf16 %v3189_v58 }
  0x40   : > { %1960 = vmatprep.subr.bf16.mxu0 %v2756_v46  ;;  %2046 = vmatprep.subr.bf16.mxu1 %v2758_v47  ;;  %v353_v15 = vadd.f32 %v339_v4, %v323_v8  ;;  %v357_v16 = vadd.f32 %v339_v4, %v327_v9  ;;  %v448_v24 = vld [vmem:[#allocation2 + $0x260] sm:$0xff]  ;;  %v2798_v39 = vcombine.high %v453_v34, %v457_v35  ;;  %v461_v42 = vld [vmem:[#allocation2 + $0x2c8] sm:$0xff]  ;;  %v298_v8 = vunpack.c.l.bf16 %v291_v60 }
  0x41   : > { %v2788_v30 = vcombine.high %v444_v23, %v448_v24  ;;  %v452_v32 = vld [vmem:[#allocation2 + $0x280] sm:$0xff]  ;;  %v2787_v36 = vcombine.low %v444_v23, %v448_v24  ;;  %v465_v44 = vld [vmem:[#allocation2 + $0x2e8] sm:$0xff]  ;;  %v2797_v46 = vcombine.low %v453_v34, %v457_v35  ;;  %v313_v9 = vrot.slane %v3196_v63, %v3212_v51 }
  0x42   : > { %v361_v20 = vmax.f32 %v353_v15, 0.0  ;;  %v365_v21 = vmax.f32 %v357_v16, 0.0  ;;  %v456_v33 = vld [vmem:[#allocation2 + $0x2a0] sm:$0xff]  ;;  %v2806_v48 = vcombine.high %v461_v42, %v465_v44  ;;  %v2805_v61 = vcombine.low %v461_v42, %v465_v44  ;;  %v485_v58 = vld [vmem:[#allocation2 + $0x388] sm:$0xff] }
  0x43   : > { %1961 = vmatpush1.bf16.msra.mxu0 %v2755_v53  ;;  %2047 = vmatpush1.bf16.msra.mxu1 %v2757_v54  ;;  %v2796_v38 = vcombine.high %v452_v32, %v456_v33  ;;  %v460_v40 = vld [vmem:[#allocation2 + $0x2c0] sm:$0xff]  ;;  %v2795_v45 = vcombine.low %v452_v32, %v456_v33  ;;  %v469_v53 = vld [vmem:[#allocation2 + $0x308] sm:$0xff]  ;;  %v328_v16 = vmul.f32 %v313_v9, %v298_v8  ;;  %v299_v23 = vunpack.c.h.bf16 %v291_v60 }
  0x44   : > { %1962 = vmatprep.subr.bf16.mxu0 %v2764_v55  ;;  %2048 = vmatprep.subr.bf16.mxu1 %v2766_v59  ;;  %v3207_v27 = vpack.c.bf16 %v365_v21, %v361_v20  ;;  %v464_v41 = vld [vmem:[#allocation2 + $0x2e0] sm:$0xff]  ;;  %v473_v54 = vld [vmem:[#allocation2 + $0x328] sm:$0xff]  ;;  %v3215_v55 = vsub.s32 0, %v3175_v43  ;;  %v317_v24 = vrot.slane %v3196_v63, %v3220_v2 }
  0x45   : > { %v2804_v47 = vcombine.high %v460_v40, %v464_v41  ;;  %v468_v49 = vld [vmem:[#allocation2 + $0x300] sm:$0xff]  ;;  %v2803_v56 = vcombine.low %v460_v40, %v464_v41  ;;  %v289_v59 = vld [vmem:[%s3180_s19 + $0x8] sm:$0xff]  ;;  %v2814_v3 = vcombine.high %v469_v53, %v473_v54  ;;  %v358_v26 = vadd.f32 %v343_v13, %v328_v16 }
  0x46   : > { %1982 = vmatprep.mubr.bf16.mxu0 %v3207_v27  ;;  %2068 = vmatprep.mubr.bf16.mxu1 %v3207_v27  ;;  %v472_v50 = vld [vmem:[#allocation2 + $0x320] sm:$0xff]  ;;  %v305_v12 = vrot.slane %v3196_v63, %v3215_v55  ;;  %v295_v21 = vunpack.c.h.bf16 %v289_v59  ;;  %v347_v40 = vrot.slane %v3201_v0, %v3220_v2  ;;  %v493_v42 = vld [vmem:[#allocation2 + $0x3c8] sm:$0xff] }
  0x47   : > { %1963 = vmatpush1.bf16.msra.mxu0 %v2763_v5  ;;  %2049 = vmatpush1.bf16.msra.mxu1 %v2765_v6  ;;  %v2812_v62 = vcombine.high %v468_v49, %v472_v50  ;;  %v476_v1 = vld [vmem:[#allocation2 + $0x340] sm:$0xff]  ;;  %v477_v5 = vld [vmem:[#allocation2 + $0x348] sm:$0xff]  ;;  %v2811_v14 = vcombine.low %v468_v49, %v472_v50  ;;  %v366_v33 = vmax.f32 %v358_v26, 0.0 }
  0x48   : > { %1964 = vmatprep.subr.bf16.mxu0 %v2772_v7  ;;  %2050 = vmatprep.subr.bf16.mxu1 %v2774_v10  ;;  %v480_v4 = vld [vmem:[#allocation2 + $0x360] sm:$0xff]  ;;  %v481_v6 = vld [vmem:[#allocation2 + $0x368] sm:$0xff]  ;;  %v294_v7 = vunpack.c.l.bf16 %v289_v59  ;;  %v292_v10 = vunpack.c.l.bf16 %v3186_v57  ;;  %v325_v63 = vmul.f32 %v317_v24, %v295_v21 }
  0x49   : > { %v484_v20 = vld [vmem:[#allocation2 + $0x380] sm:$0xff]  ;;  %v2821_v34 = vcombine.low %v477_v5, %v481_v6  ;;  %v497_v44 = vld [vmem:[#allocation2 + $0x3e8] sm:$0xff] }
  0x4a   : > { %v324_v15 = vmul.f32 %v313_v9, %v294_v7  ;;  %v488_v57 = vld [vmem:[#allocation2 + $0x3a0] sm:$0xff]  ;;  %v2838_v50 = vcombine.high %v493_v42, %v497_v44  ;;  %v501_v60 = vld [vmem:[#allocation2 + $0x408] sm:$0xff] }
  0x4b   : > { %1965 = vmatpush1.bf16.msra.mxu0 %v2771_v17  ;;  %2051 = vmatpush1.bf16.msra.mxu1 %v2773_v18  ;;  %v2813_v17 = vcombine.low %v469_v53, %v473_v54  ;;  %v2820_v18 = vcombine.high %v476_v1, %v480_v4  ;;  %v2828_v35 = vcombine.high %v484_v20, %v488_v57  ;;  %v500_v53 = vld [vmem:[#allocation2 + $0x400] sm:$0xff]  ;;  %v521_v21 = vld [vmem:[#allocation2 + $0x4a8] sm:$0xff] }
  0x4c   : > { %1966 = vmatprep.subr.bf16.mxu0 %v2780_v19  ;;  %2052 = vmatprep.subr.bf16.mxu1 %v2782_v22  ;;  %v2822_v19 = vcombine.high %v477_v5, %v481_v6  ;;  %v489_v22 = vld [vmem:[#allocation2 + $0x3a8] sm:$0xff]  ;;  %v354_v25 = vadd.f32 %v343_v13, %v324_v15  ;;  %v504_v54 = vld [vmem:[#allocation2 + $0x420] sm:$0xff] }
  0x4d   : > { %v508_v6 = vld [vmem:[#allocation2 + $0x440] sm:$0xff]  ;;  %v2843_v13 = vcombine.low %v500_v53, %v504_v54  ;;  %v525_v26 = vld [vmem:[#allocation2 + $0x4c8] sm:$0xff] }
  0x4e   : > { %v362_v32 = vmax.f32 %v354_v25, 0.0  ;;  %v512_v7 = vld [vmem:[#allocation2 + $0x460] sm:$0xff] }
  0x4f   : > { %1967 = vmatpush1.bf16.msra.mxu0 %v2779_v28  ;;  %2053 = vmatpush1.bf16.msra.mxu1 %v2781_v29  ;;  %v322_v28 = vmul.f32 %v305_v12, %v292_v10  ;;  %v326_v29 = vmul.f32 %v305_v12, %v296_v11  ;;  %v509_v11 = vld [vmem:[#allocation2 + $0x448] sm:$0xff]  ;;  %v2852_v15 = vcombine.high %v508_v6, %v512_v7  ;;  %v528_v25 = vld [vmem:[#allocation2 + $0x4e0] sm:$0xff] }
  0x50   : > { %1968 = vmatprep.subr.bf16.mxu0 %v2788_v30  ;;  %2054 = vmatprep.subr.bf16.mxu1 %v2790_v31  ;;  %v335_v30 = vrot.slane %v3201_v0, %v3215_v55  ;;  %v2819_v31 = vcombine.low %v476_v1, %v480_v4  ;;  %v3236_v41 = vpack.c.bf16 %v366_v33, %v362_v32  ;;  %v505_v0 = vld [vmem:[#allocation2 + $0x428] sm:$0xff]  ;;  %v532_v33 = vld [vmem:[#allocation2 + $0x500] sm:$0xff] }
  0x51   : > { %v2844_v4 = vcombine.high %v500_v53, %v504_v54  ;;  %v2846_v5 = vcombine.high %v501_v60, %v505_v0  ;;  %v513_v12 = vld [vmem:[#allocation2 + $0x468] sm:$0xff]  ;;  %v552_v53 = vld [vmem:[#allocation2 + $0x5a0] sm:$0xff] }
  0x52   : > { %v2854_v16 = vcombine.high %v509_v11, %v513_v12  ;;  %v549_v54 = vld [vmem:[#allocation2 + $0x588] sm:$0xff] }
  0x53   : > { %1969 = vmatpush1.bf16.msra.mxu0 %v2787_v36  ;;  %2055 = vmatpush1.bf16.msra.mxu1 %v2789_v37  ;;  %v2830_v36 = vcombine.high %v485_v58, %v489_v22  ;;  %v492_v37 = vld [vmem:[#allocation2 + $0x3c0] sm:$0xff] }
  0x54   : > { %1970 = vmatprep.subr.bf16.mxu0 %v2796_v38  ;;  %2056 = vmatprep.subr.bf16.mxu1 %v2798_v39  ;;  %v496_v38 = vld [vmem:[#allocation2 + $0x3e0] sm:$0xff]  ;;  %v329_v39 = vmul.f32 %v317_v24, %v299_v23 }
  0x55   : > { %v2836_v49 = vcombine.high %v492_v37, %v496_v38  ;;  %v2835_v1 = vcombine.low %v492_v37, %v496_v38  ;;  %v524_v24 = vld [vmem:[#allocation2 + $0x4c0] sm:$0xff] }
  0x56   : > { %v359_v59 = vadd.f32 %v347_v40, %v329_v39  ;;  %v2867_v37 = vcombine.low %v524_v24, %v528_v25 }
  0x57   : > { %1971 = vmatpush1.bf16.msra.mxu0 %v2795_v45  ;;  %2057 = vmatpush1.bf16.msra.mxu1 %v2797_v46  ;;  %v352_v45 = vadd.f32 %v335_v30, %v322_v28  ;;  %v356_v46 = vadd.f32 %v335_v30, %v326_v29  ;;  %v529_v28 = vld [vmem:[#allocation2 + $0x4e8] sm:$0xff] }
  0x58   : > { %1972 = vmatprep.subr.bf16.mxu0 %v2804_v47  ;;  %2058 = vmatprep.subr.bf16.mxu1 %v2806_v48  ;;  %v2827_v47 = vcombine.low %v484_v20, %v488_v57  ;;  %v2829_v48 = vcombine.low %v485_v58, %v489_v22  ;;  %v367_v9 = vmax.f32 %v359_v59, 0.0  ;;  %v517_v20 = vld [vmem:[#allocation2 + $0x488] sm:$0xff]  ;;  %v2851_v57 = vcombine.low %v508_v6, %v512_v7 }
  0x59   : > { %v2853_v58 = vcombine.low %v509_v11, %v513_v12  ;;  %v2862_v23 = vcombine.high %v517_v20, %v521_v21  ;;  %v2861_v30 = vcombine.low %v517_v20, %v521_v21  ;;  %v2870_v32 = vcombine.high %v525_v26, %v529_v28  ;;  %v568_v11 = vld [vmem:[#allocation2 + $0x620] sm:$0xff]  ;;  %v565_v12 = vld [vmem:[#allocation2 + $0x608] sm:$0xff] }
  0x5a   : > { %v2869_v38 = vcombine.low %v525_v26, %v529_v28  ;;  %v576_v20 = vld [vmem:[#allocation2 + $0x660] sm:$0xff]  ;;  %v573_v21 = vld [vmem:[#allocation2 + $0x648] sm:$0xff] }
  0x5b   : > { %1973 = vmatpush1.bf16.msra.mxu0 %v2803_v56  ;;  %2059 = vmatpush1.bf16.msra.mxu1 %v2805_v61  ;;  %v355_v56 = vadd.f32 %v347_v40, %v325_v63  ;;  %v360_v61 = vmax.f32 %v352_v45, 0.0  ;;  %v540_v40 = vld [vmem:[#allocation2 + $0x540] sm:$0xff]  ;;  %v545_v45 = vld [vmem:[#allocation2 + $0x568] sm:$0xff] }
  0x5c   : > { %1974 = vmatprep.subr.bf16.mxu0 %v2812_v62  ;;  %2060 = vmatprep.subr.bf16.mxu1 %v2814_v3  ;;  %v364_v62 = vmax.f32 %v356_v46, 0.0  ;;  %v2837_v3 = vcombine.low %v493_v42, %v497_v44  ;;  %v544_v42 = vld [vmem:[#allocation2 + $0x560] sm:$0xff]  ;;  %v541_v44 = vld [vmem:[#allocation2 + $0x548] sm:$0xff] }
  0x5d   : > { %v363_v8 = vmax.f32 %v355_v56, 0.0  ;;  %v553_v56 = vld [vmem:[#allocation2 + $0x5a8] sm:$0xff]  ;;  %v2883_v59 = vcombine.low %v540_v40, %v544_v42  ;;  %v584_v26 = vld [vmem:[#allocation2 + $0x6a0] sm:$0xff] }
  0x5e   : > { %v3238_v10 = vpack.c.bf16 %v364_v62, %v360_v61  ;;  %v2894_v61 = vcombine.high %v549_v54, %v553_v56  ;;  %v556_v62 = vld [vmem:[#allocation2 + $0x5c0] sm:$0xff]  ;;  %v2893_v6 = vcombine.low %v549_v54, %v553_v56  ;;  %v581_v28 = vld [vmem:[#allocation2 + $0x688] sm:$0xff] }
  0x5f   : > { %1975 = vmatpush1.bf16.msra.mxu0 %v2811_v14  ;;  %2061 = vmatpush1.bf16.msra.mxu1 %v2813_v17  ;;  %v2845_v14 = vcombine.low %v501_v60, %v505_v0  ;;  %v516_v17 = vld [vmem:[#allocation2 + $0x480] sm:$0xff]  ;;  %v2885_v60 = vcombine.low %v541_v44, %v545_v45  ;;  %v605_v56 = vld [vmem:[#allocation2 + $0x748] sm:$0xff] }
  0x60   : > { %1976 = vmatprep.subr.bf16.mxu0 %v2820_v18  ;;  %2062 = vmatprep.subr.bf16.mxu1 %v2822_v19  ;;  %v520_v18 = vld [vmem:[#allocation2 + $0x4a0] sm:$0xff]  ;;  %v3240_v19 = vpack.c.bf16 %v367_v9, %v363_v8 }
  0x61   : > { %v2860_v22 = vcombine.high %v516_v17, %v520_v18  ;;  %v2859_v29 = vcombine.low %v516_v17, %v520_v18  ;;  %v564_v9 = vld [vmem:[#allocation2 + $0x600] sm:$0xff] }
  0x62   : > { %v572_v18 = vld [vmem:[#allocation2 + $0x640] sm:$0xff] }
  0x63   : > { %1977 = vmatpush1.bf16.msra.mxu0 %v2819_v31  ;;  %2063 = vmatpush1.bf16.msra.mxu1 %v2821_v34  ;;  %v2868_v31 = vcombine.high %v524_v24, %v528_v25  ;;  %v536_v34 = vld [vmem:[#allocation2 + $0x520] sm:$0xff] }
  0x64   : > { %1978 = vmatprep.subr.bf16.mxu0 %v2828_v35  ;;  %2064 = vmatprep.subr.bf16.mxu1 %v2830_v36  ;;  %v533_v35 = vld [vmem:[#allocation2 + $0x508] sm:$0xff]  ;;  %v2876_v63 = vcombine.high %v532_v33, %v536_v34  ;;  %v2875_v46 = vcombine.low %v532_v33, %v536_v34  ;;  %v580_v25 = vld [vmem:[#allocation2 + $0x680] sm:$0xff] }
  0x65   : > { %v537_v36 = vld [vmem:[#allocation2 + $0x528] sm:$0xff]  ;;  %v588_v34 = vld [vmem:[#allocation2 + $0x6c0] sm:$0xff] }
  0x66   : > { %v2878_v39 = vcombine.high %v533_v35, %v537_v36  ;;  %v608_v54 = vld [vmem:[#allocation2 + $0x760] sm:$0xff] }
  0x67   : > { %1979 = vmatpush1.bf16.msra.mxu0 %v2827_v47  ;;  %2065 = vmatpush1.bf16.msra.mxu1 %v2829_v48  ;;  %v2877_v47 = vcombine.low %v533_v35, %v537_v36  ;;  %v2884_v48 = vcombine.high %v540_v40, %v544_v42  ;;  %v592_v35 = vld [vmem:[#allocation2 + $0x6e0] sm:$0xff]  ;;  %v589_v36 = vld [vmem:[#allocation2 + $0x6c8] sm:$0xff] }
  0x68   : > { %1980 = vmatprep.subr.bf16.mxu0 %v2836_v49  ;;  %2066 = vmatprep.subr.bf16.mxu1 %v2838_v50  ;;  %v2886_v49 = vcombine.high %v541_v44, %v545_v45  ;;  %v548_v50 = vld [vmem:[#allocation2 + $0x580] sm:$0xff]  ;;  %v597_v45 = vld [vmem:[#allocation2 + $0x708] sm:$0xff] }
  0x69   : > { %v2892_v0 = vcombine.high %v548_v50, %v552_v53  ;;  %v596_v42 = vld [vmem:[#allocation2 + $0x700] sm:$0xff] }
  0x6a   : > { %v600_v44 = vld [vmem:[#allocation2 + $0x720] sm:$0xff] }
  0x6b   : > { %1981 = vmatpush1.bf16.msra.mxu0 %v2835_v1  ;;  %2067 = vmatpush1.bf16.msra.mxu1 %v2837_v3  ;;  %v560_v1 = vld [vmem:[#allocation2 + $0x5e0] sm:$0xff]  ;;  %v557_v3 = vld [vmem:[#allocation2 + $0x5c8] sm:$0xff] }
  0x6c   : > { %1993 = vmatprep.subr.bf16.mxu0 %v2844_v4  ;;  %2079 = vmatprep.subr.bf16.mxu1 %v2846_v5  ;;  %v561_v4 = vld [vmem:[#allocation2 + $0x5e8] sm:$0xff]  ;;  %v2891_v5 = vcombine.low %v548_v50, %v552_v53  ;;  %v2900_v7 = vcombine.high %v556_v62, %v560_v1  ;;  %v604_v53 = vld [vmem:[#allocation2 + $0x740] sm:$0xff] }
  0x6d   : > { %v2902_v8 = vcombine.high %v557_v3, %v561_v4 }
  0x6e   : > { %1983 = vmatmul.mubr.bf16.vlgmr.msra.gmra.mrb[0].mxu0 %v3238_v10  ;;  %2069 = vmatmul.mubr.bf16.vlgmr.msra.gmra.mrb[0].mxu1 %v3238_v10 }
  0x6f   : > { %1994 = vmatpush1.bf16.msra.mxu0 %v2843_v13  ;;  %2080 = vmatpush1.bf16.msra.mxu1 %v2845_v14  ;;  %v569_v13 = vld [vmem:[#allocation2 + $0x628] sm:$0xff]  ;;  %v2899_v14 = vcombine.low %v556_v62, %v560_v1  ;;  %v612_v1 = vld [vmem:[#allocation2 + $0x780] sm:$0xff] }
  0x70   : > { %1995 = vmatprep.subr.bf16.mxu0 %v2852_v15  ;;  %2081 = vmatprep.subr.bf16.mxu1 %v2854_v16  ;;  %v2901_v15 = vcombine.low %v557_v3, %v561_v4  ;;  %v2908_v16 = vcombine.high %v564_v9, %v568_v11  ;;  %v2910_v17 = vcombine.high %v565_v12, %v569_v13  ;;  %v616_v3 = vld [vmem:[#allocation2 + $0x7a0] sm:$0xff]  ;;  %v613_v4 = vld [vmem:[#allocation2 + $0x788] sm:$0xff] }
  0x71   : > { %2025 = vmatprep.mubr.bf16.mxu0 %v3240_v19  ;;  %2111 = vmatprep.mubr.bf16.mxu1 %v3240_v19 }
  0x73   : > { %1996 = vmatpush1.bf16.msra.mxu0 %v2851_v57  ;;  %2082 = vmatpush1.bf16.msra.mxu1 %v2853_v58  ;;  %v577_v57 = vld [vmem:[#allocation2 + $0x668] sm:$0xff]  ;;  %v2907_v58 = vcombine.low %v564_v9, %v568_v11  ;;  %v620_v11 = vld [vmem:[#allocation2 + $0x7c0] sm:$0xff] }
  0x74   : > { %1997 = vmatprep.subr.bf16.mxu0 %v2860_v22  ;;  %2083 = vmatprep.subr.bf16.mxu1 %v2862_v23  ;;  %v2909_v22 = vcombine.low %v565_v12, %v569_v13  ;;  %v2916_v23 = vcombine.high %v572_v18, %v576_v20  ;;  %v2918_v24 = vcombine.high %v573_v21, %v577_v57  ;;  %v624_v12 = vld [vmem:[#allocation2 + $0x7e0] sm:$0xff]  ;;  %v621_v13 = vld [vmem:[#allocation2 + $0x7c8] sm:$0xff] }
  0x77   : > { %1998 = vmatpush1.bf16.msra.mxu0 %v2859_v29  ;;  %2084 = vmatpush1.bf16.msra.mxu1 %v2861_v30  ;;  %v585_v29 = vld [vmem:[#allocation2 + $0x6a8] sm:$0xff]  ;;  %v2915_v30 = vcombine.low %v572_v18, %v576_v20  ;;  %v374_v20 = vld [vmem:[#allocation2 + $0x10] sm:$0xff] }
  0x78   : > { %1999 = vmatprep.subr.bf16.mxu0 %v2868_v31  ;;  %2085 = vmatprep.subr.bf16.mxu1 %v2870_v32  ;;  %v2917_v31 = vcombine.low %v573_v21, %v577_v57  ;;  %v2924_v32 = vcombine.high %v580_v25, %v584_v26  ;;  %v2926_v33 = vcombine.high %v581_v28, %v585_v29  ;;  %v378_v21 = vld [vmem:[#allocation2 + $0x30] sm:$0xff]  ;;  %v375_v57 = vld [vmem:[#allocation2 + $0x18] sm:$0xff] }
  0x7b   : > { %2000 = vmatpush1.bf16.msra.mxu0 %v2867_v37  ;;  %2086 = vmatpush1.bf16.msra.mxu1 %v2869_v38  ;;  %v593_v37 = vld [vmem:[#allocation2 + $0x6e8] sm:$0xff]  ;;  %v2923_v38 = vcombine.low %v580_v25, %v584_v26  ;;  %v382_v26 = vld [vmem:[#allocation2 + $0x50] sm:$0xff] }
  0x7c   : > { %2001 = vmatprep.subr.bf16.mxu0 %v2876_v63  ;;  %2087 = vmatprep.subr.bf16.mxu1 %v2878_v39  ;;  %v2925_v63 = vcombine.low %v581_v28, %v585_v29  ;;  %v2932_v39 = vcombine.high %v588_v34, %v592_v35  ;;  %v2934_v40 = vcombine.high %v589_v36, %v593_v37  ;;  %v386_v28 = vld [vmem:[#allocation2 + $0x70] sm:$0xff]  ;;  %v383_v29 = vld [vmem:[#allocation2 + $0x58] sm:$0xff] }
  0x7f   : > { %2002 = vmatpush1.bf16.msra.mxu0 %v2875_v46  ;;  %2088 = vmatpush1.bf16.msra.mxu1 %v2877_v47  ;;  %v601_v46 = vld [vmem:[#allocation2 + $0x728] sm:$0xff]  ;;  %v2931_v47 = vcombine.low %v588_v34, %v592_v35  ;;  %v390_v35 = vld [vmem:[#allocation2 + $0x90] sm:$0xff] }
  0x80   : > { %2003 = vmatprep.subr.bf16.mxu0 %v2884_v48  ;;  %2089 = vmatprep.subr.bf16.mxu1 %v2886_v49  ;;  %v2933_v48 = vcombine.low %v589_v36, %v593_v37  ;;  %v2940_v49 = vcombine.high %v596_v42, %v600_v44  ;;  %v2942_v50 = vcombine.high %v597_v45, %v601_v46  ;;  %v394_v36 = vld [vmem:[#allocation2 + $0xb0] sm:$0xff]  ;;  %v391_v37 = vld [vmem:[#allocation2 + $0x98] sm:$0xff] }
  0x83   : > { %2004 = vmatpush1.bf16.msra.mxu0 %v2883_v59  ;;  %2090 = vmatpush1.bf16.msra.mxu1 %v2885_v60  ;;  %v609_v59 = vld [vmem:[#allocation2 + $0x768] sm:$0xff]  ;;  %v2939_v60 = vcombine.low %v596_v42, %v600_v44  ;;  %v398_v44 = vld [vmem:[#allocation2 + $0xd0] sm:$0xff] }
  0x84   : > { %2005 = vmatprep.subr.bf16.mxu0 %v2892_v0  ;;  %2091 = vmatprep.subr.bf16.mxu1 %v2894_v61  ;;  %v2941_v0 = vcombine.low %v597_v45, %v601_v46  ;;  %v2948_v61 = vcombine.high %v604_v53, %v608_v54  ;;  %v2950_v62 = vcombine.high %v605_v56, %v609_v59  ;;  %v402_v45 = vld [vmem:[#allocation2 + $0xf0] sm:$0xff]  ;;  %v399_v46 = vld [vmem:[#allocation2 + $0xd8] sm:$0xff] }
  0x87   : > { %2006 = vmatpush1.bf16.msra.mxu0 %v2891_v5  ;;  %2092 = vmatpush1.bf16.msra.mxu1 %v2893_v6  ;;  %v617_v5 = vld [vmem:[#allocation2 + $0x7a8] sm:$0xff]  ;;  %v2947_v6 = vcombine.low %v604_v53, %v608_v54  ;;  %v406_v54 = vld [vmem:[#allocation2 + $0x110] sm:$0xff] }
  0x88   : > { %2007 = vmatprep.subr.bf16.mxu0 %v2900_v7  ;;  %2093 = vmatprep.subr.bf16.mxu1 %v2902_v8  ;;  %v2949_v7 = vcombine.low %v605_v56, %v609_v59  ;;  %v2956_v8 = vcombine.high %v612_v1, %v616_v3  ;;  %v2958_v9 = vcombine.high %v613_v4, %v617_v5  ;;  %v410_v56 = vld [vmem:[#allocation2 + $0x130] sm:$0xff]  ;;  %v407_v59 = vld [vmem:[#allocation2 + $0x118] sm:$0xff] }
  0x8b   : > { %2008 = vmatpush1.bf16.msra.mxu0 %v2899_v14  ;;  %2094 = vmatpush1.bf16.msra.mxu1 %v2901_v15  ;;  %v625_v14 = vld [vmem:[#allocation2 + $0x7e8] sm:$0xff]  ;;  %v2955_v15 = vcombine.low %v612_v1, %v616_v3  ;;  %v414_v1 = vld [vmem:[#allocation2 + $0x150] sm:$0xff] }
  0x8c   : > { %2009 = vmatprep.subr.bf16.mxu0 %v2908_v16  ;;  %2095 = vmatprep.subr.bf16.mxu1 %v2910_v17  ;;  %v2957_v16 = vcombine.low %v613_v4, %v617_v5  ;;  %v2964_v17 = vcombine.high %v620_v11, %v624_v12  ;;  %v2966_v18 = vcombine.high %v621_v13, %v625_v14  ;;  %v418_v3 = vld [vmem:[#allocation2 + $0x170] sm:$0xff]  ;;  %v415_v4 = vld [vmem:[#allocation2 + $0x158] sm:$0xff] }
  0x8d   : > { %v419_v5 = vld [vmem:[#allocation2 + $0x178] sm:$0xff] }
  0x8f   : > { %2010 = vmatpush1.bf16.msra.mxu0 %v2907_v58  ;;  %2096 = vmatpush1.bf16.msra.mxu1 %v2909_v22  ;;  %v379_v58 = vld [vmem:[#allocation2 + $0x38] sm:$0xff]  ;;  %v2963_v22 = vcombine.low %v620_v11, %v624_v12  ;;  %v422_v11 = vld [vmem:[#allocation2 + $0x190] sm:$0xff] }
  0x90   : > { %2011 = vmatprep.subr.bf16.mxu0 %v2916_v23  ;;  %2097 = vmatprep.subr.bf16.mxu1 %v2918_v24  ;;  %v2965_v23 = vcombine.low %v621_v13, %v625_v14  ;;  %v2720_v24 = vcombine.high %v374_v20, %v378_v21  ;;  %v2722_v25 = vcombine.high %v375_v57, %v379_v58  ;;  %v426_v12 = vld [vmem:[#allocation2 + $0x1b0] sm:$0xff]  ;;  %v423_v13 = vld [vmem:[#allocation2 + $0x198] sm:$0xff] }
  0x91   : > { %v427_v14 = vld [vmem:[#allocation2 + $0x1b8] sm:$0xff] }
  0x93   : > { %2012 = vmatpush1.bf16.msra.mxu0 %v2915_v30  ;;  %2098 = vmatpush1.bf16.msra.mxu1 %v2917_v31  ;;  %v387_v30 = vld [vmem:[#allocation2 + $0x78] sm:$0xff]  ;;  %v2719_v31 = vcombine.low %v374_v20, %v378_v21  ;;  %v430_v20 = vld [vmem:[#allocation2 + $0x1d0] sm:$0xff] }
  0x94   : > { %2013 = vmatprep.subr.bf16.mxu0 %v2924_v32  ;;  %2099 = vmatprep.subr.bf16.mxu1 %v2926_v33  ;;  %v2721_v32 = vcombine.low %v375_v57, %v379_v58  ;;  %v2728_v33 = vcombine.high %v382_v26, %v386_v28  ;;  %v2730_v34 = vcombine.high %v383_v29, %v387_v30  ;;  %v434_v21 = vld [vmem:[#allocation2 + $0x1f0] sm:$0xff]  ;;  %v431_v57 = vld [vmem:[#allocation2 + $0x1d8] sm:$0xff] }
  0x95   : > { %v435_v58 = vld [vmem:[#allocation2 + $0x1f8] sm:$0xff] }
  0x97   : > { %2014 = vmatpush1.bf16.msra.mxu0 %v2923_v38  ;;  %2100 = vmatpush1.bf16.msra.mxu1 %v2925_v63  ;;  %v395_v38 = vld [vmem:[#allocation2 + $0xb8] sm:$0xff]  ;;  %v2727_v63 = vcombine.low %v382_v26, %v386_v28  ;;  %v438_v26 = vld [vmem:[#allocation2 + $0x210] sm:$0xff] }
  0x98   : > { %2015 = vmatprep.subr.bf16.mxu0 %v2932_v39  ;;  %2101 = vmatprep.subr.bf16.mxu1 %v2934_v40  ;;  %v2729_v39 = vcombine.low %v383_v29, %v387_v30  ;;  %v2736_v40 = vcombine.high %v390_v35, %v394_v36  ;;  %v2738_v42 = vcombine.high %v391_v37, %v395_v38  ;;  %v442_v28 = vld [vmem:[#allocation2 + $0x230] sm:$0xff]  ;;  %v439_v29 = vld [vmem:[#allocation2 + $0x218] sm:$0xff] }
  0x99   : > { %v443_v30 = vld [vmem:[#allocation2 + $0x238] sm:$0xff] }
  0x9b   : > { %2016 = vmatpush1.bf16.msra.mxu0 %v2931_v47  ;;  %2102 = vmatpush1.bf16.msra.mxu1 %v2933_v48  ;;  %v403_v47 = vld [vmem:[#allocation2 + $0xf8] sm:$0xff]  ;;  %v2735_v48 = vcombine.low %v390_v35, %v394_v36  ;;  %v446_v35 = vld [vmem:[#allocation2 + $0x250] sm:$0xff] }
  0x9c   : > { %2017 = vmatprep.subr.bf16.mxu0 %v2940_v49  ;;  %2103 = vmatprep.subr.bf16.mxu1 %v2942_v50  ;;  %v2737_v49 = vcombine.low %v391_v37, %v395_v38  ;;  %v2744_v50 = vcombine.high %v398_v44, %v402_v45  ;;  %v2746_v53 = vcombine.high %v399_v46, %v403_v47  ;;  %v450_v36 = vld [vmem:[#allocation2 + $0x270] sm:$0xff]  ;;  %v447_v37 = vld [vmem:[#allocation2 + $0x258] sm:$0xff] }
  0x9d   : > { %v451_v38 = vld [vmem:[#allocation2 + $0x278] sm:$0xff] }
  0x9f   : > { %2018 = vmatpush1.bf16.msra.mxu0 %v2939_v60  ;;  %2104 = vmatpush1.bf16.msra.mxu1 %v2941_v0  ;;  %v411_v60 = vld [vmem:[#allocation2 + $0x138] sm:$0xff]  ;;  %v2743_v0 = vcombine.low %v398_v44, %v402_v45  ;;  %v454_v44 = vld [vmem:[#allocation2 + $0x290] sm:$0xff] }
  0xa0   : > { %2019 = vmatprep.subr.bf16.mxu0 %v2948_v61  ;;  %2105 = vmatprep.subr.bf16.mxu1 %v2950_v62  ;;  %v2745_v61 = vcombine.low %v399_v46, %v403_v47  ;;  %v2752_v62 = vcombine.high %v406_v54, %v410_v56  ;;  %v458_v45 = vld [vmem:[#allocation2 + $0x2b0] sm:$0xff]  ;;  %v455_v46 = vld [vmem:[#allocation2 + $0x298] sm:$0xff] }
  0xa1   : > { %v459_v47 = vld [vmem:[#allocation2 + $0x2b8] sm:$0xff] }
  0xa3   : > { %2020 = vmatpush1.bf16.msra.mxu0 %v2947_v6  ;;  %2106 = vmatpush1.bf16.msra.mxu1 %v2949_v7  ;;  %v2751_v6 = vcombine.low %v406_v54, %v410_v56  ;;  %v2753_v7 = vcombine.low %v407_v59, %v411_v60  ;;  %v462_v54 = vld [vmem:[#allocation2 + $0x2d0] sm:$0xff] }
  0xa4   : > { %2021 = vmatprep.subr.bf16.mxu0 %v2956_v8  ;;  %2107 = vmatprep.subr.bf16.mxu1 %v2958_v9  ;;  %v2760_v8 = vcombine.high %v414_v1, %v418_v3  ;;  %v2762_v9 = vcombine.high %v415_v4, %v419_v5  ;;  %v466_v56 = vld [vmem:[#allocation2 + $0x2f0] sm:$0xff] }
  0xa7   : > { %2022 = vmatpush1.bf16.msra.mxu0 %v2955_v15  ;;  %2108 = vmatpush1.bf16.msra.mxu1 %v2957_v16  ;;  %v2759_v15 = vcombine.low %v414_v1, %v418_v3  ;;  %v2761_v16 = vcombine.low %v415_v4, %v419_v5  ;;  %v470_v1 = vld [vmem:[#allocation2 + $0x310] sm:$0xff]  ;;  %v471_v4 = vld [vmem:[#allocation2 + $0x318] sm:$0xff] }
  0xa8   : > { %2023 = vmatprep.subr.bf16.mxu0 %v2964_v17  ;;  %2109 = vmatprep.subr.bf16.mxu1 %v2966_v18  ;;  %v2768_v17 = vcombine.high %v422_v11, %v426_v12  ;;  %v2770_v18 = vcombine.high %v423_v13, %v427_v14  ;;  %v474_v3 = vld [vmem:[#allocation2 + $0x330] sm:$0xff]  ;;  %v475_v5 = vld [vmem:[#allocation2 + $0x338] sm:$0xff] }
  0xab   : > { %2024 = vmatpush1.bf16.msra.mxu0 %v2963_v22  ;;  %2110 = vmatpush1.bf16.msra.mxu1 %v2965_v23  ;;  %v2767_v22 = vcombine.low %v422_v11, %v426_v12  ;;  %v2769_v23 = vcombine.low %v423_v13, %v427_v14  ;;  %v478_v11 = vld [vmem:[#allocation2 + $0x350] sm:$0xff]  ;;  %v479_v13 = vld [vmem:[#allocation2 + $0x358] sm:$0xff] }
  0xac   : > { %2122 = vmatprep.subr.bf16.mxu0 %v2720_v24  ;;  %2208 = vmatprep.subr.bf16.mxu1 %v2722_v25  ;;  %v2776_v24 = vcombine.high %v430_v20, %v434_v21  ;;  %v2778_v25 = vcombine.high %v431_v57, %v435_v58  ;;  %v482_v12 = vld [vmem:[#allocation2 + $0x370] sm:$0xff]  ;;  %v483_v14 = vld [vmem:[#allocation2 + $0x378] sm:$0xff] }
  0xae   : > { %2026 = vmatmul.mubr.bf16.vlgmr.msra.gmra.mrb[0].mxu0 %v3236_v41  ;;  %2112 = vmatmul.mubr.bf16.vlgmr.msra.gmra.mrb[0].mxu1 %v3236_v41 }
  0xaf   : > { %2123 = vmatpush1.bf16.msra.mxu0 %v2719_v31  ;;  %2209 = vmatpush1.bf16.msra.mxu1 %v2721_v32  ;;  %v2775_v31 = vcombine.low %v430_v20, %v434_v21  ;;  %v2777_v32 = vcombine.low %v431_v57, %v435_v58  ;;  %v486_v20 = vld [vmem:[#allocation2 + $0x390] sm:$0xff]  ;;  %v487_v57 = vld [vmem:[#allocation2 + $0x398] sm:$0xff] }
  0xb0   : > { %2124 = vmatprep.subr.bf16.mxu0 %v2728_v33  ;;  %2210 = vmatprep.subr.bf16.mxu1 %v2730_v34  ;;  %v2784_v33 = vcombine.high %v438_v26, %v442_v28  ;;  %v2786_v34 = vcombine.high %v439_v29, %v443_v30  ;;  %v490_v21 = vld [vmem:[#allocation2 + $0x3b0] sm:$0xff]  ;;  %v491_v58 = vld [vmem:[#allocation2 + $0x3b8] sm:$0xff] }
  0xb1   : > { %2154 = vmatprep.mubr.bf16.mxu0 %v3207_v27  ;;  %2240 = vmatprep.mubr.bf16.mxu1 %v3207_v27  ;;  %v2754_v27 = vcombine.high %v407_v59, %v411_v60  ;;  %v463_v59 = vld [vmem:[#allocation2 + $0x2d8] sm:$0xff] }
  0xb2   : > { %v467_v60 = vld [vmem:[#allocation2 + $0x2f8] sm:$0xff] }
  0xb3   : > { %2125 = vmatpush1.bf16.msra.mxu0 %v2727_v63  ;;  %2211 = vmatpush1.bf16.msra.mxu1 %v2729_v39  ;;  %v2783_v63 = vcombine.low %v438_v26, %v442_v28  ;;  %v2785_v39 = vcombine.low %v439_v29, %v443_v30  ;;  %v494_v26 = vld [vmem:[#allocation2 + $0x3d0] sm:$0xff]  ;;  %v495_v29 = vld [vmem:[#allocation2 + $0x3d8] sm:$0xff] }
  0xb4   : > { %2126 = vmatprep.subr.bf16.mxu0 %v2736_v40  ;;  %2212 = vmatprep.subr.bf16.mxu1 %v2738_v42  ;;  %v2792_v40 = vcombine.high %v446_v35, %v450_v36  ;;  %v2794_v42 = vcombine.high %v447_v37, %v451_v38  ;;  %v498_v28 = vld [vmem:[#allocation2 + $0x3f0] sm:$0xff]  ;;  %v499_v30 = vld [vmem:[#allocation2 + $0x3f8] sm:$0xff] }
  0xb7   : > { %2127 = vmatpush1.bf16.msra.mxu0 %v2735_v48  ;;  %2213 = vmatpush1.bf16.msra.mxu1 %v2737_v49  ;;  %v2791_v48 = vcombine.low %v446_v35, %v450_v36  ;;  %v2793_v49 = vcombine.low %v447_v37, %v451_v38  ;;  %v502_v35 = vld [vmem:[#allocation2 + $0x410] sm:$0xff]  ;;  %v503_v37 = vld [vmem:[#allocation2 + $0x418] sm:$0xff] }
  0xb8   : > { %2128 = vmatprep.subr.bf16.mxu0 %v2744_v50  ;;  %2214 = vmatprep.subr.bf16.mxu1 %v2746_v53  ;;  %v2800_v50 = vcombine.high %v454_v44, %v458_v45  ;;  %v2802_v53 = vcombine.high %v455_v46, %v459_v47  ;;  %v506_v36 = vld [vmem:[#allocation2 + $0x430] sm:$0xff]  ;;  %v507_v38 = vld [vmem:[#allocation2 + $0x438] sm:$0xff] }
  0xbb   : > { %2129 = vmatpush1.bf16.msra.mxu0 %v2743_v0  ;;  %2215 = vmatpush1.bf16.msra.mxu1 %v2745_v61  ;;  %v2799_v0 = vcombine.low %v454_v44, %v458_v45  ;;  %v2801_v61 = vcombine.low %v455_v46, %v459_v47  ;;  %v510_v44 = vld [vmem:[#allocation2 + $0x450] sm:$0xff]  ;;  %v511_v46 = vld [vmem:[#allocation2 + $0x458] sm:$0xff] }
  0xbc   : > { %2130 = vmatprep.subr.bf16.mxu0 %v2752_v62  ;;  %2216 = vmatprep.subr.bf16.mxu1 %v2754_v27  ;;  %v2808_v62 = vcombine.high %v462_v54, %v466_v56  ;;  %v2810_v27 = vcombine.high %v463_v59, %v467_v60  ;;  %v514_v45 = vld [vmem:[#allocation2 + $0x470] sm:$0xff]  ;;  %v515_v47 = vld [vmem:[#allocation2 + $0x478] sm:$0xff] }
  0xbf   : > { %2131 = vmatpush1.bf16.msra.mxu0 %v2751_v6  ;;  %2217 = vmatpush1.bf16.msra.mxu1 %v2753_v7  ;;  %v2807_v6 = vcombine.low %v462_v54, %v466_v56  ;;  %v2809_v7 = vcombine.low %v463_v59, %v467_v60  ;;  %v518_v54 = vld [vmem:[#allocation2 + $0x490] sm:$0xff]  ;;  %v519_v59 = vld [vmem:[#allocation2 + $0x498] sm:$0xff] }
  0xc0   : > { %2132 = vmatprep.subr.bf16.mxu0 %v2760_v8  ;;  %2218 = vmatprep.subr.bf16.mxu1 %v2762_v9  ;;  %v2816_v8 = vcombine.high %v470_v1, %v474_v3  ;;  %v2818_v9 = vcombine.high %v471_v4, %v475_v5  ;;  %v522_v56 = vld [vmem:[#allocation2 + $0x4b0] sm:$0xff]  ;;  %v523_v60 = vld [vmem:[#allocation2 + $0x4b8] sm:$0xff] }
  0xc3   : > { %2133 = vmatpush1.bf16.msra.mxu0 %v2759_v15  ;;  %2219 = vmatpush1.bf16.msra.mxu1 %v2761_v16  ;;  %v2815_v15 = vcombine.low %v470_v1, %v474_v3  ;;  %v2817_v16 = vcombine.low %v471_v4, %v475_v5  ;;  %v526_v1 = vld [vmem:[#allocation2 + $0x4d0] sm:$0xff]  ;;  %v527_v4 = vld [vmem:[#allocation2 + $0x4d8] sm:$0xff] }
  0xc4   : > { %2134 = vmatprep.subr.bf16.mxu0 %v2768_v17  ;;  %2220 = vmatprep.subr.bf16.mxu1 %v2770_v18  ;;  %v2824_v17 = vcombine.high %v478_v11, %v482_v12  ;;  %v2826_v18 = vcombine.high %v479_v13, %v483_v14  ;;  %v530_v3 = vld [vmem:[#allocation2 + $0x4f0] sm:$0xff]  ;;  %v531_v5 = vld [vmem:[#allocation2 + $0x4f8] sm:$0xff] }
  0xc7   : > { %2135 = vmatpush1.bf16.msra.mxu0 %v2767_v22  ;;  %2221 = vmatpush1.bf16.msra.mxu1 %v2769_v23  ;;  %v2823_v22 = vcombine.low %v478_v11, %v482_v12  ;;  %v2825_v23 = vcombine.low %v479_v13, %v483_v14  ;;  %v538_v11 = vld [vmem:[#allocation2 + $0x530] sm:$0xff]  ;;  %v535_v12 = vld [vmem:[#allocation2 + $0x518] sm:$0xff]  ;;  %v2871_v14 = vcombine.low %v526_v1, %v530_v3 }
  0xc8   : > { %2136 = vmatprep.subr.bf16.mxu0 %v2776_v24  ;;  %2222 = vmatprep.subr.bf16.mxu1 %v2778_v25  ;;  %v2832_v24 = vcombine.high %v486_v20, %v490_v21  ;;  %v2834_v25 = vcombine.high %v487_v57, %v491_v58  ;;  %v539_v13 = vld [vmem:[#allocation2 + $0x538] sm:$0xff] }
  0xcb   : > { %2137 = vmatpush1.bf16.msra.mxu0 %v2775_v31  ;;  %2223 = vmatpush1.bf16.msra.mxu1 %v2777_v32  ;;  %v2831_v31 = vcombine.low %v486_v20, %v490_v21  ;;  %v2833_v32 = vcombine.low %v487_v57, %v491_v58  ;;  %v543_v20 = vld [vmem:[#allocation2 + $0x558] sm:$0xff]  ;;  %v2881_v58 = vcombine.low %v535_v12, %v539_v13 }
  0xcc   : > { %2138 = vmatprep.subr.bf16.mxu0 %v2784_v33  ;;  %2224 = vmatprep.subr.bf16.mxu1 %v2786_v34  ;;  %v2840_v33 = vcombine.high %v494_v26, %v498_v28  ;;  %v2842_v34 = vcombine.high %v495_v29, %v499_v30  ;;  %v547_v21 = vld [vmem:[#allocation2 + $0x578] sm:$0xff] }
  0xcf   : > { %2139 = vmatpush1.bf16.msra.mxu0 %v2783_v63  ;;  %2225 = vmatpush1.bf16.msra.mxu1 %v2785_v39  ;;  %v2839_v63 = vcombine.low %v494_v26, %v498_v28  ;;  %v2841_v39 = vcombine.low %v495_v29, %v499_v30  ;;  %v551_v26 = vld [vmem:[#allocation2 + $0x598] sm:$0xff]  ;;  %v2889_v30 = vcombine.low %v543_v20, %v547_v21 }
  0xd0   : > { %2140 = vmatprep.subr.bf16.mxu0 %v2792_v40  ;;  %2226 = vmatprep.subr.bf16.mxu1 %v2794_v42  ;;  %v2848_v40 = vcombine.high %v502_v35, %v506_v36  ;;  %v2850_v42 = vcombine.high %v503_v37, %v507_v38  ;;  %v555_v28 = vld [vmem:[#allocation2 + $0x5b8] sm:$0xff] }
  0xd3   : > { %2141 = vmatpush1.bf16.msra.mxu0 %v2791_v48  ;;  %2227 = vmatpush1.bf16.msra.mxu1 %v2793_v49  ;;  %v2847_v48 = vcombine.low %v502_v35, %v506_v36  ;;  %v2849_v49 = vcombine.low %v503_v37, %v507_v38  ;;  %v559_v35 = vld [vmem:[#allocation2 + $0x5d8] sm:$0xff]  ;;  %v2897_v38 = vcombine.low %v551_v26, %v555_v28 }
  0xd4   : > { %2142 = vmatprep.subr.bf16.mxu0 %v2800_v50  ;;  %2228 = vmatprep.subr.bf16.mxu1 %v2802_v53  ;;  %v2856_v50 = vcombine.high %v510_v44, %v514_v45  ;;  %v2858_v53 = vcombine.high %v511_v46, %v515_v47  ;;  %v563_v36 = vld [vmem:[#allocation2 + $0x5f8] sm:$0xff] }
  0xd7   : > { %2143 = vmatpush1.bf16.msra.mxu0 %v2799_v0  ;;  %2229 = vmatpush1.bf16.msra.mxu1 %v2801_v61  ;;  %v2855_v0 = vcombine.low %v510_v44, %v514_v45  ;;  %v2857_v61 = vcombine.low %v511_v46, %v515_v47  ;;  %v567_v44 = vld [vmem:[#allocation2 + $0x618] sm:$0xff]  ;;  %v2905_v47 = vcombine.low %v559_v35, %v563_v36 }
  0xd8   : > { %2144 = vmatprep.subr.bf16.mxu0 %v2808_v62  ;;  %2230 = vmatprep.subr.bf16.mxu1 %v2810_v27  ;;  %v2864_v62 = vcombine.high %v518_v54, %v522_v56  ;;  %v2866_v27 = vcombine.high %v519_v59, %v523_v60  ;;  %v571_v45 = vld [vmem:[#allocation2 + $0x638] sm:$0xff] }
  0xdb   : > { %2145 = vmatpush1.bf16.msra.mxu0 %v2807_v6  ;;  %2231 = vmatpush1.bf16.msra.mxu1 %v2809_v7  ;;  %v2863_v6 = vcombine.low %v518_v54, %v522_v56  ;;  %v2872_v7 = vcombine.high %v526_v1, %v530_v3  ;;  %v575_v54 = vld [vmem:[#allocation2 + $0x658] sm:$0xff] }
  0xdc   : > { %2146 = vmatprep.subr.bf16.mxu0 %v2816_v8  ;;  %2232 = vmatprep.subr.bf16.mxu1 %v2818_v9  ;;  %v2874_v8 = vcombine.high %v527_v4, %v531_v5  ;;  %v534_v9 = vld [vmem:[#allocation2 + $0x510] sm:$0xff]  ;;  %v579_v56 = vld [vmem:[#allocation2 + $0x678] sm:$0xff] }
  0xdd   : > { %v2879_v57 = vcombine.low %v534_v9, %v538_v11  ;;  %v583_v1 = vld [vmem:[#allocation2 + $0x698] sm:$0xff] }
  0xde   : > { %v587_v3 = vld [vmem:[#allocation2 + $0x6b8] sm:$0xff] }
  0xdf   : > { %2147 = vmatpush1.bf16.msra.mxu0 %v2815_v15  ;;  %2233 = vmatpush1.bf16.msra.mxu1 %v2817_v16  ;;  %v2873_v15 = vcombine.low %v527_v4, %v531_v5  ;;  %v2880_v16 = vcombine.high %v534_v9, %v538_v11  ;;  %v2921_v5 = vcombine.low %v575_v54, %v579_v56  ;;  %v591_v9 = vld [vmem:[#allocation2 + $0x6d8] sm:$0xff] }
  0xe0   : > { %2148 = vmatprep.subr.bf16.mxu0 %v2824_v17  ;;  %2234 = vmatprep.subr.bf16.mxu1 %v2826_v18  ;;  %v542_v17 = vld [vmem:[#allocation2 + $0x550] sm:$0xff]  ;;  %v595_v11 = vld [vmem:[#allocation2 + $0x6f8] sm:$0xff] }
  0xe1   : > { %v546_v18 = vld [vmem:[#allocation2 + $0x570] sm:$0xff] }
  0xe2   : > { %v2887_v29 = vcombine.low %v542_v17, %v546_v18 }
  0xe3   : > { %2149 = vmatpush1.bf16.msra.mxu0 %v2823_v22  ;;  %2235 = vmatpush1.bf16.msra.mxu1 %v2825_v23  ;;  %v2888_v22 = vcombine.high %v542_v17, %v546_v18  ;;  %v2890_v23 = vcombine.high %v543_v20, %v547_v21  ;;  %v599_v17 = vld [vmem:[#allocation2 + $0x718] sm:$0xff]  ;;  %v2937_v21 = vcombine.low %v591_v9, %v595_v11 }
  0xe4   : > { %2150 = vmatprep.subr.bf16.mxu0 %v2832_v24  ;;  %2236 = vmatprep.subr.bf16.mxu1 %v2834_v25  ;;  %v550_v24 = vld [vmem:[#allocation2 + $0x590] sm:$0xff]  ;;  %v603_v18 = vld [vmem:[#allocation2 + $0x738] sm:$0xff] }
  0xe5   : > { %v554_v25 = vld [vmem:[#allocation2 + $0x5b0] sm:$0xff] }
  0xe6   : > { %v2895_v37 = vcombine.low %v550_v24, %v554_v25 }
  0xe7   : > { %2151 = vmatpush1.bf16.msra.mxu0 %v2831_v31  ;;  %2237 = vmatpush1.bf16.msra.mxu1 %v2833_v32  ;;  %v2896_v31 = vcombine.high %v550_v24, %v554_v25  ;;  %v2898_v32 = vcombine.high %v551_v26, %v555_v28  ;;  %v607_v24 = vld [vmem:[#allocation2 + $0x758] sm:$0xff]  ;;  %v2945_v28 = vcombine.low %v599_v17, %v603_v18 }
  0xe8   : > { %2152 = vmatprep.subr.bf16.mxu0 %v2840_v33  ;;  %2238 = vmatprep.subr.bf16.mxu1 %v2842_v34  ;;  %v558_v33 = vld [vmem:[#allocation2 + $0x5d0] sm:$0xff]  ;;  %v611_v25 = vld [vmem:[#allocation2 + $0x778] sm:$0xff] }
  0xe9   : > { %v562_v34 = vld [vmem:[#allocation2 + $0x5f0] sm:$0xff] }
  0xea   : > { %v2903_v46 = vcombine.low %v558_v33, %v562_v34 }
  0xeb   : > { %2153 = vmatpush1.bf16.msra.mxu0 %v2839_v63  ;;  %2239 = vmatpush1.bf16.msra.mxu1 %v2841_v39  ;;  %v2904_v63 = vcombine.high %v558_v33, %v562_v34  ;;  %v2906_v39 = vcombine.high %v559_v35, %v563_v36  ;;  %v615_v33 = vld [vmem:[#allocation2 + $0x798] sm:$0xff]  ;;  %v2953_v36 = vcombine.low %v607_v24, %v611_v25 }
  0xec   : > { %2165 = vmatprep.subr.bf16.mxu0 %v2848_v40  ;;  %2251 = vmatprep.subr.bf16.mxu1 %v2850_v42  ;;  %v566_v40 = vld [vmem:[#allocation2 + $0x610] sm:$0xff]  ;;  %v619_v34 = vld [vmem:[#allocation2 + $0x7b8] sm:$0xff] }
  0xed   : > { %v570_v42 = vld [vmem:[#allocation2 + $0x630] sm:$0xff] }
  0xee   : > { %2155 = vmatmul.mubr.bf16.vlgmr.msra.gmra.mrb[4].mxu0 %v3238_v10  ;;  %2241 = vmatmul.mubr.bf16.vlgmr.msra.gmra.mrb[4].mxu1 %v3238_v10  ;;  %v2865_v10 = vcombine.low %v519_v59, %v523_v60  ;;  %v2911_v59 = vcombine.low %v566_v40, %v570_v42  ;;  %v2913_v60 = vcombine.low %v567_v44, %v571_v45 }
  0xef   : > { %2166 = vmatpush1.bf16.msra.mxu0 %v2847_v48  ;;  %2252 = vmatpush1.bf16.msra.mxu1 %v2849_v49  ;;  %v2912_v48 = vcombine.high %v566_v40, %v570_v42  ;;  %v2914_v49 = vcombine.high %v567_v44, %v571_v45  ;;  %v623_v40 = vld [vmem:[#allocation2 + $0x7d8] sm:$0xff]  ;;  %v2961_v45 = vcombine.low %v615_v33, %v619_v34 }
  0xf0   : > { %2167 = vmatprep.subr.bf16.mxu0 %v2856_v50  ;;  %2253 = vmatprep.subr.bf16.mxu1 %v2858_v53  ;;  %v574_v50 = vld [vmem:[#allocation2 + $0x650] sm:$0xff]  ;;  %v627_v42 = vld [vmem:[#allocation2 + $0x7f8] sm:$0xff] }
  0xf1   : > { %2197 = vmatprep.mubr.bf16.mxu0 %v3240_v19  ;;  %2283 = vmatprep.mubr.bf16.mxu1 %v3240_v19  ;;  %v2882_v19 = vcombine.high %v535_v12, %v539_v13  ;;  %v578_v53 = vld [vmem:[#allocation2 + $0x670] sm:$0xff]  ;;  %v2929_v13 = vcombine.low %v583_v1, %v587_v3 }
  0xf2   : > { %v2919_v4 = vcombine.low %v574_v50, %v578_v53 }
  0xf3   : > { %2168 = vmatpush1.bf16.msra.mxu0 %v2855_v0  ;;  %2254 = vmatpush1.bf16.msra.mxu1 %v2857_v61  ;;  %v2920_v0 = vcombine.high %v574_v50, %v578_v53  ;;  %v2922_v61 = vcombine.high %v575_v54, %v579_v56  ;;  %v3259_v50 = vld [vmem:[%s3353_s4] sm:$0xff] }
  0xf4   : > { %2169 = vmatprep.subr.bf16.mxu0 %v2864_v62  ;;  %2255 = vmatprep.subr.bf16.mxu1 %v2866_v27  ;;  %v582_v62 = vld [vmem:[#allocation2 + $0x690] sm:$0xff]  ;;  %v633_v53 = vrot.slane %v3259_v50, %v3215_v55  ;;  %v641_v54 = vrot.slane %v3259_v50, %v3212_v51  ;;  %v637_v56 = vrot.slane %v3259_v50, %v3183_v52 }
  0xf5   : > { %v586_v27 = vld [vmem:[#allocation2 + $0x6b0] sm:$0xff] }
  0xf6   : > { %v2927_v12 = vcombine.low %v582_v62, %v586_v27 }
  0xf7   : > { %2170 = vmatpush1.bf16.msra.mxu0 %v2863_v6  ;;  %2256 = vmatpush1.bf16.msra.mxu1 %v2865_v10  ;;  %v2928_v6 = vcombine.high %v582_v62, %v586_v27  ;;  %v2930_v10 = vcombine.high %v583_v1, %v587_v3 }
  0xf8   : > { %2171 = vmatprep.subr.bf16.mxu0 %v2872_v7  ;;  %2257 = vmatprep.subr.bf16.mxu1 %v2874_v8  ;;  %v590_v7 = vld [vmem:[#allocation2 + $0x6d0] sm:$0xff] }
  0xf9   : > { %v594_v8 = vld [vmem:[#allocation2 + $0x6f0] sm:$0xff] }
  0xfa   : > { %v2935_v20 = vcombine.low %v590_v7, %v594_v8 }
  0xfb   : > { %2172 = vmatpush1.bf16.msra.mxu0 %v2871_v14  ;;  %2258 = vmatpush1.bf16.msra.mxu1 %v2873_v15  ;;  %v2936_v14 = vcombine.high %v590_v7, %v594_v8  ;;  %v2938_v15 = vcombine.high %v591_v9, %v595_v11 }
  0xfc   : > { %2173 = vmatprep.subr.bf16.mxu0 %v2880_v16  ;;  %2259 = vmatprep.subr.bf16.mxu1 %v2882_v19  ;;  %v598_v16 = vld [vmem:[#allocation2 + $0x710] sm:$0xff] }
  0xfd   : > { %v602_v19 = vld [vmem:[#allocation2 + $0x730] sm:$0xff] }
  0xfe   : > { %v2943_v26 = vcombine.low %v598_v16, %v602_v19 }
  0xff   : > { %2174 = vmatpush1.bf16.msra.mxu0 %v2879_v57  ;;  %2260 = vmatpush1.bf16.msra.mxu1 %v2881_v58  ;;  %v2944_v57 = vcombine.high %v598_v16, %v602_v19  ;;  %v2946_v58 = vcombine.high %v599_v17, %v603_v18 }
 0x100   : > { %2175 = vmatprep.subr.bf16.mxu0 %v2888_v22  ;;  %2261 = vmatprep.subr.bf16.mxu1 %v2890_v23  ;;  %v606_v22 = vld [vmem:[#allocation2 + $0x750] sm:$0xff] }
 0x101   : > { %v610_v23 = vld [vmem:[#allocation2 + $0x770] sm:$0xff] }
 0x102   : > { %v2951_v35 = vcombine.low %v606_v22, %v610_v23 }
 0x103   : > { %2176 = vmatpush1.bf16.msra.mxu0 %v2887_v29  ;;  %2262 = vmatpush1.bf16.msra.mxu1 %v2889_v30  ;;  %v2952_v29 = vcombine.high %v606_v22, %v610_v23  ;;  %v2954_v30 = vcombine.high %v607_v24, %v611_v25 }
 0x104   : > { %2177 = vmatprep.subr.bf16.mxu0 %v2896_v31  ;;  %2263 = vmatprep.subr.bf16.mxu1 %v2898_v32  ;;  %v614_v31 = vld [vmem:[#allocation2 + $0x790] sm:$0xff] }
 0x105   : > { %v618_v32 = vld [vmem:[#allocation2 + $0x7b0] sm:$0xff] }
 0x106   : > { %v2959_v44 = vcombine.low %v614_v31, %v618_v32 }
 0x107   : > { %2178 = vmatpush1.bf16.msra.mxu0 %v2895_v37  ;;  %2264 = vmatpush1.bf16.msra.mxu1 %v2897_v38  ;;  %v2960_v37 = vcombine.high %v614_v31, %v618_v32  ;;  %v2962_v38 = vcombine.high %v615_v33, %v619_v34 }
 0x108   : > { %2179 = vmatprep.subr.bf16.mxu0 %v2904_v63  ;;  %2265 = vmatprep.subr.bf16.mxu1 %v2906_v39  ;;  %v622_v63 = vld [vmem:[#allocation2 + $0x7d0] sm:$0xff] }
 0x109   : > { %v626_v39 = vld [vmem:[#allocation2 + $0x7f0] sm:$0xff] }
 0x10b   : > { %2180 = vmatpush1.bf16.msra.mxu0 %v2903_v46  ;;  %2266 = vmatpush1.bf16.msra.mxu1 %v2905_v47  ;;  %v2968_v46 = vcombine.high %v622_v63, %v626_v39  ;;  %v2970_v47 = vcombine.high %v623_v40, %v627_v42 }
 0x10c   : > { %2181 = vmatprep.subr.bf16.mxu0 %v2912_v48  ;;  %2267 = vmatprep.subr.bf16.mxu1 %v2914_v49  ;;  %v2967_v48 = vcombine.low %v622_v63, %v626_v39  ;;  %v2969_v49 = vcombine.low %v623_v40, %v627_v42 }
 0x10f   : > { %2182 = vmatpush1.bf16.msra.mxu0 %v2911_v59  ;;  %2268 = vmatpush1.bf16.msra.mxu1 %v2913_v60  ;;  %v645_v59 = vrot.slane %v3259_v50, %v3220_v2 }
 0x110   : > { %2183 = vmatprep.subr.bf16.mxu0 %v2920_v0  ;;  %2269 = vmatprep.subr.bf16.mxu1 %v2922_v61 }
 0x113   : > { %2184 = vmatpush1.bf16.msra.mxu0 %v2919_v4  ;;  %2270 = vmatpush1.bf16.msra.mxu1 %v2921_v5 }
 0x114   : > { %2185 = vmatprep.subr.bf16.mxu0 %v2928_v6  ;;  %2271 = vmatprep.subr.bf16.mxu1 %v2930_v10 }
 0x117   : > { %2186 = vmatpush1.bf16.msra.mxu0 %v2927_v12  ;;  %2272 = vmatpush1.bf16.msra.mxu1 %v2929_v13 }
 0x118   : > { %2187 = vmatprep.subr.bf16.mxu0 %v2936_v14  ;;  %2273 = vmatprep.subr.bf16.mxu1 %v2938_v15 }
 0x11b   : > { %2188 = vmatpush1.bf16.msra.mxu0 %v2935_v20  ;;  %2274 = vmatpush1.bf16.msra.mxu1 %v2937_v21 }
 0x11c   : > { %2189 = vmatprep.subr.bf16.mxu0 %v2944_v57  ;;  %2275 = vmatprep.subr.bf16.mxu1 %v2946_v58 }
 0x11f   : > { %2190 = vmatpush1.bf16.msra.mxu0 %v2943_v26  ;;  %2276 = vmatpush1.bf16.msra.mxu1 %v2945_v28 }
 0x120   : > { %2191 = vmatprep.subr.bf16.mxu0 %v2952_v29  ;;  %2277 = vmatprep.subr.bf16.mxu1 %v2954_v30 }
 0x123   : > { %2192 = vmatpush1.bf16.msra.mxu0 %v2951_v35  ;;  %2278 = vmatpush1.bf16.msra.mxu1 %v2953_v36 }
 0x124   : > { %2193 = vmatprep.subr.bf16.mxu0 %v2960_v37  ;;  %2279 = vmatprep.subr.bf16.mxu1 %v2962_v38 }
 0x127   : > { %2194 = vmatpush1.bf16.msra.mxu0 %v2959_v44  ;;  %2280 = vmatpush1.bf16.msra.mxu1 %v2961_v45 }
 0x128   : > { %2195 = vmatprep.subr.bf16.mxu0 %v2968_v46  ;;  %2281 = vmatprep.subr.bf16.mxu1 %v2970_v47 }
 0x12b   : > { %2196 = vmatpush1.bf16.msra.mxu0 %v2967_v48  ;;  %2282 = vmatpush1.bf16.msra.mxu1 %v2969_v49 }
 0x12e   : > { %2198 = vmatmul.mubr.bf16.vlgmr.msra.gmra.mrb[4].mxu0 %v3236_v41  ;;  %2284 = vmatmul.mubr.bf16.vlgmr.msra.gmra.mrb[4].mxu1 %v3236_v41  ;;  %v3090_v41 = vmov 1966171168  }
 0x12f   : > { %v3270_v0 = vunpack.c.l.s4 %v3090_v41 }
 0x131   : > { %v2364_v8 = vunpack.c.0.s8 %v3270_v0 }
 0x181   : > { %v2027_v60 = vpop.f32.mrb[0].mxu0  ;;  %v2113_v62 = vpop.f32.mrb[0].mxu1 }
 0x182   : > { %v2993_v61 = vadd.f32 %v2027_v60, %v633_v53  ;;  %v2029_v27 = vpop.f32.mrb[1].mxu0  ;;  %v2997_v1 = vadd.f32 %v2113_v62, %v641_v54  ;;  %v2115_v55 = vpop.f32.mrb[1].mxu1 }
 0x183   : > { %v2994_v3 = vadd.f32 %v2029_v27, %v637_v56  ;;  %v2031_v4 = vpop.f32.mrb[2].mxu0  ;;  %v2998_v52 = vadd.f32 %v2115_v55, %v645_v59  ;;  %v2117_v2 = vpop.f32.mrb[2].mxu1 }
 0x184   : > { %v2995_v51 = vadd.f32 %v2031_v4, %v633_v53  ;;  %v2033_v5 = vpop.f32.mrb[3].mxu0  ;;  %v2409_v6 = vmul.f32 %v2993_v61, %v2993_v61  ;;  %v3277_v7 = vadd.f32 %v2117_v2, %v641_v54  ;;  %v2119_v9 = vpop.f32.mrb[3].mxu1  ;;  %v2411_v11 = vmul.f32 %v2997_v1, %v2997_v1 }
 0x185   : > { %v2985_v10 = vpack.c.bf16 %v2994_v3, %v2993_v61  ;;  %v2986_v12 = vpack.c.bf16 %v2998_v52, %v2997_v1  ;;  %v2996_v19 = vadd.f32 %v2033_v5, %v637_v56  ;;  %v3000_v17 = vadd.f32 %v2119_v9, %v645_v59 }
 0x186   : > { %v2294_v13 = vadd.f32 %v2995_v51, %v2993_v61  ;;  %v2417_v14 = vmul.f32 %v2995_v51, %v2995_v51  ;;  %v2308_v15 = vadd.f32 %v3277_v7, %v2997_v1  ;;  %v2419_v16 = vmul.f32 %v3277_v7, %v3277_v7 }
 0x187   : > { %2589 = vst [vmem:[%s3275_s7] sm:$0xff] %v2985_v10  ;;  %v2410_v18 = vmul.f32 %v2994_v3, %v2994_v3  ;;  %v2412_v20 = vmul.f32 %v2998_v52, %v2998_v52  ;;  %2590 = vst [vmem:[%s3275_s7 + $0x8] sm:$0xff] %v2986_v12  ;;  %v2301_v23 = vadd.f32 %v2996_v19, %v2994_v3 }
 0x188   : > { %v2295_v21 = vrot.slane %v2294_v13, 4  ;;  %v2425_v57 = vadd.f32 %v2417_v14, %v2409_v6  ;;  %v2309_v58 = vrot.slane %v2308_v15, 4  ;;  %v2439_v22 = vadd.f32 %v2419_v16, %v2411_v11 }
 0x189   : > { %v2418_v24 = vmul.f32 %v2996_v19, %v2996_v19  ;;  %v2989_v28 = vpack.c.bf16 %v2996_v19, %v2995_v51  ;;  %v2315_v29 = vadd.f32 %v3000_v17, %v2998_v52  ;;  %v2302_v32 = vrot.slane %v2301_v23, 4 }
 0x18a   : > { %v2296_v25 = vadd.f32 %v2295_v21, %v2294_v13  ;;  %v2426_v26 = vrot.slane %v2425_v57, 4  ;;  %v2310_v30 = vadd.f32 %v2309_v58, %v2308_v15  ;;  %v2440_v31 = vrot.slane %v2439_v22, 4 }
 0x18b   : > { %v2432_v33 = vadd.f32 %v2418_v24, %v2410_v18  ;;  %2593 = vst [vmem:[%s3275_s7 + $0x20] sm:$0xff] %v2989_v28  ;;  %v2316_v36 = vrot.slane %v2315_v29, 4  ;;  %v2420_v37 = vmul.f32 %v3000_v17, %v3000_v17  ;;  %v2303_v39 = vadd.f32 %v2302_v32, %v2301_v23 }
 0x18c   : > { %v2297_v34 = vrot.slane %v2296_v25, 2  ;;  %v2427_v35 = vadd.f32 %v2426_v26, %v2425_v57  ;;  %v2311_v38 = vrot.slane %v2310_v30, 2  ;;  %v2441_v63 = vadd.f32 %v2440_v31, %v2439_v22 }
 0x18d   : > { %v2433_v40 = vrot.slane %v2432_v33, 4  ;;  %v2317_v45 = vadd.f32 %v2316_v36, %v2315_v29  ;;  %v2446_v46 = vadd.f32 %v2420_v37, %v2412_v20  ;;  %v2304_v49 = vrot.slane %v2303_v39, 2 }
 0x18e   : > { %v2298_v42 = vadd.f32 %v2297_v34, %v2296_v25  ;;  %v2428_v44 = vrot.slane %v2427_v35, 2  ;;  %v2312_v47 = vadd.f32 %v2311_v38, %v2310_v30  ;;  %v2442_v48 = vrot.slane %v2441_v63, 2 }
 0x18f   : > { %v2434_v53 = vadd.f32 %v2433_v40, %v2432_v33  ;;  %v2318_v59 = vrot.slane %v2317_v45, 2  ;;  %v2447_v60 = vrot.slane %v2446_v46, 4  ;;  %v2305_v62 = vadd.f32 %v2304_v49, %v2303_v39 }
 0x190   : > { %v2299_v54 = vrot.slane %v2298_v42, 1  ;;  %v2429_v56 = vadd.f32 %v2428_v44, %v2427_v35  ;;  %v2313_v41 = vrot.slane %v2312_v47, 1  ;;  %v2443_v61 = vadd.f32 %v2442_v48, %v2441_v63 }
 0x191   : > { %v2435_v27 = vrot.slane %v2434_v53, 2  ;;  %v2319_v3 = vadd.f32 %v2318_v59, %v2317_v45  ;;  %v2448_v55 = vadd.f32 %v2447_v60, %v2446_v46  ;;  %v2306_v51 = vrot.slane %v2305_v62, 1 }
 0x192   : > { %v2430_v1 = vrot.slane %v2429_v56, 1  ;;  %v2300_v4 = vadd.f32 %v2299_v54, %v2298_v42  ;;  %v2314_v52 = vadd.f32 %v2313_v41, %v2312_v47  ;;  %v2444_v5 = vrot.slane %v2443_v61, 1 }
 0x193   : > { %v2436_v2 = vadd.f32 %v2435_v27, %v2434_v53  ;;  %v2320_v6 = vrot.slane %v2319_v3, 1  ;;  %v2449_v10 = vrot.slane %v2448_v55, 2  ;;  %v2990_v9 = vpack.c.bf16 %v3000_v17, %v3277_v7 }
 0x194   : > { %v2431_v11 = vadd.f32 %v2430_v1, %v2429_v56  ;;  %v2307_v12 = vadd.f32 %v2306_v51, %v2305_v62  ;;  %v3290_v13 = vsub.s32 %v2364_v8, %v3175_v43  ;;  %v2445_v20 = vadd.f32 %v2444_v5, %v2443_v61 }
 0x195   : > { %v2437_v14 = vrot.slane %v2436_v2, 1  ;;  %v2321_v15 = vadd.f32 %v2320_v6, %v2319_v3  ;;  %v2450_v16 = vadd.f32 %v2449_v10, %v2448_v55  ;;  %2594 = vst [vmem:[%s3275_s7 + $0x28] sm:$0xff] %v2990_v9  ;;  %v648_v26 = vsub.s32 4, %v3175_v43 }
 0x196   : > { %v2358_v19 = vcombine.low %v2300_v4, %v2307_v12  ;;  %v656_v28 = vsub.s32 6, %v3175_v43  ;;  %v652_v29 = vsub.s32 5, %v3175_v43  ;;  %v660_v30 = vsub.s32 7, %v3175_v43 }
 0x197   : > { %v2438_v18 = vadd.f32 %v2437_v14, %v2436_v2  ;;  %v2359_v21 = vcombine.low %v2314_v52, %v2321_v15  ;;  %v2451_v57 = vrot.slane %v2450_v16, 1  ;;  %v649_v31 = vrot.slane %v3259_v50, %v648_v26 }
 0x198   : > { %v3294_v58 = vrot.slane %v2358_v19, %v3290_v13  ;;  %v657_v32 = vrot.slane %v3259_v50, %v656_v28  ;;  %v653_v33 = vrot.slane %v3259_v50, %v652_v29  ;;  %v661_v34 = vrot.slane %v3259_v50, %v660_v30 }
 0x199   : > { %v2489_v7 = vcombine.low %v2431_v11, %v2438_v18  ;;  %v3297_v17 = vrot.slane %v2359_v21, %v3290_v13  ;;  %v2452_v22 = vadd.f32 %v2451_v57, %v2450_v16 }
 0x19b   : > { %v3300_v0 = vrot.slane %v2489_v7, %v3290_v13  ;;  %v2390_v8 = vcombine.low %v3294_v58, %v3297_v17  ;;  %v2490_v23 = vcombine.low %v2445_v20, %v2452_v22 }
 0x19d   : > { %v3305_v24 = vrot.slane %v2490_v23, %v3290_v13 }
 0x19f   : > { %v2521_v25 = vcombine.low %v3300_v0, %v3305_v24 }
 0x201   : > { %v2199_v35 = vpop.f32.mrb[4].mxu0  ;;  %v2285_v37 = vpop.f32.mrb[4].mxu1 }
 0x202   : > { %v3001_v36 = vadd.f32 %v2199_v35, %v649_v31  ;;  %v2201_v38 = vpop.f32.mrb[5].mxu0  ;;  %v3005_v63 = vadd.f32 %v2285_v37, %v657_v32  ;;  %v2287_v40 = vpop.f32.mrb[5].mxu1 }
 0x203   : > { %v3002_v39 = vadd.f32 %v2201_v38, %v653_v33  ;;  %v2203_v42 = vpop.f32.mrb[6].mxu0  ;;  %v3006_v44 = vadd.f32 %v2287_v40, %v661_v34  ;;  %v2289_v43 = vpop.f32.mrb[6].mxu1 }
 0x204   : > { %v3003_v45 = vadd.f32 %v2203_v42, %v649_v31  ;;  %v2205_v46 = vpop.f32.mrb[7].mxu0  ;;  %v2413_v47 = vmul.f32 %v3001_v36, %v3001_v36  ;;  %v3317_v49 = vadd.f32 %v2289_v43, %v657_v32  ;;  %v2291_v53 = vpop.f32.mrb[7].mxu1  ;;  %v2415_v50 = vmul.f32 %v3005_v63, %v3005_v63 }
 0x205   : > { %v2987_v48 = vpack.c.bf16 %v3002_v39, %v3001_v36  ;;  %v2988_v54 = vpack.c.bf16 %v3006_v44, %v3005_v63  ;;  %v3004_v61 = vadd.f32 %v2205_v46, %v653_v33  ;;  %v3008_v62 = vadd.f32 %v2291_v53, %v661_v34 }
 0x206   : > { %v2322_v56 = vadd.f32 %v3003_v45, %v3001_v36  ;;  %v2421_v59 = vmul.f32 %v3003_v45, %v3003_v45  ;;  %v2336_v60 = vadd.f32 %v3317_v49, %v3005_v63  ;;  %v2423_v41 = vmul.f32 %v3317_v49, %v3317_v49 }
 0x207   : > { %2591 = vst [vmem:[%s3275_s7 + $0x10] sm:$0xff] %v2987_v48  ;;  %v2414_v27 = vmul.f32 %v3002_v39, %v3002_v39  ;;  %v2416_v1 = vmul.f32 %v3006_v44, %v3006_v44  ;;  %2592 = vst [vmem:[%s3275_s7 + $0x18] sm:$0xff] %v2988_v54  ;;  %v2329_v51 = vadd.f32 %v3004_v61, %v3002_v39 }
 0x208   : > { %v2323_v3 = vrot.slane %v2322_v56, 4  ;;  %v2453_v55 = vadd.f32 %v2421_v59, %v2413_v47  ;;  %v2337_v4 = vrot.slane %v2336_v60, 4  ;;  %v2467_v52 = vadd.f32 %v2423_v41, %v2415_v50 }
 0x209   : > { %v2422_v2 = vmul.f32 %v3004_v61, %v3004_v61  ;;  %v2991_v10 = vpack.c.bf16 %v3004_v61, %v3003_v45  ;;  %v2343_v9 = vadd.f32 %v3008_v62, %v3006_v44  ;;  %v2330_v14 = vrot.slane %v2329_v51, 4 }
 0x20a   : > { %v2324_v5 = vadd.f32 %v2323_v3, %v2322_v56  ;;  %v2454_v6 = vrot.slane %v2453_v55, 4  ;;  %v2338_v11 = vadd.f32 %v2337_v4, %v2336_v60  ;;  %v2468_v12 = vrot.slane %v2467_v52, 4 }
 0x20b   : > { %v2460_v15 = vadd.f32 %v2422_v2, %v2414_v27  ;;  %2595 = vst [vmem:[%s3275_s7 + $0x30] sm:$0xff] %v2991_v10  ;;  %v2344_v18 = vrot.slane %v2343_v9, 4  ;;  %v2424_v20 = vmul.f32 %v3008_v62, %v3008_v62  ;;  %v2331_v7 = vadd.f32 %v2330_v14, %v2329_v51 }
 0x20c   : > { %v2325_v16 = vrot.slane %v2324_v5, 2  ;;  %v2455_v19 = vadd.f32 %v2454_v6, %v2453_v55  ;;  %v2339_v21 = vrot.slane %v2338_v11, 2  ;;  %v2469_v57 = vadd.f32 %v2468_v12, %v2467_v52 }
 0x20d   : > { %v2461_v22 = vrot.slane %v2460_v15, 4  ;;  %v2345_v28 = vadd.f32 %v2344_v18, %v2343_v9  ;;  %v2474_v29 = vadd.f32 %v2424_v20, %v2416_v1  ;;  %v2332_v32 = vrot.slane %v2331_v7, 2 }
 0x20e   : > { %v2326_v23 = vadd.f32 %v2325_v16, %v2324_v5  ;;  %v2456_v26 = vrot.slane %v2455_v19, 2  ;;  %v2340_v30 = vadd.f32 %v2339_v21, %v2338_v11  ;;  %v2470_v31 = vrot.slane %v2469_v57, 2 }
 0x20f   : > { %v2462_v33 = vadd.f32 %v2461_v22, %v2460_v15  ;;  %v2346_v36 = vrot.slane %v2345_v28, 2  ;;  %v2475_v37 = vrot.slane %v2474_v29, 4  ;;  %v2333_v39 = vadd.f32 %v2332_v32, %v2331_v7 }
 0x210   : > { %v2327_v34 = vrot.slane %v2326_v23, 1  ;;  %v2457_v35 = vadd.f32 %v2456_v26, %v2455_v19  ;;  %v2341_v38 = vrot.slane %v2340_v30, 1  ;;  %v2471_v63 = vadd.f32 %v2470_v31, %v2469_v57 }
 0x211   : > { %v2463_v40 = vrot.slane %v2462_v33, 2  ;;  %v2347_v44 = vadd.f32 %v2346_v36, %v2345_v28  ;;  %v2476_v45 = vadd.f32 %v2475_v37, %v2474_v29  ;;  %v2334_v47 = vrot.slane %v2333_v39, 1 }
 0x212   : > { %v2458_v42 = vrot.slane %v2457_v35, 1  ;;  %v2328_v43 = vadd.f32 %v2327_v34, %v2326_v23  ;;  %v2342_v46 = vadd.f32 %v2341_v38, %v2340_v30  ;;  %v2472_v53 = vrot.slane %v2471_v63, 1 }
 0x213   : > { %v2464_v48 = vadd.f32 %v2463_v40, %v2462_v33  ;;  %v2348_v50 = vrot.slane %v2347_v44, 1  ;;  %v2477_v54 = vrot.slane %v2476_v45, 2  ;;  %v2992_v56 = vpack.c.bf16 %v3008_v62, %v3317_v49 }
 0x214   : > { %v2459_v59 = vadd.f32 %v2458_v42, %v2457_v35  ;;  %v2335_v60 = vadd.f32 %v2334_v47, %v2333_v39  ;;  %v2473_v55 = vadd.f32 %v2472_v53, %v2471_v63  ;;  %v2398_v9 = vrot.slane %v2390_v8, %v3290_v13 }
 0x215   : > { %v2465_v41 = vrot.slane %v2464_v48, 1  ;;  %v2349_v61 = vadd.f32 %v2348_v50, %v2347_v44  ;;  %v2478_v27 = vadd.f32 %v2477_v54, %v2476_v45  ;;  %2596 = vst [vmem:[%s3275_s7 + $0x38] sm:$0xff] %v2992_v56  ;;  %v2529_v16 = vrot.slane %v2521_v25, %v3290_v13 }
 0x216   : > { %v2360_v1 = vcombine.low %v2328_v43, %v2335_v60 }
 0x217   : > { %v2466_v3 = vadd.f32 %v2465_v41, %v2464_v48  ;;  %v2361_v4 = vcombine.low %v2342_v46, %v2349_v61  ;;  %v2479_v52 = vrot.slane %v2478_v27, 1 }
 0x218   : > { %v2382_v51 = vrot.slane %v2360_v1, %v3290_v13 }
 0x219   : > { %v2491_v2 = vcombine.low %v2459_v59, %v2466_v3  ;;  %v2389_v5 = vrot.slane %v2361_v4, %v3290_v13  ;;  %v2480_v6 = vadd.f32 %v2479_v52, %v2478_v27 }
 0x21b   : > { %v2513_v49 = vrot.slane %v2491_v2, %v3290_v13  ;;  %v2391_v62 = vcombine.low %v2382_v51, %v2389_v5  ;;  %v2492_v10 = vcombine.low %v2473_v55, %v2480_v6 }
 0x21d   : > { %v2405_v11 = vrot.slane %v2391_v62, %v3290_v13  ;;  %v2520_v12 = vrot.slane %v2492_v10, %v3290_v13 }
 0x21f   : > { %v2406_v14 = vcombine.low %v2398_v9, %v2405_v11  ;;  %v2522_v15 = vcombine.low %v2513_v49, %v2520_v12 }
 0x221   : > { %2408 = vst [vmem:[%s287_s11] ss:$2 sm:$0xff] %v2406_v14  ;;  %v2536_v19 = vrot.slane %v2522_v15, %v3290_v13 }
 0x223   : > { %v2537_v58 = vcombine.low %v2529_v16, %v2536_v19 }
 0x225   : > { %2971 = vst [vmem:[%s287_s11 + $0x1] ss:$2 sm:$0xff] %v2537_v58 }
 0x226 PF: > { %s18_s21 = sadd.s32 1, %s3085_s21  }
 0x227   : > { %p15_p5 = scmp.ge.s32.totalorder %s18_s21, 4  }
 0x229   :  { %17 = sbr.rel (!%p15_p5) target bundleno = 1 (0x1), region = 88 }
 0x230   :  { %2637 = vsyncpa [#allocation3], 1 }
 0x231   :  { %2639 = vsyncpa [#allocation3 + $0x1], 1 }

// kernel: generator_f0.11
= control target key start
LH: loop header
LB: loop body
LE: loop exit
PB: predicated region body
PF: predicated region fallthrough
CT: control target
= control target key end

     0   :  { %s1263_s21 = smov 0   ;;  %s1512_s0 = inlined_call_operand.vmem [shape: bf16[32,512], index: 0, kind: input, shape index: {}]   ;;  %s1513_s1 = inlined_call_operand.vmem [shape: f32[1,512], index: 1, kind: input, shape index: {}]   ;;  %s1514_s2 = inlined_call_operand.vmem [shape: f32[1,512], index: 2, kind: input, shape index: {}]   ;;  %s1515_s3 = inlined_call_operand.vmem [shape: bf16[512,256], index: 3, kind: input, shape index: {}]   ;;  %s1516_s4 = inlined_call_operand.vmem [shape: f32[1,256], index: 4, kind: input, shape index: {}]   ;;  %s1517_s5 = inlined_call_operand.vmem [shape: bf16[32,256], index: 5, kind: output, shape index: {0}]   ;;  %s1518_s6 = inlined_call_operand.vmem [shape: f32[2,2,256], index: 6, kind: output, shape index: {1}]  }
   0x1 LB: > { %s1269_s22 = sadd.s32 4294967295, %s1225_s21   ;;  %p1023_p0 = scmp.ge.s32.totalorder %s1225_s21, 1  ;;  %s1225_s21 = sphi %s1263_s21, %s17_s21  }
   0x2   : > { %p217_p1 = scmp.lt.s32.totalorder %s1225_s21, 3 }
   0x4   : > { %p218_p2 = pnand %p1023_p0, %p217_p1 }
   0x5   : > { %v1123_v0 = vld [vmem:[%s1515_s3 + $0x4] ss:$8 sps:$4 sm:$0xff] (!%p218_p2)   ;;  %v1127_v2 = vld [vmem:[%s1515_s3] ss:$8 sps:$4 sm:$0xff] (!%p218_p2)   ;;  %v1129_v4 = vld [vmem:[%s1515_s3 + $0x14] ss:$8 sps:$4 sm:$0xff] (!%p218_p2)   ;;  %v287_v36 = vlaneseq (!%p218_p2) }
   0x6   : > { %221 = sbr.rel (%p218_p2) target bundleno = 312 (0x138), region = 40  ;;  %v1125_v1 = vld [vmem:[%s1515_s3 + $0x104] ss:$8 sps:$4 sm:$0xff] (!%p218_p2)   ;;  %753 = vmatprep.subr.bf16.mxu1 (!%p218_p2), %v1123_v0  ;;  %v1128_v3 = vld [vmem:[%s1515_s3 + $0x100] ss:$8 sps:$4 sm:$0xff] (!%p218_p2)   ;;  %s1024_s15 = sshll.u32 (!%p218_p2), %s1269_s22, 1 }
   0x7   : > { %796 = vmatprep.subr.bf16.mxu0 (!%p218_p2), %v1125_v1  ;;  %754 = vmatpush1.bf16.msra.mxu1 (!%p218_p2), %v1127_v2  ;;  %v1131_v5 = vld [vmem:[%s1515_s3 + $0x114] ss:$8 sps:$4 sm:$0xff] (!%p218_p2)   ;;  %v1133_v6 = vld [vmem:[%s1515_s3 + $0x10] ss:$8 sps:$4 sm:$0xff] (!%p218_p2)   ;;  %v1135_v8 = vld [vmem:[%s1515_s3 + $0x24] ss:$8 sps:$4 sm:$0xff] (!%p218_p2)  }
   0x8   : > { %797 = vmatpush1.bf16.msra.mxu0 (!%p218_p2), %v1128_v3  ;;  %755 = vmatprep.subr.bf16.mxu1 (!%p218_p2), %v1129_v4  ;;  %v1134_v7 = vld [vmem:[%s1515_s3 + $0x110] ss:$8 sps:$4 sm:$0xff] (!%p218_p2)   ;;  %v1137_v9 = vld [vmem:[%s1515_s3 + $0x124] ss:$8 sps:$4 sm:$0xff] (!%p218_p2)   ;;  %v1139_v10 = vld [vmem:[%s1515_s3 + $0x20] ss:$8 sps:$4 sm:$0xff] (!%p218_p2)  }
   0x9   : > { %798 = vmatprep.subr.bf16.mxu0 (!%p218_p2), %v1131_v5  ;;  %v1140_v11 = vld [vmem:[%s1515_s3 + $0x120] ss:$8 sps:$4 sm:$0xff] (!%p218_p2)   ;;  %v1141_v12 = vld [vmem:[%s1515_s3 + $0x34] ss:$8 sps:$4 sm:$0xff] (!%p218_p2)   ;;  %v1145_v14 = vld [vmem:[%s1515_s3 + $0x30] ss:$8 sps:$4 sm:$0xff] (!%p218_p2)  }
   0xa   : > { %v1143_v13 = vld [vmem:[%s1515_s3 + $0x134] ss:$8 sps:$4 sm:$0xff] (!%p218_p2)   ;;  %v1146_v15 = vld [vmem:[%s1515_s3 + $0x130] ss:$8 sps:$4 sm:$0xff] (!%p218_p2)   ;;  %v1147_v16 = vld [vmem:[%s1515_s3 + $0x44] ss:$8 sps:$4 sm:$0xff] (!%p218_p2)  }
   0xb   : > { %756 = vmatpush1.bf16.msra.mxu1 (!%p218_p2), %v1133_v6  ;;  %v1149_v17 = vld [vmem:[%s1515_s3 + $0x144] ss:$8 sps:$4 sm:$0xff] (!%p218_p2)   ;;  %v1151_v18 = vld [vmem:[%s1515_s3 + $0x40] ss:$8 sps:$4 sm:$0xff] (!%p218_p2)   ;;  %v1153_v20 = vld [vmem:[%s1515_s3 + $0x54] ss:$8 sps:$4 sm:$0xff] (!%p218_p2)  }
   0xc   : > { %799 = vmatpush1.bf16.msra.mxu0 (!%p218_p2), %v1134_v7  ;;  %757 = vmatprep.subr.bf16.mxu1 (!%p218_p2), %v1135_v8  ;;  %v1152_v19 = vld [vmem:[%s1515_s3 + $0x140] ss:$8 sps:$4 sm:$0xff] (!%p218_p2)   ;;  %v1155_v21 = vld [vmem:[%s1515_s3 + $0x154] ss:$8 sps:$4 sm:$0xff] (!%p218_p2)   ;;  %v1157_v22 = vld [vmem:[%s1515_s3 + $0x50] ss:$8 sps:$4 sm:$0xff] (!%p218_p2)  }
   0xd   : > { %800 = vmatprep.subr.bf16.mxu0 %v1137_v9  ;;  %v1158_v23 = vld [vmem:[%s1515_s3 + $0x150] ss:$8 sps:$4 sm:$0xff]   ;;  %v1159_v24 = vld [vmem:[%s1515_s3 + $0x64] ss:$8 sps:$4 sm:$0xff]   ;;  %v1163_v26 = vld [vmem:[%s1515_s3 + $0x60] ss:$8 sps:$4 sm:$0xff]  }
   0xe   : > { %v1161_v25 = vld [vmem:[%s1515_s3 + $0x164] ss:$8 sps:$4 sm:$0xff]   ;;  %v1164_v27 = vld [vmem:[%s1515_s3 + $0x160] ss:$8 sps:$4 sm:$0xff]   ;;  %v1165_v28 = vld [vmem:[%s1515_s3 + $0x74] ss:$8 sps:$4 sm:$0xff]  }
   0xf   : > { %758 = vmatpush1.bf16.msra.mxu1 %v1139_v10  ;;  %v1167_v29 = vld [vmem:[%s1515_s3 + $0x174] ss:$8 sps:$4 sm:$0xff]   ;;  %v1169_v30 = vld [vmem:[%s1515_s3 + $0x70] ss:$8 sps:$4 sm:$0xff]   ;;  %v1171_v32 = vld [vmem:[%s1515_s3 + $0x84] ss:$8 sps:$4 sm:$0xff]  }
  0x10   : > { %801 = vmatpush1.bf16.msra.mxu0 %v1140_v11  ;;  %759 = vmatprep.subr.bf16.mxu1 %v1141_v12  ;;  %v1170_v31 = vld [vmem:[%s1515_s3 + $0x170] ss:$8 sps:$4 sm:$0xff]   ;;  %p255_p3 = scmp.lt.s32.totalorder %s1024_s15, 3  ;;  %v1173_v33 = vld [vmem:[%s1515_s3 + $0x184] ss:$8 sps:$4 sm:$0xff]   ;;  %v1394_v40 = vshrl.u32 %v287_v36, 7 }
  0x11   : > { %802 = vmatprep.subr.bf16.mxu0 %v1143_v13  ;;  %v1175_v34 = vld [vmem:[%s1515_s3 + $0x80] ss:$8 sps:$4 sm:$0xff]   ;;  %v1177_v37 = vld [vmem:[%s1515_s3 + $0x94] ss:$8 sps:$4 sm:$0xff]   ;;  %v1181_v39 = vld [vmem:[%s1515_s3 + $0x90] ss:$8 sps:$4 sm:$0xff]  }
  0x12   : > { %v1176_v35 = vld [vmem:[%s1515_s3 + $0x180] ss:$8 sps:$4 sm:$0xff]   ;;  %s1520_s15 = smov (!%p255_p3, %s1024_s15), 3  ;;  %v1179_v38 = vld [vmem:[%s1515_s3 + $0x194] ss:$8 sps:$4 sm:$0xff]   ;;  %v1419_v47 = vsub.s32 1, %v1394_v40 }
  0x13   : > { %760 = vmatpush1.bf16.msra.mxu1 %v1145_v14  ;;  %v1182_v41 = vld [vmem:[%s1515_s3 + $0x190] ss:$8 sps:$4 sm:$0xff]   ;;  %v1183_v42 = vld [vmem:[%s1515_s3 + $0xa4] ss:$8 sps:$4 sm:$0xff]   ;;  %s1101_s17 = sshll.u32 %s1520_s15, 4  ;;  %v301_v51 = vsub.s32 3, %v1394_v40 }
  0x14   : > { %803 = vmatpush1.bf16.msra.mxu0 %v1146_v15  ;;  %761 = vmatprep.subr.bf16.mxu1 %v1147_v16  ;;  %v1185_v43 = vld [vmem:[%s1515_s3 + $0x1a4] ss:$8 sps:$4 sm:$0xff]   ;;  %v1187_v44 = vld [vmem:[%s1515_s3 + $0xa0] ss:$8 sps:$4 sm:$0xff]   ;;  %s259_s28 = scalar_lea.vmem %s1512_s0, %s1101_s17  ;;  %v1189_v46 = vld [vmem:[%s1515_s3 + $0xb4] ss:$8 sps:$4 sm:$0xff]  }
  0x15   : > { %804 = vmatprep.subr.bf16.mxu0 %v1149_v17  ;;  %v1188_v45 = vld [vmem:[%s1515_s3 + $0x1a0] ss:$8 sps:$4 sm:$0xff]   ;;  %v1191_v48 = vld [vmem:[%s1515_s3 + $0x1b4] ss:$8 sps:$4 sm:$0xff]   ;;  %v1193_v49 = vld [vmem:[%s1515_s3 + $0xb0] ss:$8 sps:$4 sm:$0xff]  }
  0x16   : > { %v273_v50 = vld [vmem:[%s259_s28] sm:$0xff]  ;;  %v1429_v52 = vsub.s32 0, %v1394_v40  ;;  %v275_v53 = vld [vmem:[%s259_s28 + $0x10] sm:$0xff]  ;;  %v297_v57 = vsub.s32 2, %v1394_v40  ;;  %v274_v62 = vld [vmem:[%s259_s28 + $0x8] sm:$0xff]  ;;  %s1102_s9 = sshll.u32 %s1520_s15, 3 }
  0x17   : > { %762 = vmatpush1.bf16.msra.mxu1 %v1151_v18  ;;  %v278_v54 = vunpack.c.h.bf16 %v273_v50  ;;  %v285_v55 = vld [vmem:[%s1513_s1] sm:$0xf]  ;;  %v1194_v58 = vld [vmem:[%s1515_s3 + $0x1b0] ss:$8 sps:$4 sm:$0xff]   ;;  %v282_v59 = vunpack.c.h.bf16 %v275_v53  ;;  %v1195_v0 = vld [vmem:[%s1515_s3 + $0xc4] ss:$8 sps:$4 sm:$0xff]   ;;  %v277_v2 = vunpack.c.l.bf16 %v273_v50  ;;  %v281_v3 = vunpack.c.l.bf16 %v275_v53  ;;  %s266_s12 = scalar_lea.vmem %s1517_s5, %s1102_s9 }
  0x18   : > { %805 = vmatpush1.bf16.msra.mxu0 %v1152_v19  ;;  %763 = vmatprep.subr.bf16.mxu1 %v1153_v20  ;;  %v315_v56 = vld [vmem:[%s1514_s2] sm:$0xf]  ;;  %v294_v60 = vrot.slane %v285_v55, %v1419_v47  ;;  %v276_v63 = vld [vmem:[%s259_s28 + $0x18] sm:$0xff]  ;;  %v1197_v1 = vld [vmem:[%s1515_s3 + $0x1c4] ss:$8 sps:$4 sm:$0xff]   ;;  %v280_v4 = vunpack.c.h.bf16 %v274_v62  ;;  %v302_v8 = vrot.slane %v285_v55, %v301_v51  ;;  %v279_v10 = vunpack.c.l.bf16 %v274_v62  ;;  %p268_p4 = scmp.lt.s32.totalorder %s1269_s22, 1 }
  0x19   : > { %806 = vmatprep.subr.bf16.mxu0 %v1155_v21  ;;  %v324_v61 = vrot.slane %v315_v56, %v1419_v47  ;;  %v284_v5 = vunpack.c.h.bf16 %v276_v63  ;;  %v332_v9 = vrot.slane %v315_v56, %v301_v51  ;;  %v283_v11 = vunpack.c.l.bf16 %v276_v63  ;;  %v1199_v14 = vld [vmem:[%s1515_s3 + $0xc0] ss:$8 sps:$4 sm:$0xff]   ;;  %v1201_v19 = vld [vmem:[%s1515_s3 + $0xd4] ss:$8 sps:$4 sm:$0xff]  }
  0x1a   : > { %v308_v6 = vmul.f32 %v294_v60, %v278_v54  ;;  %v312_v7 = vmul.f32 %v294_v60, %v282_v59  ;;  %v290_v12 = vrot.slane %v285_v55, %v1429_v52  ;;  %v298_v13 = vrot.slane %v285_v55, %v297_v57  ;;  %v1200_v15 = vld [vmem:[%s1515_s3 + $0x1c0] ss:$8 sps:$4 sm:$0xff]   ;;  %v1203_v20 = vld [vmem:[%s1515_s3 + $0x1d4] ss:$8 sps:$4 sm:$0xff]   ;;  %s1522_s22 = smov (!%p268_p4, %s1269_s22), 1 }
  0x1b   : > { %764 = vmatpush1.bf16.msra.mxu1 %v1157_v22  ;;  %v310_v18 = vmul.f32 %v302_v8, %v280_v4  ;;  %v314_v21 = vmul.f32 %v302_v8, %v284_v5  ;;  %v320_v22 = vrot.slane %v315_v56, %v1429_v52  ;;  %v1215_v50 = vld [vmem:[%s1515_s3 + $0x1f4] ss:$8 sps:$4 sm:$0xff]   ;;  %v421_v60 = vld [vmem:[%s1516_s4] sm:$0x3]  ;;  %s1103_s15 = sshll.u32 %s1522_s22, 2  ;;  %vm873_vm0 = vcmp.lt.s32.totalorder %v287_v36, 256 }
  0x1c   : > { %807 = vmatpush1.bf16.msra.mxu0 %v1158_v23  ;;  %765 = vmatprep.subr.bf16.mxu1 %v1159_v24  ;;  %v338_v16 = vadd.f32 %v324_v61, %v308_v6  ;;  %v342_v17 = vadd.f32 %v324_v61, %v312_v7  ;;  %v328_v23 = vrot.slane %v315_v56, %v297_v57  ;;  %v1217_v56 = vld [vmem:[%s1515_s3 + $0xf0] ss:$8 sps:$4 sm:$0xff]   ;;  %s272_s16 = scalar_lea.vmem %s1518_s6, %s1103_s15 }
  0x1d   : > { %808 = vmatprep.subr.bf16.mxu0 %v1161_v25  ;;  %v1218_v57 = vld [vmem:[%s1515_s3 + $0x1f0] ss:$8 sps:$4 sm:$0xff]   ;;  %v426_v61 = vrot.slane %v421_v60, %v1429_v52  ;;  %v430_v62 = vrot.slane %v421_v60, %v1419_v47 }
  0x1e   : > { %v346_v24 = vmax.f32 %v338_v16, 0.0  ;;  %v350_v25 = vmax.f32 %v342_v17, 0.0 }
  0x1f   : > { %766 = vmatpush1.bf16.msra.mxu1 %v1163_v26  ;;  %v340_v26 = vadd.f32 %v332_v9, %v310_v18 }
  0x20   : > { %809 = vmatpush1.bf16.msra.mxu0 %v1164_v27  ;;  %767 = vmatprep.subr.bf16.mxu1 %v1165_v28  ;;  %v307_v27 = vmul.f32 %v290_v12, %v277_v2  ;;  %v344_v28 = vadd.f32 %v332_v9, %v314_v21 }
  0x21   : > { %810 = vmatprep.subr.bf16.mxu0 %v1167_v29  ;;  %v311_v29 = vmul.f32 %v290_v12, %v281_v3 }
  0x23   : > { %768 = vmatpush1.bf16.msra.mxu1 %v1169_v30  ;;  %v309_v30 = vmul.f32 %v298_v13, %v279_v10 }
  0x24   : > { %811 = vmatpush1.bf16.msra.mxu0 %v1170_v31  ;;  %769 = vmatprep.subr.bf16.mxu1 %v1171_v32  ;;  %v313_v31 = vmul.f32 %v298_v13, %v283_v11  ;;  %v1205_v32 = vld [vmem:[%s1515_s3 + $0xd0] ss:$8 sps:$4 sm:$0xff]  }
  0x25   : > { %812 = vmatprep.subr.bf16.mxu0 %v1173_v33  ;;  %v1206_v33 = vld [vmem:[%s1515_s3 + $0x1d0] ss:$8 sps:$4 sm:$0xff]  }
  0x27   : > { %770 = vmatpush1.bf16.msra.mxu1 %v1175_v34  ;;  %v354_v34 = vpack.c.bf16 %v350_v25, %v346_v24 }
  0x28   : > { %813 = vmatpush1.bf16.msra.mxu0 %v1176_v35  ;;  %771 = vmatprep.subr.bf16.mxu1 %v1177_v37  ;;  %v348_v35 = vmax.f32 %v340_v26, 0.0  ;;  %v1207_v37 = vld [vmem:[%s1515_s3 + $0xe4] ss:$8 sps:$4 sm:$0xff]  }
  0x29   : > { %814 = vmatprep.subr.bf16.mxu0 %v1179_v38  ;;  %v1209_v38 = vld [vmem:[%s1515_s3 + $0x1e4] ss:$8 sps:$4 sm:$0xff]   ;;  %785 = vmatprep.mubr.bf16.mxu1 %v354_v34 }
  0x2b   : > { %772 = vmatpush1.bf16.msra.mxu1 %v1181_v39  ;;  %v352_v39 = vmax.f32 %v344_v28, 0.0  ;;  %v1227_v28 = vmov 1966171168  }
  0x2c   : > { %815 = vmatpush1.bf16.msra.mxu0 %v1182_v41  ;;  %773 = vmatprep.subr.bf16.mxu1 %v1183_v42  ;;  %v337_v41 = vadd.f32 %v320_v22, %v307_v27 }
  0x2d   : > { %816 = vmatprep.subr.bf16.mxu0 %v1185_v43  ;;  %v356_v42 = vpack.c.bf16 %v352_v39, %v348_v35  ;;  %v341_v43 = vadd.f32 %v320_v22, %v311_v29  ;;  %v857_v29 = vunpack.c.l.s4 %v1227_v28 }
  0x2e   : > { %v345_v51 = vmax.f32 %v337_v41, 0.0 }
  0x2f   : > { %774 = vmatpush1.bf16.msra.mxu1 %v1187_v44  ;;  %v339_v44 = vadd.f32 %v328_v23, %v309_v30  ;;  %828 = vmatprep.mubr.bf16.mxu0 %v356_v42  ;;  %v349_v53 = vmax.f32 %v341_v43, 0.0  ;;  %v858_v39 = vunpack.c.0.s8 %v857_v29 }
  0x30   : > { %817 = vmatpush1.bf16.msra.mxu0 %v1188_v45  ;;  %775 = vmatprep.subr.bf16.mxu1 %v1189_v46  ;;  %v343_v45 = vadd.f32 %v328_v23, %v313_v31  ;;  %v1211_v46 = vld [vmem:[%s1515_s3 + $0xe0] ss:$8 sps:$4 sm:$0xff]  }
  0x31   : > { %818 = vmatprep.subr.bf16.mxu0 %v1191_v48  ;;  %v1212_v48 = vld [vmem:[%s1515_s3 + $0x1e0] ss:$8 sps:$4 sm:$0xff]   ;;  %v347_v54 = vmax.f32 %v339_v44, 0.0 }
  0x32   : > { %v351_v55 = vmax.f32 %v343_v45, 0.0 }
  0x33   : > { %776 = vmatpush1.bf16.msra.mxu1 %v1193_v49  ;;  %v1213_v49 = vld [vmem:[%s1515_s3 + $0xf4] ss:$8 sps:$4 sm:$0xff]  }
  0x34   : > { %819 = vmatpush1.bf16.msra.mxu0 %v1194_v58  ;;  %777 = vmatprep.subr.bf16.mxu1 %v1195_v0  ;;  %v353_v58 = vpack.c.bf16 %v349_v53, %v345_v51  ;;  %v355_v59 = vpack.c.bf16 %v351_v55, %v347_v54 }
  0x35   : > { %820 = vmatprep.subr.bf16.mxu0 %v1197_v1 }
  0x37   : > { %778 = vmatpush1.bf16.msra.mxu1 %v1199_v14 }
  0x38   : > { %821 = vmatpush1.bf16.msra.mxu0 %v1200_v15  ;;  %779 = vmatprep.subr.bf16.mxu1 %v1201_v19 }
  0x39   : > { %822 = vmatprep.subr.bf16.mxu0 %v1203_v20 }
  0x3b   : > { %780 = vmatpush1.bf16.msra.mxu1 %v1205_v32 }
  0x3c   : > { %823 = vmatpush1.bf16.msra.mxu0 %v1206_v33  ;;  %781 = vmatprep.subr.bf16.mxu1 %v1207_v37 }
  0x3d   : > { %824 = vmatprep.subr.bf16.mxu0 %v1209_v38 }
  0x3f   : > { %782 = vmatpush1.bf16.msra.mxu1 %v1211_v46 }
  0x40   : > { %825 = vmatpush1.bf16.msra.mxu0 %v1212_v48  ;;  %783 = vmatprep.subr.bf16.mxu1 %v1213_v49 }
  0x41   : > { %826 = vmatprep.subr.bf16.mxu0 %v1215_v50  ;;  %v861_v50 = vsub.s32 %v858_v39, %v1394_v40 }
  0x43   : > { %784 = vmatpush1.bf16.msra.mxu1 %v1217_v56 }
  0x44   : > { %827 = vmatpush1.bf16.msra.mxu0 %v1218_v57 }
  0x46   : > { %786 = vmatmul.mubr.bf16.vlgmr.msra.gmra.mrb[0].mxu1 %v353_v58 }
  0x47   : > { %829 = vmatmul.mubr.bf16.vlgmr.msra.gmra.mrb[0].mxu0 %v355_v59 }
 0x119   : > { %v787_v63 = vpop.f32.mrb[0].mxu1 }
 0x11a   : > { %v830_v0 = vpop.f32.mrb[0].mxu0  ;;  %v788_v1 = vadd.f32 %v787_v63, %v426_v61  ;;  %v789_v2 = vpop.f32.mrb[1].mxu1 }
 0x11b   : > { %v832_v3 = vpop.f32.mrb[1].mxu0  ;;  %v790_v4 = vadd.f32 %v789_v2, %v430_v62  ;;  %v791_v5 = vpop.f32.mrb[2].mxu1 }
 0x11c   : > { %v834_v6 = vpop.f32.mrb[2].mxu0  ;;  %v831_v7 = vadd.f32 %v830_v0, %v788_v1  ;;  %v792_v8 = vadd.f32 %v791_v5, %v426_v61  ;;  %v793_v9 = vpop.f32.mrb[3].mxu1 }
 0x11d   : > { %v836_v10 = vpop.f32.mrb[3].mxu0  ;;  %v833_v11 = vadd.f32 %v832_v3, %v790_v4  ;;  %v794_v12 = vadd.f32 %v793_v9, %v430_v62 }
 0x11e   : > { %v835_v47 = vadd.f32 %v834_v6, %v792_v8  ;;  %v876_v14 = vmul.f32 %v831_v7, %v831_v7 }
 0x11f   : > { %v1104_v52 = vpack.c.bf16 %v833_v11, %v831_v7  ;;  %v837_v13 = vadd.f32 %v836_v10, %v794_v12  ;;  %v877_v17 = vmul.f32 %v833_v11, %v833_v11 }
 0x120   : > { %v839_v15 = vadd.f32 %v835_v47, %v831_v7  ;;  %v878_v16 = vmul.f32 %v835_v47, %v835_v47 }
 0x121   : > { %926 = vst [vmem:[%s266_s12] sm:$0xff] %v1104_v52  ;;  %v846_v18 = vadd.f32 %v837_v13, %v833_v11  ;;  %v879_v19 = vmul.f32 %v837_v13, %v837_v13  ;;  %v1105_v20 = vpack.c.bf16 %v837_v13, %v835_v47 }
 0x122   : > { %v840_v21 = vrot.slane %v839_v15, 4  ;;  %v880_v22 = vadd.f32 %v878_v16, %v876_v14 }
 0x123   : > { %v847_v23 = vrot.slane %v846_v18, 4  ;;  %v887_v24 = vadd.f32 %v879_v19, %v877_v17  ;;  %927 = vst [vmem:[%s266_s12 + $0x8] sm:$0xff] %v1105_v20 }
 0x124   : > { %v841_v25 = vadd.f32 %v840_v21, %v839_v15  ;;  %v881_v26 = vrot.slane %v880_v22, 4 }
 0x125   : > { %v848_v27 = vadd.f32 %v847_v23, %v846_v18  ;;  %v888_v30 = vrot.slane %v887_v24, 4 }
 0x126   : > { %v842_v31 = vrot.slane %v841_v25, 2  ;;  %v882_v32 = vadd.f32 %v881_v26, %v880_v22 }
 0x127   : > { %v849_v33 = vrot.slane %v848_v27, 2  ;;  %v889_v34 = vadd.f32 %v888_v30, %v887_v24 }
 0x128   : > { %v843_v35 = vadd.f32 %v842_v31, %v841_v25  ;;  %v883_v37 = vrot.slane %v882_v32, 2 }
 0x129   : > { %v850_v38 = vadd.f32 %v849_v33, %v848_v27  ;;  %v890_v41 = vrot.slane %v889_v34, 2 }
 0x12a   : > { %v844_v42 = vrot.slane %v843_v35, 1  ;;  %v884_v43 = vadd.f32 %v883_v37, %v882_v32 }
 0x12b   : > { %v851_v44 = vrot.slane %v850_v38, 1  ;;  %v891_v45 = vadd.f32 %v890_v41, %v889_v34 }
 0x12c   : > { %v845_v46 = vadd.f32 %v844_v42, %v843_v35  ;;  %v885_v48 = vrot.slane %v884_v43, 1 }
 0x12d   : > { %v852_v49 = vadd.f32 %v851_v44, %v850_v38  ;;  %v892_v51 = vrot.slane %v891_v45, 1 }
 0x12e   : > { %v886_v53 = vadd.f32 %v885_v48, %v884_v43 }
 0x12f   : > { %v855_v54 = vcombine.low %v845_v46, %v852_v49  ;;  %v893_v55 = vadd.f32 %v892_v51, %v891_v45 }
 0x131   : > { %v862_v56 = vrot.slane %v855_v54, %v861_v50  ;;  %v896_v57 = vcombine.low %v886_v53, %v893_v55 }
 0x133   : > { %v869_v58 = vrot.slane %v862_v56, %v861_v50  ;;  %v903_v59 = vrot.slane %v896_v57, %v861_v50 }
 0x135   : > { %875 = vst.msk [vmem:[%s272_s16] ss:$2 sm:$0x3] %vm873_vm0, %v869_v58  ;;  %v910_v60 = vrot.slane %v903_v59, %v861_v50 }
 0x137   : > { %1096 = vst.msk [vmem:[%s272_s16 + $0x1] ss:$2 sm:$0x3] %vm873_vm0, %v910_v60 }
 0x138 PF: > { %s17_s21 = sadd.s32 1, %s1225_s21  }
 0x139   : > { %p14_p5 = scmp.ge.s32.totalorder %s17_s21, 4  }
 0x13b   :  { %16 = sbr.rel (!%p14_p5) target bundleno = 1 (0x1), region = 83 }

// kernel: generator_f0.10
= control target key start
LH: loop header
LB: loop body
LE: loop exit
PB: predicated region body
PF: predicated region fallthrough
CT: control target
= control target key end

     0   :  { %s3341_s21 = smov 0   ;;  %s4263_s0 = inlined_call_operand.vmem [shape: bf16[32,1024], index: 0, kind: input, shape index: {}]   ;;  %s4264_s1 = inlined_call_operand.vmem [shape: f32[1,1024], index: 1, kind: input, shape index: {}]   ;;  %s4265_s2 = inlined_call_operand.vmem [shape: f32[1,1024], index: 2, kind: input, shape index: {}]   ;;  %s4266_s3 = inlined_call_operand.vmem [shape: bf16[1024,512], index: 3, kind: input, shape index: {}]   ;;  %s4267_s4 = inlined_call_operand.vmem [shape: f32[1,512], index: 4, kind: input, shape index: {}]   ;;  %s4268_s5 = inlined_call_operand.vmem [shape: bf16[32,512], index: 5, kind: output, shape index: {0}]   ;;  %s4269_s6 = inlined_call_operand.vmem [shape: f32[2,2,512], index: 6, kind: output, shape index: {1}]  }
   0x1 LB: > { %s3347_s22 = sadd.s32 4294967295, %s3303_s21   ;;  %p2591_p0 = scmp.ge.s32.totalorder %s3303_s21, 1  ;;  %s3303_s21 = sphi %s3341_s21, %s17_s21  }
   0x2   : > { %p217_p1 = scmp.lt.s32.totalorder %s3303_s21, 3 }
   0x4   : > { %p218_p2 = pnand %p2591_p0, %p217_p1 }
   0x5   : > { %v2911_v0 = vld [vmem:[%s4266_s3 + $0x4] ss:$16 sps:$4 sm:$0xff] (!%p218_p2)   ;;  %v2913_v1 = vld [vmem:[%s4266_s3 + $0xc] ss:$16 sps:$4 sm:$0xff] (!%p218_p2)   ;;  %v2915_v2 = vld [vmem:[%s4266_s3] ss:$16 sps:$4 sm:$0xff] (!%p218_p2)   ;;  %v299_v36 = vlaneseq (!%p218_p2) }
   0x6   : > { %221 = sbr.rel (%p218_p2) target bundleno = 508 (0x1fc), region = 40  ;;  %1995 = vmatprep.subr.bf16.mxu0 (!%p218_p2), %v2911_v0  ;;  %v2916_v3 = vld [vmem:[%s4266_s3 + $0x8] ss:$16 sps:$4 sm:$0xff] (!%p218_p2)   ;;  %2167 = vmatprep.subr.bf16.mxu1 (!%p218_p2), %v2913_v1  ;;  %v2917_v4 = vld [vmem:[%s4266_s3 + $0x24] ss:$16 sps:$4 sm:$0xff] (!%p218_p2)   ;;  %s2592_s15 = sshll.u32 (!%p218_p2), %s3347_s22, 1 }
   0x7   : > { %1996 = vmatpush1.bf16.msra.mxu0 (!%p218_p2), %v2915_v2  ;;  %2168 = vmatpush1.bf16.msra.mxu1 (!%p218_p2), %v2916_v3  ;;  %v2919_v5 = vld [vmem:[%s4266_s3 + $0x2c] ss:$16 sps:$4 sm:$0xff] (!%p218_p2)   ;;  %v2921_v6 = vld [vmem:[%s4266_s3 + $0x20] ss:$16 sps:$4 sm:$0xff] (!%p218_p2)   ;;  %v2922_v7 = vld [vmem:[%s4266_s3 + $0x28] ss:$16 sps:$4 sm:$0xff] (!%p218_p2)  }
   0x8   : > { %1997 = vmatprep.subr.bf16.mxu0 (!%p218_p2), %v2917_v4  ;;  %2169 = vmatprep.subr.bf16.mxu1 (!%p218_p2), %v2919_v5  ;;  %v2923_v8 = vld [vmem:[%s4266_s3 + $0x44] ss:$16 sps:$4 sm:$0xff] (!%p218_p2)   ;;  %v2925_v9 = vld [vmem:[%s4266_s3 + $0x4c] ss:$16 sps:$4 sm:$0xff] (!%p218_p2)   ;;  %v2927_v10 = vld [vmem:[%s4266_s3 + $0x40] ss:$16 sps:$4 sm:$0xff] (!%p218_p2)  }
   0x9   : > { %v2928_v11 = vld [vmem:[%s4266_s3 + $0x48] ss:$16 sps:$4 sm:$0xff] (!%p218_p2)   ;;  %v2929_v12 = vld [vmem:[%s4266_s3 + $0x64] ss:$16 sps:$4 sm:$0xff] (!%p218_p2)   ;;  %v2931_v13 = vld [vmem:[%s4266_s3 + $0x6c] ss:$16 sps:$4 sm:$0xff] (!%p218_p2)  }
   0xa   : > { %v2933_v14 = vld [vmem:[%s4266_s3 + $0x60] ss:$16 sps:$4 sm:$0xff] (!%p218_p2)   ;;  %v2934_v15 = vld [vmem:[%s4266_s3 + $0x68] ss:$16 sps:$4 sm:$0xff] (!%p218_p2)   ;;  %v2935_v16 = vld [vmem:[%s4266_s3 + $0x84] ss:$16 sps:$4 sm:$0xff] (!%p218_p2)  }
   0xb   : > { %1998 = vmatpush1.bf16.msra.mxu0 (!%p218_p2), %v2921_v6  ;;  %2170 = vmatpush1.bf16.msra.mxu1 (!%p218_p2), %v2922_v7  ;;  %v2937_v17 = vld [vmem:[%s4266_s3 + $0x8c] ss:$16 sps:$4 sm:$0xff] (!%p218_p2)   ;;  %v2939_v18 = vld [vmem:[%s4266_s3 + $0x80] ss:$16 sps:$4 sm:$0xff] (!%p218_p2)   ;;  %v2940_v19 = vld [vmem:[%s4266_s3 + $0x88] ss:$16 sps:$4 sm:$0xff] (!%p218_p2)  }
   0xc   : > { %1999 = vmatprep.subr.bf16.mxu0 (!%p218_p2), %v2923_v8  ;;  %2171 = vmatprep.subr.bf16.mxu1 (!%p218_p2), %v2925_v9  ;;  %v2941_v20 = vld [vmem:[%s4266_s3 + $0xa4] ss:$16 sps:$4 sm:$0xff] (!%p218_p2)   ;;  %v2943_v21 = vld [vmem:[%s4266_s3 + $0xac] ss:$16 sps:$4 sm:$0xff] (!%p218_p2)   ;;  %v2945_v22 = vld [vmem:[%s4266_s3 + $0xa0] ss:$16 sps:$4 sm:$0xff] (!%p218_p2)  }
   0xd   : > { %v2946_v23 = vld [vmem:[%s4266_s3 + $0xa8] ss:$16 sps:$4 sm:$0xff]   ;;  %v2947_v24 = vld [vmem:[%s4266_s3 + $0xc4] ss:$16 sps:$4 sm:$0xff]   ;;  %v2949_v25 = vld [vmem:[%s4266_s3 + $0xcc] ss:$16 sps:$4 sm:$0xff]  }
   0xe   : > { %v2951_v26 = vld [vmem:[%s4266_s3 + $0xc0] ss:$16 sps:$4 sm:$0xff]   ;;  %v2952_v27 = vld [vmem:[%s4266_s3 + $0xc8] ss:$16 sps:$4 sm:$0xff]   ;;  %v2953_v28 = vld [vmem:[%s4266_s3 + $0xe4] ss:$16 sps:$4 sm:$0xff]  }
   0xf   : > { %2000 = vmatpush1.bf16.msra.mxu0 %v2927_v10  ;;  %2172 = vmatpush1.bf16.msra.mxu1 %v2928_v11  ;;  %v2955_v29 = vld [vmem:[%s4266_s3 + $0xec] ss:$16 sps:$4 sm:$0xff]   ;;  %v2957_v30 = vld [vmem:[%s4266_s3 + $0xe0] ss:$16 sps:$4 sm:$0xff]   ;;  %v2958_v31 = vld [vmem:[%s4266_s3 + $0xe8] ss:$16 sps:$4 sm:$0xff]  }
  0x10   : > { %2001 = vmatprep.subr.bf16.mxu0 %v2929_v12  ;;  %2173 = vmatprep.subr.bf16.mxu1 %v2931_v13  ;;  %v2959_v32 = vld [vmem:[%s4266_s3 + $0x104] ss:$16 sps:$4 sm:$0xff]   ;;  %p255_p3 = scmp.lt.s32.totalorder %s2592_s15, 3  ;;  %v2961_v33 = vld [vmem:[%s4266_s3 + $0x10c] ss:$16 sps:$4 sm:$0xff]   ;;  %v3472_v40 = vshrl.u32 %v299_v36, 7 }
  0x11   : > { %v2963_v34 = vld [vmem:[%s4266_s3 + $0x100] ss:$16 sps:$4 sm:$0xff]   ;;  %v2964_v35 = vld [vmem:[%s4266_s3 + $0x108] ss:$16 sps:$4 sm:$0xff]   ;;  %v2965_v37 = vld [vmem:[%s4266_s3 + $0x124] ss:$16 sps:$4 sm:$0xff]  }
  0x12   : > { %s4271_s15 = smov (!%p255_p3, %s2592_s15), 3  ;;  %v2967_v38 = vld [vmem:[%s4266_s3 + $0x12c] ss:$16 sps:$4 sm:$0xff]   ;;  %v2969_v39 = vld [vmem:[%s4266_s3 + $0x120] ss:$16 sps:$4 sm:$0xff]   ;;  %v3499_v47 = vsub.s32 1, %v3472_v40 }
  0x13   : > { %2002 = vmatpush1.bf16.msra.mxu0 %v2933_v14  ;;  %2174 = vmatpush1.bf16.msra.mxu1 %v2934_v15  ;;  %v2970_v41 = vld [vmem:[%s4266_s3 + $0x128] ss:$16 sps:$4 sm:$0xff]   ;;  %v2971_v42 = vld [vmem:[%s4266_s3 + $0x144] ss:$16 sps:$4 sm:$0xff]   ;;  %s2863_s17 = sshll.u32 %s4271_s15, 5  ;;  %v3523_v56 = vsub.s32 0, %v3472_v40 }
  0x14   : > { %2003 = vmatprep.subr.bf16.mxu0 %v2935_v16  ;;  %2175 = vmatprep.subr.bf16.mxu1 %v2937_v17  ;;  %v2973_v43 = vld [vmem:[%s4266_s3 + $0x14c] ss:$16 sps:$4 sm:$0xff]   ;;  %v2975_v44 = vld [vmem:[%s4266_s3 + $0x140] ss:$16 sps:$4 sm:$0xff]   ;;  %v2976_v45 = vld [vmem:[%s4266_s3 + $0x148] ss:$16 sps:$4 sm:$0xff]   ;;  %s3493_s28 = scalar_lea.vmem %s4263_s0, %s2863_s17 }
  0x15   : > { %v2977_v46 = vld [vmem:[%s4266_s3 + $0x164] ss:$16 sps:$4 sm:$0xff]   ;;  %v2979_v48 = vld [vmem:[%s4266_s3 + $0x16c] ss:$16 sps:$4 sm:$0xff]   ;;  %v2981_v49 = vld [vmem:[%s4266_s3 + $0x160] ss:$16 sps:$4 sm:$0xff]  }
  0x16   : > { %v2982_v50 = vld [vmem:[%s4266_s3 + $0x168] ss:$16 sps:$4 sm:$0xff]   ;;  %v273_v51 = vld [vmem:[%s3493_s28] sm:$0xff]  ;;  %v2985_v61 = vld [vmem:[%s4266_s3 + $0x18c] ss:$16 sps:$4 sm:$0xff]   ;;  %s2864_s11 = sshll.u32 %s4271_s15, 4 }
  0x17   : > { %2004 = vmatpush1.bf16.msra.mxu0 %v2939_v18  ;;  %2176 = vmatpush1.bf16.msra.mxu1 %v2940_v19  ;;  %v277_v52 = vld [vmem:[%s3493_s28 + $0x20] sm:$0xff]  ;;  %v282_v53 = vunpack.c.h.bf16 %v273_v51  ;;  %v2988_v1 = vld [vmem:[%s4266_s3 + $0x188] ss:$16 sps:$4 sm:$0xff]   ;;  %v281_v2 = vunpack.c.l.bf16 %v273_v51  ;;  %v2991_v8 = vld [vmem:[%s4266_s3 + $0x1ac] ss:$16 sps:$4 sm:$0xff]   ;;  %s4236_s14 = scalar_lea.vmem %s4268_s5, %s2864_s11  ;;  %p268_p4 = scmp.lt.s32.totalorder %s3347_s22, 1 }
  0x18   : > { %2005 = vmatprep.subr.bf16.mxu0 %v2941_v20  ;;  %2177 = vmatprep.subr.bf16.mxu1 %v2943_v21  ;;  %v3515_v54 = vld [vmem:[%s4264_s1] sm:$0xff]  ;;  %v290_v58 = vunpack.c.h.bf16 %v277_v52  ;;  %v289_v3 = vunpack.c.l.bf16 %v277_v52  ;;  %v2994_v15 = vld [vmem:[%s4266_s3 + $0x1a8] ss:$16 sps:$4 sm:$0xff]   ;;  %v2997_v18 = vld [vmem:[%s4266_s3 + $0x1cc] ss:$16 sps:$4 sm:$0xff]   ;;  %vm2398_vm0 = vcmp.lt.s32.totalorder %v299_v36, 512 }
  0x19   : > { %v3520_v55 = vld [vmem:[%s4265_s2] sm:$0xff]  ;;  %v306_v59 = vrot.slane %v3515_v54, %v3499_v47  ;;  %v302_v4 = vrot.slane %v3515_v54, %v3523_v56  ;;  %v3034_v52 = vld [vmem:[%s4266_s3 + $0x288] ss:$16 sps:$4 sm:$0xff]   ;;  %s4273_s22 = smov (!%p268_p4, %s3347_s22), 1 }
  0x1a   : > { %v2983_v57 = vld [vmem:[%s4266_s3 + $0x184] ss:$16 sps:$4 sm:$0xff]   ;;  %v364_v60 = vrot.slane %v3520_v55, %v3499_v47  ;;  %v2987_v0 = vld [vmem:[%s4266_s3 + $0x180] ss:$16 sps:$4 sm:$0xff]   ;;  %v360_v14 = vrot.slane %v3520_v55, %v3523_v56  ;;  %s2865_s15 = sshll.u32 %s4273_s22, 3 }
  0x1b   : > { %2006 = vmatpush1.bf16.msra.mxu0 %v2945_v22  ;;  %2178 = vmatpush1.bf16.msra.mxu1 %v2946_v23  ;;  %v340_v62 = vmul.f32 %v306_v59, %v282_v53  ;;  %v348_v63 = vmul.f32 %v306_v59, %v290_v58  ;;  %v2989_v5 = vld [vmem:[%s4266_s3 + $0x1a4] ss:$16 sps:$4 sm:$0xff]   ;;  %v2993_v11 = vld [vmem:[%s4266_s3 + $0x1a0] ss:$16 sps:$4 sm:$0xff]   ;;  %v339_v12 = vmul.f32 %v302_v4, %v281_v2  ;;  %v3000_v22 = vld [vmem:[%s4266_s3 + $0x1c8] ss:$16 sps:$4 sm:$0xff]   ;;  %s272_s18 = scalar_lea.vmem %s4269_s6, %s2865_s15 }
  0x1c   : > { %2007 = vmatprep.subr.bf16.mxu0 %v2947_v24  ;;  %2179 = vmatprep.subr.bf16.mxu1 %v2949_v25  ;;  %v347_v13 = vmul.f32 %v302_v4, %v289_v3  ;;  %v2995_v17 = vld [vmem:[%s4266_s3 + $0x1c4] ss:$16 sps:$4 sm:$0xff]   ;;  %v2999_v19 = vld [vmem:[%s4266_s3 + $0x1c0] ss:$16 sps:$4 sm:$0xff]   ;;  %v3003_v24 = vld [vmem:[%s4266_s3 + $0x1ec] ss:$16 sps:$4 sm:$0xff]  }
  0x1d   : > { %v398_v6 = vadd.f32 %v364_v60, %v340_v62  ;;  %v406_v7 = vadd.f32 %v364_v60, %v348_v63  ;;  %v397_v20 = vadd.f32 %v360_v14, %v339_v12  ;;  %v3001_v23 = vld [vmem:[%s4266_s3 + $0x1e4] ss:$16 sps:$4 sm:$0xff]   ;;  %v3005_v25 = vld [vmem:[%s4266_s3 + $0x1e0] ss:$16 sps:$4 sm:$0xff]   ;;  %v3648_v58 = vsub.s32 3, %v3472_v40  ;;  %v3671_v2 = vld [vmem:[%s3493_s28 + $0x28] sm:$0xff] }
  0x1e   : > { %v405_v21 = vadd.f32 %v360_v14, %v347_v13  ;;  %v3031_v51 = vld [vmem:[%s4266_s3 + $0x280] ss:$16 sps:$4 sm:$0xff]   ;;  %v3039_v53 = vld [vmem:[%s4266_s3 + $0x2a4] ss:$16 sps:$4 sm:$0xff]   ;;  %v3040_v60 = vld [vmem:[%s4266_s3 + $0x2a8] ss:$16 sps:$4 sm:$0xff]  }
  0x1f   : > { %2008 = vmatpush1.bf16.msra.mxu0 %v2951_v26  ;;  %2180 = vmatpush1.bf16.msra.mxu1 %v2952_v27  ;;  %v414_v9 = vmax.f32 %v398_v6, 0.0  ;;  %v422_v10 = vmax.f32 %v406_v7, 0.0  ;;  %v413_v26 = vmax.f32 %v397_v20, 0.0  ;;  %v3037_v59 = vld [vmem:[%s4266_s3 + $0x2a0] ss:$16 sps:$4 sm:$0xff]   ;;  %v292_v6 = vunpack.c.h.bf16 %v3671_v2 }
  0x20   : > { %2009 = vmatprep.subr.bf16.mxu0 %v2953_v28  ;;  %2181 = vmatprep.subr.bf16.mxu1 %v2955_v29  ;;  %v421_v27 = vmax.f32 %v405_v21, 0.0  ;;  %v3006_v28 = vld [vmem:[%s4266_s3 + $0x1e8] ss:$16 sps:$4 sm:$0xff]   ;;  %v3009_v29 = vld [vmem:[%s4266_s3 + $0x204] ss:$16 sps:$4 sm:$0xff]   ;;  %v372_v7 = vrot.slane %v3520_v55, %v3648_v58 }
  0x21   : > { %v430_v16 = vpack.c.bf16 %v422_v10, %v414_v9  ;;  %v3048_v62 = vld [vmem:[%s4266_s3 + $0x2cc] ss:$16 sps:$4 sm:$0xff]   ;;  %v3043_v63 = vld [vmem:[%s4266_s3 + $0x2c0] ss:$16 sps:$4 sm:$0xff]   ;;  %v3046_v3 = vld [vmem:[%s4266_s3 + $0x2c8] ss:$16 sps:$4 sm:$0xff]  }
  0x22   : > { %v3051_v4 = vld [vmem:[%s4266_s3 + $0x2e4] ss:$16 sps:$4 sm:$0xff]   ;;  %v3052_v12 = vld [vmem:[%s4266_s3 + $0x2e8] ss:$16 sps:$4 sm:$0xff]  }
  0x23   : > { %2010 = vmatpush1.bf16.msra.mxu0 %v2957_v30  ;;  %2182 = vmatpush1.bf16.msra.mxu1 %v2958_v31  ;;  %v3012_v30 = vld [vmem:[%s4266_s3 + $0x20c] ss:$16 sps:$4 sm:$0xff]   ;;  %v3007_v31 = vld [vmem:[%s4266_s3 + $0x200] ss:$16 sps:$4 sm:$0xff]   ;;  %v3057_v13 = vld [vmem:[%s4266_s3 + $0x304] ss:$16 sps:$4 sm:$0xff]  }
  0x24   : > { %2011 = vmatprep.subr.bf16.mxu0 %v2959_v32  ;;  %2183 = vmatprep.subr.bf16.mxu1 %v2961_v33  ;;  %v429_v32 = vpack.c.bf16 %v421_v27, %v413_v26  ;;  %v3010_v33 = vld [vmem:[%s4266_s3 + $0x208] ss:$16 sps:$4 sm:$0xff]   ;;  %v3063_v21 = vld [vmem:[%s4266_s3 + $0x324] ss:$16 sps:$4 sm:$0xff]   ;;  %v3072_v27 = vld [vmem:[%s4266_s3 + $0x34c] ss:$16 sps:$4 sm:$0xff]  }
  0x25   : > { %2027 = vmatprep.mubr.bf16.mxu0 %v430_v16  ;;  %2199 = vmatprep.mubr.bf16.mxu1 %v430_v16  ;;  %v3060_v16 = vld [vmem:[%s4266_s3 + $0x30c] ss:$16 sps:$4 sm:$0xff]   ;;  %v3058_v20 = vld [vmem:[%s4266_s3 + $0x308] ss:$16 sps:$4 sm:$0xff]   ;;  %v3069_v26 = vld [vmem:[%s4266_s3 + $0x344] ss:$16 sps:$4 sm:$0xff]  }
  0x27   : > { %2012 = vmatpush1.bf16.msra.mxu0 %v2963_v34  ;;  %2184 = vmatpush1.bf16.msra.mxu1 %v2964_v35  ;;  %v3015_v34 = vld [vmem:[%s4266_s3 + $0x224] ss:$16 sps:$4 sm:$0xff]   ;;  %v3018_v35 = vld [vmem:[%s4266_s3 + $0x22c] ss:$16 sps:$4 sm:$0xff]  }
  0x28   : > { %2013 = vmatprep.subr.bf16.mxu0 %v2965_v37  ;;  %2185 = vmatprep.subr.bf16.mxu1 %v2967_v38  ;;  %v3013_v37 = vld [vmem:[%s4266_s3 + $0x220] ss:$16 sps:$4 sm:$0xff]   ;;  %v3016_v38 = vld [vmem:[%s4266_s3 + $0x228] ss:$16 sps:$4 sm:$0xff]  }
  0x2b   : > { %2014 = vmatpush1.bf16.msra.mxu0 %v2969_v39  ;;  %2186 = vmatpush1.bf16.msra.mxu1 %v2970_v41  ;;  %v3021_v39 = vld [vmem:[%s4266_s3 + $0x244] ss:$16 sps:$4 sm:$0xff]   ;;  %v3024_v41 = vld [vmem:[%s4266_s3 + $0x24c] ss:$16 sps:$4 sm:$0xff]  }
  0x2c   : > { %2015 = vmatprep.subr.bf16.mxu0 %v2971_v42  ;;  %2187 = vmatprep.subr.bf16.mxu1 %v2973_v43  ;;  %v3019_v42 = vld [vmem:[%s4266_s3 + $0x240] ss:$16 sps:$4 sm:$0xff]   ;;  %v3022_v43 = vld [vmem:[%s4266_s3 + $0x248] ss:$16 sps:$4 sm:$0xff]  }
  0x2f   : > { %2016 = vmatpush1.bf16.msra.mxu0 %v2975_v44  ;;  %2188 = vmatpush1.bf16.msra.mxu1 %v2976_v45  ;;  %v3027_v44 = vld [vmem:[%s4266_s3 + $0x264] ss:$16 sps:$4 sm:$0xff]   ;;  %v3030_v45 = vld [vmem:[%s4266_s3 + $0x26c] ss:$16 sps:$4 sm:$0xff]  }
  0x30   : > { %2017 = vmatprep.subr.bf16.mxu0 %v2977_v46  ;;  %2189 = vmatprep.subr.bf16.mxu1 %v2979_v48  ;;  %v3025_v46 = vld [vmem:[%s4266_s3 + $0x260] ss:$16 sps:$4 sm:$0xff]   ;;  %v3028_v48 = vld [vmem:[%s4266_s3 + $0x268] ss:$16 sps:$4 sm:$0xff]  }
  0x33   : > { %2018 = vmatpush1.bf16.msra.mxu0 %v2981_v49  ;;  %2190 = vmatpush1.bf16.msra.mxu1 %v2982_v50  ;;  %v3033_v49 = vld [vmem:[%s4266_s3 + $0x284] ss:$16 sps:$4 sm:$0xff]   ;;  %v3036_v50 = vld [vmem:[%s4266_s3 + $0x28c] ss:$16 sps:$4 sm:$0xff]  }
  0x34   : > { %2019 = vmatprep.subr.bf16.mxu0 %v2983_v57  ;;  %2191 = vmatprep.subr.bf16.mxu1 %v2985_v61  ;;  %v3042_v57 = vld [vmem:[%s4266_s3 + $0x2ac] ss:$16 sps:$4 sm:$0xff]   ;;  %v3045_v61 = vld [vmem:[%s4266_s3 + $0x2c4] ss:$16 sps:$4 sm:$0xff]  }
  0x37   : > { %2020 = vmatpush1.bf16.msra.mxu0 %v2987_v0  ;;  %2192 = vmatpush1.bf16.msra.mxu1 %v2988_v1  ;;  %v314_v0 = vrot.slane %v3515_v54, %v3648_v58  ;;  %v3668_v1 = vld [vmem:[%s3493_s28 + $0x8] sm:$0xff] }
  0x38   : > { %2021 = vmatprep.subr.bf16.mxu0 %v2989_v5  ;;  %2193 = vmatprep.subr.bf16.mxu1 %v2991_v8  ;;  %v284_v5 = vunpack.c.h.bf16 %v3668_v1  ;;  %v3054_v8 = vld [vmem:[%s4266_s3 + $0x2ec] ss:$16 sps:$4 sm:$0xff]  }
  0x39   : > { %v350_v10 = vmul.f32 %v314_v0, %v292_v6  ;;  %v321_v6 = vsub.s32 5, %v3472_v40 }
  0x3a   : > { %v342_v9 = vmul.f32 %v314_v0, %v284_v5  ;;  %v3097_v0 = vld [vmem:[%s4266_s3 + $0x3e0] ss:$16 sps:$4 sm:$0xff]   ;;  %v3108_v5 = vld [vmem:[%s4266_s3 + $0x40c] ss:$16 sps:$4 sm:$0xff]  }
  0x3b   : > { %2022 = vmatpush1.bf16.msra.mxu0 %v2993_v11  ;;  %2194 = vmatpush1.bf16.msra.mxu1 %v2994_v15  ;;  %v3049_v11 = vld [vmem:[%s4266_s3 + $0x2e0] ss:$16 sps:$4 sm:$0xff]   ;;  %v408_v15 = vadd.f32 %v372_v7, %v350_v10  ;;  %v3111_v10 = vld [vmem:[%s4266_s3 + $0x424] ss:$16 sps:$4 sm:$0xff]  }
  0x3c   : > { %2023 = vmatprep.subr.bf16.mxu0 %v2995_v17  ;;  %2195 = vmatprep.subr.bf16.mxu1 %v2997_v18  ;;  %v400_v14 = vadd.f32 %v372_v7, %v342_v9  ;;  %v3103_v7 = vld [vmem:[%s4266_s3 + $0x400] ss:$16 sps:$4 sm:$0xff]  }
  0x3d   : > { %v424_v18 = vmax.f32 %v408_v15, 0.0 }
  0x3e   : > { %v416_v17 = vmax.f32 %v400_v14, 0.0  ;;  %v3821_v14 = vld [vmem:[%s3493_s28 + $0x30] sm:$0xff] }
  0x3f   : > { %2024 = vmatpush1.bf16.msra.mxu0 %v2999_v19  ;;  %2196 = vmatpush1.bf16.msra.mxu1 %v3000_v22  ;;  %v3055_v19 = vld [vmem:[%s4266_s3 + $0x300] ss:$16 sps:$4 sm:$0xff]  }
  0x40   : > { %2025 = vmatprep.subr.bf16.mxu0 %v3001_v23  ;;  %2197 = vmatprep.subr.bf16.mxu1 %v3003_v24  ;;  %v432_v22 = vpack.c.bf16 %v424_v18, %v416_v17  ;;  %v3066_v23 = vld [vmem:[%s4266_s3 + $0x32c] ss:$16 sps:$4 sm:$0xff]   ;;  %v3061_v24 = vld [vmem:[%s4266_s3 + $0x320] ss:$16 sps:$4 sm:$0xff]   ;;  %v294_v18 = vunpack.c.h.bf16 %v3821_v14 }
  0x41   : > { %v3109_v17 = vld [vmem:[%s4266_s3 + $0x420] ss:$16 sps:$4 sm:$0xff]  }
  0x43   : > { %2026 = vmatpush1.bf16.msra.mxu0 %v3005_v25  ;;  %2198 = vmatpush1.bf16.msra.mxu1 %v3006_v28  ;;  %v3064_v25 = vld [vmem:[%s4266_s3 + $0x328] ss:$16 sps:$4 sm:$0xff]   ;;  %v3067_v28 = vld [vmem:[%s4266_s3 + $0x340] ss:$16 sps:$4 sm:$0xff]  }
  0x44   : > { %2038 = vmatprep.subr.bf16.mxu0 %v3009_v29  ;;  %2210 = vmatprep.subr.bf16.mxu1 %v3012_v30  ;;  %v3070_v29 = vld [vmem:[%s4266_s3 + $0x348] ss:$16 sps:$4 sm:$0xff]   ;;  %v3075_v30 = vld [vmem:[%s4266_s3 + $0x364] ss:$16 sps:$4 sm:$0xff]  }
  0x46   : > { %2028 = vmatmul.mubr.bf16.vlgmr.msra.gmra.mrb[0].mxu0 %v429_v32  ;;  %2200 = vmatmul.mubr.bf16.vlgmr.msra.gmra.mrb[0].mxu1 %v429_v32  ;;  %v3073_v32 = vld [vmem:[%s4266_s3 + $0x360] ss:$16 sps:$4 sm:$0xff]  }
  0x47   : > { %2039 = vmatpush1.bf16.msra.mxu0 %v3007_v31  ;;  %2211 = vmatpush1.bf16.msra.mxu1 %v3010_v33  ;;  %v3078_v31 = vld [vmem:[%s4266_s3 + $0x36c] ss:$16 sps:$4 sm:$0xff]   ;;  %v3076_v33 = vld [vmem:[%s4266_s3 + $0x368] ss:$16 sps:$4 sm:$0xff]  }
  0x48   : > { %2040 = vmatprep.subr.bf16.mxu0 %v3015_v34  ;;  %2212 = vmatprep.subr.bf16.mxu1 %v3018_v35  ;;  %v3741_v34 = vsub.s32 2, %v3472_v40  ;;  %v3081_v35 = vld [vmem:[%s4266_s3 + $0x384] ss:$16 sps:$4 sm:$0xff]  }
  0x49   : > { %2070 = vmatprep.mubr.bf16.mxu0 %v432_v22  ;;  %2242 = vmatprep.mubr.bf16.mxu1 %v432_v22  ;;  %v3115_v22 = vld [vmem:[%s4266_s3 + $0x440] ss:$16 sps:$4 sm:$0xff]  }
  0x4b   : > { %2041 = vmatpush1.bf16.msra.mxu0 %v3013_v37  ;;  %2213 = vmatpush1.bf16.msra.mxu1 %v3016_v38  ;;  %v3084_v37 = vld [vmem:[%s4266_s3 + $0x38c] ss:$16 sps:$4 sm:$0xff]   ;;  %v3079_v38 = vld [vmem:[%s4266_s3 + $0x380] ss:$16 sps:$4 sm:$0xff]  }
  0x4c   : > { %2042 = vmatprep.subr.bf16.mxu0 %v3021_v39  ;;  %2214 = vmatprep.subr.bf16.mxu1 %v3024_v41  ;;  %v3082_v39 = vld [vmem:[%s4266_s3 + $0x388] ss:$16 sps:$4 sm:$0xff]   ;;  %v283_v41 = vunpack.c.l.bf16 %v3668_v1 }
  0x4d   : > { %v3100_v1 = vld [vmem:[%s4266_s3 + $0x3e8] ss:$16 sps:$4 sm:$0xff]  }
  0x4f   : > { %2043 = vmatpush1.bf16.msra.mxu0 %v3019_v42  ;;  %2215 = vmatpush1.bf16.msra.mxu1 %v3022_v43  ;;  %v291_v42 = vunpack.c.l.bf16 %v3671_v2  ;;  %v310_v43 = vrot.slane %v3515_v54, %v3741_v34 }
  0x50   : > { %2044 = vmatprep.subr.bf16.mxu0 %v3027_v44  ;;  %2216 = vmatprep.subr.bf16.mxu1 %v3030_v45  ;;  %v3087_v44 = vld [vmem:[%s4266_s3 + $0x3a4] ss:$16 sps:$4 sm:$0xff]   ;;  %v3090_v45 = vld [vmem:[%s4266_s3 + $0x3ac] ss:$16 sps:$4 sm:$0xff]  }
  0x53   : > { %2045 = vmatpush1.bf16.msra.mxu0 %v3025_v46  ;;  %2217 = vmatpush1.bf16.msra.mxu1 %v3028_v48  ;;  %v3085_v46 = vld [vmem:[%s4266_s3 + $0x3a0] ss:$16 sps:$4 sm:$0xff]   ;;  %v3088_v48 = vld [vmem:[%s4266_s3 + $0x3a8] ss:$16 sps:$4 sm:$0xff]  }
  0x54   : > { %2046 = vmatprep.subr.bf16.mxu0 %v3033_v49  ;;  %2218 = vmatprep.subr.bf16.mxu1 %v3036_v50  ;;  %v341_v49 = vmul.f32 %v310_v43, %v283_v41  ;;  %v349_v50 = vmul.f32 %v310_v43, %v291_v42  ;;  %v3138_v41 = vld [vmem:[%s4266_s3 + $0x4ac] ss:$16 sps:$4 sm:$0xff]   ;;  %v3133_v42 = vld [vmem:[%s4266_s3 + $0x4a0] ss:$16 sps:$4 sm:$0xff]   ;;  %v3136_v43 = vld [vmem:[%s4266_s3 + $0x4a8] ss:$16 sps:$4 sm:$0xff]  }
  0x57   : > { %2047 = vmatpush1.bf16.msra.mxu0 %v3031_v51  ;;  %2219 = vmatpush1.bf16.msra.mxu1 %v3034_v52  ;;  %v368_v51 = vrot.slane %v3520_v55, %v3741_v34  ;;  %v3093_v52 = vld [vmem:[%s4266_s3 + $0x3c4] ss:$16 sps:$4 sm:$0xff]  }
  0x58   : > { %2048 = vmatprep.subr.bf16.mxu0 %v3039_v53  ;;  %2220 = vmatprep.subr.bf16.mxu1 %v3042_v57  ;;  %v3096_v53 = vld [vmem:[%s4266_s3 + $0x3cc] ss:$16 sps:$4 sm:$0xff]   ;;  %v3091_v57 = vld [vmem:[%s4266_s3 + $0x3c0] ss:$16 sps:$4 sm:$0xff]  }
  0x5b   : > { %2049 = vmatpush1.bf16.msra.mxu0 %v3037_v59  ;;  %2221 = vmatpush1.bf16.msra.mxu1 %v3040_v60  ;;  %v3094_v59 = vld [vmem:[%s4266_s3 + $0x3c8] ss:$16 sps:$4 sm:$0xff]   ;;  %v399_v60 = vadd.f32 %v368_v51, %v341_v49  ;;  %v3147_v49 = vld [vmem:[%s4266_s3 + $0x4e4] ss:$16 sps:$4 sm:$0xff]  }
  0x5c   : > { %2050 = vmatprep.subr.bf16.mxu0 %v3045_v61  ;;  %2222 = vmatprep.subr.bf16.mxu1 %v3048_v62  ;;  %v407_v61 = vadd.f32 %v368_v51, %v349_v50  ;;  %v3099_v62 = vld [vmem:[%s4266_s3 + $0x3e4] ss:$16 sps:$4 sm:$0xff]   ;;  %v3150_v50 = vld [vmem:[%s4266_s3 + $0x4ec] ss:$16 sps:$4 sm:$0xff]   ;;  %v3145_v51 = vld [vmem:[%s4266_s3 + $0x4e0] ss:$16 sps:$4 sm:$0xff]  }
  0x5d   : > { %v415_v2 = vmax.f32 %v399_v60, 0.0  ;;  %v3154_v60 = vld [vmem:[%s4266_s3 + $0x508] ss:$16 sps:$4 sm:$0xff]  }
  0x5f   : > { %2051 = vmatpush1.bf16.msra.mxu0 %v3043_v63  ;;  %2223 = vmatpush1.bf16.msra.mxu1 %v3046_v3  ;;  %v3102_v63 = vld [vmem:[%s4266_s3 + $0x3ec] ss:$16 sps:$4 sm:$0xff]   ;;  %v423_v3 = vmax.f32 %v407_v61, 0.0  ;;  %v3159_v61 = vld [vmem:[%s4266_s3 + $0x524] ss:$16 sps:$4 sm:$0xff]  }
  0x60   : > { %2052 = vmatprep.subr.bf16.mxu0 %v3051_v4  ;;  %2224 = vmatprep.subr.bf16.mxu1 %v3054_v8  ;;  %v3105_v4 = vld [vmem:[%s4266_s3 + $0x404] ss:$16 sps:$4 sm:$0xff]   ;;  %v3106_v8 = vld [vmem:[%s4266_s3 + $0x408] ss:$16 sps:$4 sm:$0xff]  }
  0x61   : > { %v431_v9 = vpack.c.bf16 %v423_v3, %v415_v2  ;;  %v3168_v2 = vld [vmem:[%s4266_s3 + $0x54c] ss:$16 sps:$4 sm:$0xff]   ;;  %v3163_v3 = vld [vmem:[%s4266_s3 + $0x540] ss:$16 sps:$4 sm:$0xff]  }
  0x63   : > { %2053 = vmatpush1.bf16.msra.mxu0 %v3049_v11  ;;  %2225 = vmatpush1.bf16.msra.mxu1 %v3052_v12  ;;  %v3114_v11 = vld [vmem:[%s4266_s3 + $0x42c] ss:$16 sps:$4 sm:$0xff]   ;;  %v322_v12 = vrot.slane %v3515_v54, %v321_v6  ;;  %v3112_v54 = vld [vmem:[%s4266_s3 + $0x428] ss:$16 sps:$4 sm:$0xff]  }
  0x64   : > { %2054 = vmatprep.subr.bf16.mxu0 %v3057_v13  ;;  %2226 = vmatprep.subr.bf16.mxu1 %v3060_v16  ;;  %v3818_v13 = vld [vmem:[%s3493_s28 + $0x10] sm:$0xff]  ;;  %v380_v16 = vrot.slane %v3520_v55, %v321_v6  ;;  %v3120_v55 = vld [vmem:[%s4266_s3 + $0x44c] ss:$16 sps:$4 sm:$0xff]  }
  0x65   : > { %v286_v15 = vunpack.c.h.bf16 %v3818_v13  ;;  %v3174_v6 = vld [vmem:[%s4266_s3 + $0x56c] ss:$16 sps:$4 sm:$0xff]  }
  0x67   : > { %2055 = vmatpush1.bf16.msra.mxu0 %v3055_v19  ;;  %2227 = vmatpush1.bf16.msra.mxu1 %v3058_v20  ;;  %v3117_v19 = vld [vmem:[%s4266_s3 + $0x444] ss:$16 sps:$4 sm:$0xff]   ;;  %v344_v20 = vmul.f32 %v322_v12, %v286_v15  ;;  %v285_v15 = vunpack.c.l.bf16 %v3818_v13  ;;  %v3178_v13 = vld [vmem:[%s4266_s3 + $0x588] ss:$16 sps:$4 sm:$0xff]  }
  0x68   : > { %2056 = vmatprep.subr.bf16.mxu0 %v3063_v21  ;;  %2228 = vmatprep.subr.bf16.mxu1 %v3066_v23  ;;  %v352_v21 = vmul.f32 %v322_v12, %v294_v18  ;;  %v329_v12 = vsub.s32 7, %v3472_v40  ;;  %v3969_v18 = vld [vmem:[%s3493_s28 + $0x18] sm:$0xff] }
  0x69   : > { %v402_v23 = vadd.f32 %v380_v16, %v344_v20  ;;  %v3186_v20 = vld [vmem:[%s4266_s3 + $0x5ac] ss:$16 sps:$4 sm:$0xff]  }
  0x6b   : > { %2057 = vmatpush1.bf16.msra.mxu0 %v3061_v24  ;;  %2229 = vmatpush1.bf16.msra.mxu1 %v3064_v25  ;;  %v3118_v24 = vld [vmem:[%s4266_s3 + $0x448] ss:$16 sps:$4 sm:$0xff]   ;;  %v3123_v25 = vld [vmem:[%s4266_s3 + $0x464] ss:$16 sps:$4 sm:$0xff]  }
  0x6c   : > { %2058 = vmatprep.subr.bf16.mxu0 %v3069_v26  ;;  %2230 = vmatprep.subr.bf16.mxu1 %v3072_v27  ;;  %v410_v26 = vadd.f32 %v380_v16, %v352_v21  ;;  %v3126_v27 = vld [vmem:[%s4266_s3 + $0x46c] ss:$16 sps:$4 sm:$0xff]   ;;  %v293_v16 = vunpack.c.l.bf16 %v3821_v14  ;;  %v3183_v14 = vld [vmem:[%s4266_s3 + $0x5a4] ss:$16 sps:$4 sm:$0xff]   ;;  %v288_v21 = vunpack.c.h.bf16 %v3969_v18 }
  0x6f   : > { %2059 = vmatpush1.bf16.msra.mxu0 %v3067_v28  ;;  %2231 = vmatpush1.bf16.msra.mxu1 %v3070_v29  ;;  %v418_v28 = vmax.f32 %v402_v23, 0.0  ;;  %v426_v29 = vmax.f32 %v410_v26, 0.0  ;;  %v3992_v26 = vld [vmem:[%s4265_s2] sm:$0xff] }
  0x70   : > { %2060 = vmatprep.subr.bf16.mxu0 %v3075_v30  ;;  %2232 = vmatprep.subr.bf16.mxu1 %v3078_v31  ;;  %v3121_v30 = vld [vmem:[%s4266_s3 + $0x460] ss:$16 sps:$4 sm:$0xff]   ;;  %v3124_v31 = vld [vmem:[%s4266_s3 + $0x468] ss:$16 sps:$4 sm:$0xff]  }
  0x73   : > { %2061 = vmatpush1.bf16.msra.mxu0 %v3073_v32  ;;  %2233 = vmatpush1.bf16.msra.mxu1 %v3076_v33  ;;  %v434_v32 = vpack.c.bf16 %v426_v29, %v418_v28  ;;  %v3129_v33 = vld [vmem:[%s4266_s3 + $0x484] ss:$16 sps:$4 sm:$0xff]   ;;  %v3181_v28 = vld [vmem:[%s4266_s3 + $0x5a0] ss:$16 sps:$4 sm:$0xff]   ;;  %v3184_v29 = vld [vmem:[%s4266_s3 + $0x5a8] ss:$16 sps:$4 sm:$0xff]  }
  0x74   : > { %2062 = vmatprep.subr.bf16.mxu0 %v3081_v35  ;;  %2234 = vmatprep.subr.bf16.mxu1 %v3084_v37  ;;  %v3132_v35 = vld [vmem:[%s4266_s3 + $0x48c] ss:$16 sps:$4 sm:$0xff]   ;;  %v3127_v37 = vld [vmem:[%s4266_s3 + $0x480] ss:$16 sps:$4 sm:$0xff]  }
  0x77   : > { %2063 = vmatpush1.bf16.msra.mxu0 %v3079_v38  ;;  %2235 = vmatpush1.bf16.msra.mxu1 %v3082_v39  ;;  %v3130_v38 = vld [vmem:[%s4266_s3 + $0x488] ss:$16 sps:$4 sm:$0xff]   ;;  %v3135_v39 = vld [vmem:[%s4266_s3 + $0x4a4] ss:$16 sps:$4 sm:$0xff]  }
  0x78   : > { %2064 = vmatprep.subr.bf16.mxu0 %v3087_v44  ;;  %2236 = vmatprep.subr.bf16.mxu1 %v3090_v45  ;;  %v3141_v44 = vld [vmem:[%s4266_s3 + $0x4c4] ss:$16 sps:$4 sm:$0xff]   ;;  %v3144_v45 = vld [vmem:[%s4266_s3 + $0x4cc] ss:$16 sps:$4 sm:$0xff]  }
  0x7b   : > { %2065 = vmatpush1.bf16.msra.mxu0 %v3085_v46  ;;  %2237 = vmatpush1.bf16.msra.mxu1 %v3088_v48  ;;  %v3139_v46 = vld [vmem:[%s4266_s3 + $0x4c0] ss:$16 sps:$4 sm:$0xff]   ;;  %v3142_v48 = vld [vmem:[%s4266_s3 + $0x4c8] ss:$16 sps:$4 sm:$0xff]  }
  0x7c   : > { %2066 = vmatprep.subr.bf16.mxu0 %v3093_v52  ;;  %2238 = vmatprep.subr.bf16.mxu1 %v3096_v53  ;;  %v3148_v52 = vld [vmem:[%s4266_s3 + $0x4e8] ss:$16 sps:$4 sm:$0xff]   ;;  %v3153_v53 = vld [vmem:[%s4266_s3 + $0x504] ss:$16 sps:$4 sm:$0xff]  }
  0x7f   : > { %2067 = vmatpush1.bf16.msra.mxu0 %v3091_v57  ;;  %2239 = vmatpush1.bf16.msra.mxu1 %v3094_v59  ;;  %v3156_v57 = vld [vmem:[%s4266_s3 + $0x50c] ss:$16 sps:$4 sm:$0xff]   ;;  %v3151_v59 = vld [vmem:[%s4266_s3 + $0x500] ss:$16 sps:$4 sm:$0xff]  }
  0x80   : > { %2068 = vmatprep.subr.bf16.mxu0 %v3099_v62  ;;  %2240 = vmatprep.subr.bf16.mxu1 %v3102_v63  ;;  %v3162_v62 = vld [vmem:[%s4266_s3 + $0x52c] ss:$16 sps:$4 sm:$0xff]   ;;  %v3157_v63 = vld [vmem:[%s4266_s3 + $0x520] ss:$16 sps:$4 sm:$0xff]  }
  0x83   : > { %2069 = vmatpush1.bf16.msra.mxu0 %v3097_v0  ;;  %2241 = vmatpush1.bf16.msra.mxu1 %v3100_v1  ;;  %v3160_v0 = vld [vmem:[%s4266_s3 + $0x528] ss:$16 sps:$4 sm:$0xff]   ;;  %v3165_v1 = vld [vmem:[%s4266_s3 + $0x544] ss:$16 sps:$4 sm:$0xff]  }
  0x84   : > { %2081 = vmatprep.subr.bf16.mxu0 %v3105_v4  ;;  %2253 = vmatprep.subr.bf16.mxu1 %v3108_v5  ;;  %v3166_v4 = vld [vmem:[%s4266_s3 + $0x548] ss:$16 sps:$4 sm:$0xff]   ;;  %v3171_v5 = vld [vmem:[%s4266_s3 + $0x564] ss:$16 sps:$4 sm:$0xff]  }
  0x86   : > { %2071 = vmatmul.mubr.bf16.vlgmr.msra.gmra.mrb[0].mxu0 %v431_v9  ;;  %2243 = vmatmul.mubr.bf16.vlgmr.msra.gmra.mrb[0].mxu1 %v431_v9  ;;  %v3172_v9 = vld [vmem:[%s4266_s3 + $0x568] ss:$16 sps:$4 sm:$0xff]  }
  0x87   : > { %2082 = vmatpush1.bf16.msra.mxu0 %v3103_v7  ;;  %2254 = vmatpush1.bf16.msra.mxu1 %v3106_v8  ;;  %v317_v7 = vsub.s32 4, %v3472_v40  ;;  %v3169_v8 = vld [vmem:[%s4266_s3 + $0x560] ss:$16 sps:$4 sm:$0xff]  }
  0x88   : > { %2083 = vmatprep.subr.bf16.mxu0 %v3111_v10  ;;  %2255 = vmatprep.subr.bf16.mxu1 %v3114_v11  ;;  %v3177_v10 = vld [vmem:[%s4266_s3 + $0x584] ss:$16 sps:$4 sm:$0xff]   ;;  %v3180_v11 = vld [vmem:[%s4266_s3 + $0x58c] ss:$16 sps:$4 sm:$0xff]  }
  0x89   : > { %2113 = vmatprep.mubr.bf16.mxu0 %v434_v32  ;;  %2285 = vmatprep.mubr.bf16.mxu1 %v434_v32 }
  0x8b   : > { %2084 = vmatpush1.bf16.msra.mxu0 %v3109_v17  ;;  %2256 = vmatpush1.bf16.msra.mxu1 %v3112_v54  ;;  %v3965_v17 = vld [vmem:[%s4264_s1] sm:$0xff] }
  0x8c   : > { %2085 = vmatprep.subr.bf16.mxu0 %v3117_v19  ;;  %2257 = vmatprep.subr.bf16.mxu1 %v3120_v55  ;;  %v318_v54 = vrot.slane %v3965_v17, %v317_v7  ;;  %v3972_v19 = vld [vmem:[%s3493_s28 + $0x38] sm:$0xff]  ;;  %v3175_v55 = vld [vmem:[%s4266_s3 + $0x580] ss:$16 sps:$4 sm:$0xff]   ;;  %v330_v23 = vrot.slane %v3965_v17, %v329_v12 }
  0x8e   : > { %v346_v32 = vmul.f32 %v330_v23, %v288_v21  ;;  %v3240_v21 = vld [vmem:[%s4266_s3 + $0x6cc] ss:$16 sps:$4 sm:$0xff]  }
  0x8f   : > { %2086 = vmatpush1.bf16.msra.mxu0 %v3115_v22  ;;  %2258 = vmatpush1.bf16.msra.mxu1 %v3118_v24  ;;  %v296_v22 = vunpack.c.h.bf16 %v3972_v19  ;;  %v343_v24 = vmul.f32 %v318_v54, %v285_v15  ;;  %v3223_v15 = vld [vmem:[%s4266_s3 + $0x680] ss:$16 sps:$4 sm:$0xff]  }
  0x90   : > { %2087 = vmatprep.subr.bf16.mxu0 %v3123_v25  ;;  %2259 = vmatprep.subr.bf16.mxu1 %v3126_v27  ;;  %v351_v25 = vmul.f32 %v318_v54, %v293_v16  ;;  %v376_v27 = vrot.slane %v3992_v26, %v317_v7  ;;  %v3219_v7 = vld [vmem:[%s4266_s3 + $0x664] ss:$16 sps:$4 sm:$0xff]   ;;  %v3226_v16 = vld [vmem:[%s4266_s3 + $0x688] ss:$16 sps:$4 sm:$0xff]  }
  0x91   : > { %v3231_v54 = vld [vmem:[%s4266_s3 + $0x6a4] ss:$16 sps:$4 sm:$0xff]  }
  0x93   : > { %2088 = vmatpush1.bf16.msra.mxu0 %v3121_v30  ;;  %2260 = vmatpush1.bf16.msra.mxu1 %v3124_v31  ;;  %v3189_v30 = vld [vmem:[%s4266_s3 + $0x5c4] ss:$16 sps:$4 sm:$0xff]   ;;  %v3192_v31 = vld [vmem:[%s4266_s3 + $0x5cc] ss:$16 sps:$4 sm:$0xff]  }
  0x94   : > { %2089 = vmatprep.subr.bf16.mxu0 %v3129_v33  ;;  %2261 = vmatprep.subr.bf16.mxu1 %v3132_v35  ;;  %v354_v33 = vmul.f32 %v330_v23, %v296_v22  ;;  %v388_v35 = vrot.slane %v3992_v26, %v329_v12  ;;  %v3228_v12 = vld [vmem:[%s4266_s3 + $0x68c] ss:$16 sps:$4 sm:$0xff]   ;;  %v3235_v22 = vld [vmem:[%s4266_s3 + $0x6c0] ss:$16 sps:$4 sm:$0xff]   ;;  %v3238_v23 = vld [vmem:[%s4266_s3 + $0x6c8] ss:$16 sps:$4 sm:$0xff]  }
  0x97   : > { %2090 = vmatpush1.bf16.msra.mxu0 %v3127_v37  ;;  %2262 = vmatpush1.bf16.msra.mxu1 %v3130_v38  ;;  %v401_v37 = vadd.f32 %v376_v27, %v343_v24  ;;  %v409_v38 = vadd.f32 %v376_v27, %v351_v25  ;;  %v3243_v24 = vld [vmem:[%s4266_s3 + $0x6e4] ss:$16 sps:$4 sm:$0xff]   ;;  %v3246_v25 = vld [vmem:[%s4266_s3 + $0x6ec] ss:$16 sps:$4 sm:$0xff]   ;;  %v3241_v27 = vld [vmem:[%s4266_s3 + $0x6e0] ss:$16 sps:$4 sm:$0xff]  }
  0x98   : > { %2091 = vmatprep.subr.bf16.mxu0 %v3135_v39  ;;  %2263 = vmatprep.subr.bf16.mxu1 %v3138_v41  ;;  %v3187_v39 = vld [vmem:[%s4266_s3 + $0x5c0] ss:$16 sps:$4 sm:$0xff]   ;;  %v3190_v41 = vld [vmem:[%s4266_s3 + $0x5c8] ss:$16 sps:$4 sm:$0xff]  }
  0x9b   : > { %2092 = vmatpush1.bf16.msra.mxu0 %v3133_v42  ;;  %2264 = vmatpush1.bf16.msra.mxu1 %v3136_v43  ;;  %v3195_v42 = vld [vmem:[%s4266_s3 + $0x5e4] ss:$16 sps:$4 sm:$0xff]   ;;  %v3198_v43 = vld [vmem:[%s4266_s3 + $0x5ec] ss:$16 sps:$4 sm:$0xff]  }
  0x9c   : > { %2093 = vmatprep.subr.bf16.mxu0 %v3141_v44  ;;  %2265 = vmatprep.subr.bf16.mxu1 %v3144_v45  ;;  %v404_v44 = vadd.f32 %v388_v35, %v346_v32  ;;  %v412_v45 = vadd.f32 %v388_v35, %v354_v33  ;;  %v3250_v32 = vld [vmem:[%s4266_s3 + $0x708] ss:$16 sps:$4 sm:$0xff]   ;;  %v3255_v33 = vld [vmem:[%s4266_s3 + $0x724] ss:$16 sps:$4 sm:$0xff]   ;;  %v3258_v35 = vld [vmem:[%s4266_s3 + $0x72c] ss:$16 sps:$4 sm:$0xff]  }
  0x9f   : > { %2094 = vmatpush1.bf16.msra.mxu0 %v3139_v46  ;;  %2266 = vmatpush1.bf16.msra.mxu1 %v3142_v48  ;;  %v417_v46 = vmax.f32 %v401_v37, 0.0  ;;  %v425_v48 = vmax.f32 %v409_v38, 0.0  ;;  %v3253_v37 = vld [vmem:[%s4266_s3 + $0x720] ss:$16 sps:$4 sm:$0xff]   ;;  %v3256_v38 = vld [vmem:[%s4266_s3 + $0x728] ss:$16 sps:$4 sm:$0xff]  }
  0xa0   : > { %2095 = vmatprep.subr.bf16.mxu0 %v3147_v49  ;;  %2267 = vmatprep.subr.bf16.mxu1 %v3150_v50  ;;  %v3193_v49 = vld [vmem:[%s4266_s3 + $0x5e0] ss:$16 sps:$4 sm:$0xff]   ;;  %v3196_v50 = vld [vmem:[%s4266_s3 + $0x5e8] ss:$16 sps:$4 sm:$0xff]  }
  0xa3   : > { %2096 = vmatpush1.bf16.msra.mxu0 %v3145_v51  ;;  %2268 = vmatpush1.bf16.msra.mxu1 %v3148_v52  ;;  %v3201_v51 = vld [vmem:[%s4266_s3 + $0x604] ss:$16 sps:$4 sm:$0xff]   ;;  %v3204_v52 = vld [vmem:[%s4266_s3 + $0x60c] ss:$16 sps:$4 sm:$0xff]  }
  0xa4   : > { %2097 = vmatprep.subr.bf16.mxu0 %v3153_v53  ;;  %2269 = vmatprep.subr.bf16.mxu1 %v3156_v57  ;;  %v420_v53 = vmax.f32 %v404_v44, 0.0  ;;  %v428_v57 = vmax.f32 %v412_v45, 0.0  ;;  %v3267_v44 = vld [vmem:[%s4266_s3 + $0x764] ss:$16 sps:$4 sm:$0xff]   ;;  %v3270_v45 = vld [vmem:[%s4266_s3 + $0x76c] ss:$16 sps:$4 sm:$0xff]  }
  0xa7   : > { %2098 = vmatpush1.bf16.msra.mxu0 %v3151_v59  ;;  %2270 = vmatpush1.bf16.msra.mxu1 %v3154_v60  ;;  %v433_v59 = vpack.c.bf16 %v425_v48, %v417_v46  ;;  %v3199_v60 = vld [vmem:[%s4266_s3 + $0x600] ss:$16 sps:$4 sm:$0xff]   ;;  %v325_v46 = vsub.s32 6, %v3472_v40 }
  0xa8   : > { %2099 = vmatprep.subr.bf16.mxu0 %v3159_v61  ;;  %2271 = vmatprep.subr.bf16.mxu1 %v3162_v62  ;;  %v3202_v61 = vld [vmem:[%s4266_s3 + $0x608] ss:$16 sps:$4 sm:$0xff]   ;;  %v3207_v62 = vld [vmem:[%s4266_s3 + $0x624] ss:$16 sps:$4 sm:$0xff]   ;;  %v3265_v48 = vld [vmem:[%s4266_s3 + $0x760] ss:$16 sps:$4 sm:$0xff]  }
  0xab   : > { %2100 = vmatpush1.bf16.msra.mxu0 %v3157_v63  ;;  %2272 = vmatpush1.bf16.msra.mxu1 %v3160_v0  ;;  %v3210_v63 = vld [vmem:[%s4266_s3 + $0x62c] ss:$16 sps:$4 sm:$0xff]   ;;  %v436_v0 = vpack.c.bf16 %v428_v57, %v420_v53  ;;  %v295_v53 = vunpack.c.l.bf16 %v3972_v19  ;;  %v326_v57 = vrot.slane %v3965_v17, %v325_v46 }
  0xac   : > { %2101 = vmatprep.subr.bf16.mxu0 %v3165_v1  ;;  %2273 = vmatprep.subr.bf16.mxu1 %v3168_v2  ;;  %v3205_v1 = vld [vmem:[%s4266_s3 + $0x620] ss:$16 sps:$4 sm:$0xff]   ;;  %v3208_v2 = vld [vmem:[%s4266_s3 + $0x628] ss:$16 sps:$4 sm:$0xff]   ;;  %v3282_v17 = vld [vmem:[%s4266_s3 + $0x7ac] ss:$16 sps:$4 sm:$0xff]  }
  0xaf   : > { %2102 = vmatpush1.bf16.msra.mxu0 %v3163_v3  ;;  %2274 = vmatpush1.bf16.msra.mxu1 %v3166_v4  ;;  %v3213_v3 = vld [vmem:[%s4266_s3 + $0x644] ss:$16 sps:$4 sm:$0xff]   ;;  %v3216_v4 = vld [vmem:[%s4266_s3 + $0x64c] ss:$16 sps:$4 sm:$0xff]  }
  0xb0   : > { %2103 = vmatprep.subr.bf16.mxu0 %v3171_v5  ;;  %2275 = vmatprep.subr.bf16.mxu1 %v3174_v6  ;;  %v3211_v5 = vld [vmem:[%s4266_s3 + $0x640] ss:$16 sps:$4 sm:$0xff]   ;;  %v3214_v6 = vld [vmem:[%s4266_s3 + $0x648] ss:$16 sps:$4 sm:$0xff]  }
  0xb3   : > { %2104 = vmatpush1.bf16.msra.mxu0 %v3169_v8  ;;  %2276 = vmatpush1.bf16.msra.mxu1 %v3172_v9  ;;  %v3222_v8 = vld [vmem:[%s4266_s3 + $0x66c] ss:$16 sps:$4 sm:$0xff]   ;;  %v3217_v9 = vld [vmem:[%s4266_s3 + $0x660] ss:$16 sps:$4 sm:$0xff]  }
  0xb4   : > { %2105 = vmatprep.subr.bf16.mxu0 %v3177_v10  ;;  %2277 = vmatprep.subr.bf16.mxu1 %v3180_v11  ;;  %v3220_v10 = vld [vmem:[%s4266_s3 + $0x668] ss:$16 sps:$4 sm:$0xff]   ;;  %v3225_v11 = vld [vmem:[%s4266_s3 + $0x684] ss:$16 sps:$4 sm:$0xff]  }
  0xb7   : > { %2106 = vmatpush1.bf16.msra.mxu0 %v3175_v55  ;;  %2278 = vmatpush1.bf16.msra.mxu1 %v3178_v13  ;;  %v3234_v55 = vld [vmem:[%s4266_s3 + $0x6ac] ss:$16 sps:$4 sm:$0xff]   ;;  %v3229_v13 = vld [vmem:[%s4266_s3 + $0x6a0] ss:$16 sps:$4 sm:$0xff]  }
  0xb8   : > { %2107 = vmatprep.subr.bf16.mxu0 %v3183_v14  ;;  %2279 = vmatprep.subr.bf16.mxu1 %v3186_v20  ;;  %v3232_v14 = vld [vmem:[%s4266_s3 + $0x6a8] ss:$16 sps:$4 sm:$0xff]   ;;  %v3237_v20 = vld [vmem:[%s4266_s3 + $0x6c4] ss:$16 sps:$4 sm:$0xff]  }
  0xbb   : > { %2108 = vmatpush1.bf16.msra.mxu0 %v3181_v28  ;;  %2280 = vmatpush1.bf16.msra.mxu1 %v3184_v29  ;;  %v3244_v28 = vld [vmem:[%s4266_s3 + $0x6e8] ss:$16 sps:$4 sm:$0xff]   ;;  %v3249_v29 = vld [vmem:[%s4266_s3 + $0x704] ss:$16 sps:$4 sm:$0xff]  }
  0xbc   : > { %2109 = vmatprep.subr.bf16.mxu0 %v3189_v30  ;;  %2281 = vmatprep.subr.bf16.mxu1 %v3192_v31  ;;  %v3252_v30 = vld [vmem:[%s4266_s3 + $0x70c] ss:$16 sps:$4 sm:$0xff]   ;;  %v3247_v31 = vld [vmem:[%s4266_s3 + $0x700] ss:$16 sps:$4 sm:$0xff]  }
  0xbf   : > { %2110 = vmatpush1.bf16.msra.mxu0 %v3187_v39  ;;  %2282 = vmatpush1.bf16.msra.mxu1 %v3190_v41  ;;  %v3261_v39 = vld [vmem:[%s4266_s3 + $0x744] ss:$16 sps:$4 sm:$0xff]   ;;  %v3264_v41 = vld [vmem:[%s4266_s3 + $0x74c] ss:$16 sps:$4 sm:$0xff]  }
  0xc0   : > { %2111 = vmatprep.subr.bf16.mxu0 %v3195_v42  ;;  %2283 = vmatprep.subr.bf16.mxu1 %v3198_v43  ;;  %v3259_v42 = vld [vmem:[%s4266_s3 + $0x740] ss:$16 sps:$4 sm:$0xff]   ;;  %v3262_v43 = vld [vmem:[%s4266_s3 + $0x748] ss:$16 sps:$4 sm:$0xff]  }
  0xc3   : > { %2112 = vmatpush1.bf16.msra.mxu0 %v3193_v49  ;;  %2284 = vmatpush1.bf16.msra.mxu1 %v3196_v50  ;;  %v3268_v49 = vld [vmem:[%s4266_s3 + $0x768] ss:$16 sps:$4 sm:$0xff]   ;;  %v3273_v50 = vld [vmem:[%s4266_s3 + $0x784] ss:$16 sps:$4 sm:$0xff]  }
  0xc4   : > { %2124 = vmatprep.subr.bf16.mxu0 %v3201_v51  ;;  %2296 = vmatprep.subr.bf16.mxu1 %v3204_v52  ;;  %v3276_v51 = vld [vmem:[%s4266_s3 + $0x78c] ss:$16 sps:$4 sm:$0xff]   ;;  %v287_v52 = vunpack.c.l.bf16 %v3969_v18  ;;  %v3279_v18 = vld [vmem:[%s4266_s3 + $0x7a4] ss:$16 sps:$4 sm:$0xff]  }
  0xc6   : > { %2114 = vmatmul.mubr.bf16.vlgmr.msra.gmra.mrb[0].mxu0 %v433_v59  ;;  %2286 = vmatmul.mubr.bf16.vlgmr.msra.gmra.mrb[0].mxu1 %v433_v59  ;;  %v3271_v59 = vld [vmem:[%s4266_s3 + $0x780] ss:$16 sps:$4 sm:$0xff]   ;;  %v345_v19 = vmul.f32 %v326_v57, %v287_v52 }
  0xc7   : > { %2125 = vmatpush1.bf16.msra.mxu0 %v3199_v60  ;;  %2297 = vmatpush1.bf16.msra.mxu1 %v3202_v61  ;;  %v3274_v60 = vld [vmem:[%s4266_s3 + $0x788] ss:$16 sps:$4 sm:$0xff]   ;;  %v353_v61 = vmul.f32 %v326_v57, %v295_v53 }
  0xc8   : > { %2126 = vmatprep.subr.bf16.mxu0 %v3207_v62  ;;  %2298 = vmatprep.subr.bf16.mxu1 %v3210_v63  ;;  %v384_v62 = vrot.slane %v3992_v26, %v325_v46  ;;  %v3277_v63 = vld [vmem:[%s4266_s3 + $0x7a0] ss:$16 sps:$4 sm:$0xff]   ;;  %v3288_v26 = vld [vmem:[%s4266_s3 + $0x7cc] ss:$16 sps:$4 sm:$0xff]  }
  0xc9   : > { %2156 = vmatprep.mubr.bf16.mxu0 %v436_v0  ;;  %2328 = vmatprep.mubr.bf16.mxu1 %v436_v0  ;;  %v3280_v0 = vld [vmem:[%s4266_s3 + $0x7a8] ss:$16 sps:$4 sm:$0xff]  }
  0xcb   : > { %2127 = vmatpush1.bf16.msra.mxu0 %v3205_v1  ;;  %2299 = vmatpush1.bf16.msra.mxu1 %v3208_v2  ;;  %v3285_v1 = vld [vmem:[%s4266_s3 + $0x7c4] ss:$16 sps:$4 sm:$0xff]   ;;  %v403_v2 = vadd.f32 %v384_v62, %v345_v19 }
  0xcc   : > { %2128 = vmatprep.subr.bf16.mxu0 %v3213_v3  ;;  %2300 = vmatprep.subr.bf16.mxu1 %v3216_v4  ;;  %v411_v3 = vadd.f32 %v384_v62, %v353_v61  ;;  %v3283_v4 = vld [vmem:[%s4266_s3 + $0x7c0] ss:$16 sps:$4 sm:$0xff]  }
  0xcf   : > { %2129 = vmatpush1.bf16.msra.mxu0 %v3211_v5  ;;  %2301 = vmatpush1.bf16.msra.mxu1 %v3214_v6  ;;  %v3286_v5 = vld [vmem:[%s4266_s3 + $0x7c8] ss:$16 sps:$4 sm:$0xff]   ;;  %v3291_v6 = vld [vmem:[%s4266_s3 + $0x7e4] ss:$16 sps:$4 sm:$0xff]  }
  0xd0   : > { %2130 = vmatprep.subr.bf16.mxu0 %v3219_v7  ;;  %2302 = vmatprep.subr.bf16.mxu1 %v3222_v8  ;;  %v3294_v7 = vld [vmem:[%s4266_s3 + $0x7ec] ss:$16 sps:$4 sm:$0xff]   ;;  %v419_v8 = vmax.f32 %v403_v2, 0.0 }
  0xd3   : > { %2131 = vmatpush1.bf16.msra.mxu0 %v3217_v9  ;;  %2303 = vmatpush1.bf16.msra.mxu1 %v3220_v10  ;;  %v427_v9 = vmax.f32 %v411_v3, 0.0  ;;  %v3289_v10 = vld [vmem:[%s4266_s3 + $0x7e0] ss:$16 sps:$4 sm:$0xff]  }
  0xd4   : > { %2132 = vmatprep.subr.bf16.mxu0 %v3225_v11  ;;  %2304 = vmatprep.subr.bf16.mxu1 %v3228_v12  ;;  %v3292_v11 = vld [vmem:[%s4266_s3 + $0x7e8] ss:$16 sps:$4 sm:$0xff]  }
  0xd5   : > { %v435_v12 = vpack.c.bf16 %v427_v9, %v419_v8 }
  0xd7   : > { %2133 = vmatpush1.bf16.msra.mxu0 %v3223_v15  ;;  %2305 = vmatpush1.bf16.msra.mxu1 %v3226_v16  ;;  %v693_v15 = vld [vmem:[%s4267_s4] sm:$0xf] }
  0xd8   : > { %2134 = vmatprep.subr.bf16.mxu0 %v3231_v54  ;;  %2306 = vmatprep.subr.bf16.mxu1 %v3234_v55  ;;  %v698_v16 = vrot.slane %v693_v15, %v3523_v56  ;;  %v706_v54 = vrot.slane %v693_v15, %v3741_v34  ;;  %v702_v55 = vrot.slane %v693_v15, %v3499_v47 }
  0xdb   : > { %2135 = vmatpush1.bf16.msra.mxu0 %v3229_v13  ;;  %2307 = vmatpush1.bf16.msra.mxu1 %v3232_v14  ;;  %v710_v13 = vrot.slane %v693_v15, %v3648_v58  ;;  %v3305_v14 = vmov 1966171168  }
  0xdc   : > { %2136 = vmatprep.subr.bf16.mxu0 %v3237_v20  ;;  %2308 = vmatprep.subr.bf16.mxu1 %v3240_v21  ;;  %v4230_v20 = vunpack.c.l.s4 %v3305_v14 }
  0xdf   : > { %2137 = vmatpush1.bf16.msra.mxu0 %v3235_v22  ;;  %2309 = vmatpush1.bf16.msra.mxu1 %v3238_v23 }
  0xe0   : > { %2138 = vmatprep.subr.bf16.mxu0 %v3243_v24  ;;  %2310 = vmatprep.subr.bf16.mxu1 %v3246_v25 }
  0xe3   : > { %2139 = vmatpush1.bf16.msra.mxu0 %v3241_v27  ;;  %2311 = vmatpush1.bf16.msra.mxu1 %v3244_v28 }
  0xe4   : > { %2140 = vmatprep.subr.bf16.mxu0 %v3249_v29  ;;  %2312 = vmatprep.subr.bf16.mxu1 %v3252_v30 }
  0xe7   : > { %2141 = vmatpush1.bf16.msra.mxu0 %v3247_v31  ;;  %2313 = vmatpush1.bf16.msra.mxu1 %v3250_v32  ;;  %v2375_v31 = vunpack.c.0.s8 %v4230_v20 }
  0xe8   : > { %2142 = vmatprep.subr.bf16.mxu0 %v3255_v33  ;;  %2314 = vmatprep.subr.bf16.mxu1 %v3258_v35 }
  0xeb   : > { %2143 = vmatpush1.bf16.msra.mxu0 %v3253_v37  ;;  %2315 = vmatpush1.bf16.msra.mxu1 %v3256_v38 }
  0xec   : > { %2144 = vmatprep.subr.bf16.mxu0 %v3261_v39  ;;  %2316 = vmatprep.subr.bf16.mxu1 %v3264_v41 }
  0xef   : > { %2145 = vmatpush1.bf16.msra.mxu0 %v3259_v42  ;;  %2317 = vmatpush1.bf16.msra.mxu1 %v3262_v43 }
  0xf0   : > { %2146 = vmatprep.subr.bf16.mxu0 %v3267_v44  ;;  %2318 = vmatprep.subr.bf16.mxu1 %v3270_v45 }
  0xf3   : > { %2147 = vmatpush1.bf16.msra.mxu0 %v3265_v48  ;;  %2319 = vmatpush1.bf16.msra.mxu1 %v3268_v49 }
  0xf4   : > { %2148 = vmatprep.subr.bf16.mxu0 %v3273_v50  ;;  %2320 = vmatprep.subr.bf16.mxu1 %v3276_v51 }
  0xf7   : > { %2149 = vmatpush1.bf16.msra.mxu0 %v3271_v59  ;;  %2321 = vmatpush1.bf16.msra.mxu1 %v3274_v60 }
  0xf8   : > { %2150 = vmatprep.subr.bf16.mxu0 %v3279_v18  ;;  %2322 = vmatprep.subr.bf16.mxu1 %v3282_v17 }
  0xfb   : > { %2151 = vmatpush1.bf16.msra.mxu0 %v3277_v63  ;;  %2323 = vmatpush1.bf16.msra.mxu1 %v3280_v0 }
  0xfc   : > { %2152 = vmatprep.subr.bf16.mxu0 %v3285_v1  ;;  %2324 = vmatprep.subr.bf16.mxu1 %v3288_v26 }
  0xff   : > { %2153 = vmatpush1.bf16.msra.mxu0 %v3283_v4  ;;  %2325 = vmatpush1.bf16.msra.mxu1 %v3286_v5 }
 0x100   : > { %2154 = vmatprep.subr.bf16.mxu0 %v3291_v6  ;;  %2326 = vmatprep.subr.bf16.mxu1 %v3294_v7 }
 0x103   : > { %2155 = vmatpush1.bf16.msra.mxu0 %v3289_v10  ;;  %2327 = vmatpush1.bf16.msra.mxu1 %v3292_v11 }
 0x106   : > { %2157 = vmatmul.mubr.bf16.vlgmr.msra.gmra.mrb[0].mxu0 %v435_v12  ;;  %2329 = vmatmul.mubr.bf16.vlgmr.msra.gmra.mrb[0].mxu1 %v435_v12 }
 0x1d9   : > { %v2158_v21 = vpop.f32.mrb[0].mxu0  ;;  %v2330_v22 = vpop.f32.mrb[0].mxu1 }
 0x1da   : > { %v2870_v23 = vadd.f32 %v2158_v21, %v698_v16  ;;  %v2874_v24 = vadd.f32 %v2330_v22, %v706_v54  ;;  %v2160_v25 = vpop.f32.mrb[1].mxu0  ;;  %v2332_v27 = vpop.f32.mrb[1].mxu1 }
 0x1db   : > { %v2871_v28 = vadd.f32 %v2160_v25, %v702_v55  ;;  %v2875_v29 = vadd.f32 %v2332_v27, %v710_v13  ;;  %v2162_v30 = vpop.f32.mrb[2].mxu0  ;;  %v2334_v56 = vpop.f32.mrb[2].mxu1 }
 0x1dc   : > { %v2872_v47 = vadd.f32 %v2162_v30, %v698_v16  ;;  %v4238_v58 = vadd.f32 %v2334_v56, %v706_v54  ;;  %v2164_v34 = vpop.f32.mrb[3].mxu0  ;;  %v2336_v32 = vpop.f32.mrb[3].mxu1  ;;  %v2401_v33 = vmul.f32 %v2870_v23, %v2870_v23  ;;  %v2403_v35 = vmul.f32 %v2874_v24, %v2874_v24 }
 0x1dd   : > { %v2866_v37 = vpack.c.bf16 %v2871_v28, %v2870_v23  ;;  %v2867_v38 = vpack.c.bf16 %v2875_v29, %v2874_v24  ;;  %v2402_v44 = vmul.f32 %v2871_v28, %v2871_v28  ;;  %v2404_v45 = vmul.f32 %v2875_v29, %v2875_v29 }
 0x1de   : > { %v2339_v39 = vadd.f32 %v2872_v47, %v2870_v23  ;;  %v2405_v41 = vmul.f32 %v2872_v47, %v2872_v47  ;;  %v2353_v42 = vadd.f32 %v4238_v58, %v2874_v24  ;;  %v2407_v43 = vmul.f32 %v4238_v58, %v4238_v58 }
 0x1df   : > { %2492 = vst [vmem:[%s4236_s14] sm:$0xff] %v2866_v37  ;;  %2493 = vst [vmem:[%s4236_s14 + $0x8] sm:$0xff] %v2867_v38  ;;  %v2873_v46 = vadd.f32 %v2164_v34, %v702_v55  ;;  %v2877_v48 = vadd.f32 %v2336_v32, %v710_v13  ;;  %v2378_v37 = vsub.s32 %v2375_v31, %v3472_v40 }
 0x1e0   : > { %v2340_v49 = vrot.slane %v2339_v39, 4  ;;  %v2409_v50 = vadd.f32 %v2405_v41, %v2401_v33  ;;  %v2354_v51 = vrot.slane %v2353_v42, 4  ;;  %v2423_v52 = vadd.f32 %v2407_v43, %v2403_v35 }
 0x1e1   : > { %v2346_v53 = vadd.f32 %v2873_v46, %v2871_v28  ;;  %v2406_v57 = vmul.f32 %v2873_v46, %v2873_v46  ;;  %v2868_v59 = vpack.c.bf16 %v2873_v46, %v2872_v47  ;;  %v2360_v60 = vadd.f32 %v2877_v48, %v2875_v29 }
 0x1e2   : > { %v2341_v18 = vadd.f32 %v2340_v49, %v2339_v39  ;;  %v2410_v17 = vrot.slane %v2409_v50, 4  ;;  %v2355_v19 = vadd.f32 %v2354_v51, %v2353_v42  ;;  %v2424_v61 = vrot.slane %v2423_v52, 4 }
 0x1e3   : > { %v2347_v62 = vrot.slane %v2346_v53, 4  ;;  %v2416_v63 = vadd.f32 %v2406_v57, %v2402_v44  ;;  %2494 = vst [vmem:[%s4236_s14 + $0x10] sm:$0xff] %v2868_v59  ;;  %v2361_v0 = vrot.slane %v2360_v60, 4  ;;  %v2408_v1 = vmul.f32 %v2877_v48, %v2877_v48 }
 0x1e4   : > { %v2342_v26 = vrot.slane %v2341_v18, 2  ;;  %v2411_v2 = vadd.f32 %v2410_v17, %v2409_v50  ;;  %v2356_v3 = vrot.slane %v2355_v19, 2  ;;  %v2425_v4 = vadd.f32 %v2424_v61, %v2423_v52 }
 0x1e5   : > { %v2348_v5 = vadd.f32 %v2347_v62, %v2346_v53  ;;  %v2417_v6 = vrot.slane %v2416_v63, 4  ;;  %v2362_v7 = vadd.f32 %v2361_v0, %v2360_v60  ;;  %v2430_v8 = vadd.f32 %v2408_v1, %v2404_v45 }
 0x1e6   : > { %v2343_v9 = vadd.f32 %v2342_v26, %v2341_v18  ;;  %v2412_v10 = vrot.slane %v2411_v2, 2  ;;  %v2357_v11 = vadd.f32 %v2356_v3, %v2355_v19  ;;  %v2426_v12 = vrot.slane %v2425_v4, 2 }
 0x1e7   : > { %v2349_v15 = vrot.slane %v2348_v5, 2  ;;  %v2418_v16 = vadd.f32 %v2417_v6, %v2416_v63  ;;  %v2363_v54 = vrot.slane %v2362_v7, 2  ;;  %v2431_v55 = vrot.slane %v2430_v8, 4 }
 0x1e8   : > { %v2344_v13 = vrot.slane %v2343_v9, 1  ;;  %v2413_v14 = vadd.f32 %v2412_v10, %v2411_v2  ;;  %v2358_v21 = vrot.slane %v2357_v11, 1  ;;  %v2427_v22 = vadd.f32 %v2426_v12, %v2425_v4 }
 0x1e9   : > { %v2350_v23 = vadd.f32 %v2349_v15, %v2348_v5  ;;  %v2419_v24 = vrot.slane %v2418_v16, 2  ;;  %v2364_v25 = vadd.f32 %v2363_v54, %v2362_v7  ;;  %v2432_v27 = vadd.f32 %v2431_v55, %v2430_v8 }
 0x1ea   : > { %v2345_v28 = vadd.f32 %v2344_v13, %v2343_v9  ;;  %v2414_v29 = vrot.slane %v2413_v14, 1  ;;  %v2359_v30 = vadd.f32 %v2358_v21, %v2357_v11  ;;  %v2428_v56 = vrot.slane %v2427_v22, 1 }
 0x1eb   : > { %v2351_v47 = vrot.slane %v2350_v23, 1  ;;  %v2420_v34 = vadd.f32 %v2419_v24, %v2418_v16  ;;  %v2365_v32 = vrot.slane %v2364_v25, 1  ;;  %v2433_v33 = vrot.slane %v2432_v27, 2 }
 0x1ec   : > { %v2415_v35 = vadd.f32 %v2414_v29, %v2413_v14  ;;  %v2869_v38 = vpack.c.bf16 %v2877_v48, %v4238_v58  ;;  %v2429_v44 = vadd.f32 %v2428_v56, %v2427_v22 }
 0x1ed   : > { %v2352_v39 = vadd.f32 %v2351_v47, %v2350_v23  ;;  %v2421_v41 = vrot.slane %v2420_v34, 1  ;;  %v2366_v42 = vadd.f32 %v2365_v32, %v2364_v25  ;;  %v2434_v43 = vadd.f32 %v2433_v33, %v2432_v27 }
 0x1ee   : > { %2495 = vst [vmem:[%s4236_s14 + $0x18] sm:$0xff] %v2869_v38 }
 0x1ef   : > { %v2371_v45 = vcombine.low %v2345_v28, %v2352_v39  ;;  %v2422_v46 = vadd.f32 %v2421_v41, %v2420_v34  ;;  %v2372_v49 = vcombine.low %v2359_v30, %v2366_v42  ;;  %v2435_v50 = vrot.slane %v2434_v43, 1 }
 0x1f1   : > { %v2379_v51 = vrot.slane %v2371_v45, %v2378_v37  ;;  %v2441_v52 = vcombine.low %v2415_v35, %v2422_v46  ;;  %v2386_v53 = vrot.slane %v2372_v49, %v2378_v37  ;;  %v2436_v20 = vadd.f32 %v2435_v50, %v2434_v43 }
 0x1f3   : > { %v2449_v40 = vrot.slane %v2441_v52, %v2378_v37  ;;  %v2387_v31 = vcombine.low %v2379_v51, %v2386_v53  ;;  %v2442_v58 = vcombine.low %v2429_v44, %v2436_v20 }
 0x1f5   : > { %v2394_v48 = vrot.slane %v2387_v31, %v2378_v37  ;;  %v2456_v57 = vrot.slane %v2442_v58, %v2378_v37 }
 0x1f7   : > { %2400 = vst.msk [vmem:[%s272_s18] ss:$2 sm:$0xf] %vm2398_vm0, %v2394_v48  ;;  %v2457_v59 = vcombine.low %v2449_v40, %v2456_v57 }
 0x1f9   : > { %v2464_v60 = vrot.slane %v2457_v59, %v2378_v37 }
 0x1fb   : > { %2856 = vst.msk [vmem:[%s272_s18 + $0x1] ss:$2 sm:$0xf] %vm2398_vm0, %v2464_v60 }
 0x1fc PF: > { %s17_s21 = sadd.s32 1, %s3303_s21  }
 0x1fd   : > { %p14_p5 = scmp.ge.s32.totalorder %s17_s21, 4  }
 0x1ff   :  { %16 = sbr.rel (!%p14_p5) target bundleno = 1 (0x1), region = 83 }

// kernel: generator_f0.12
= control target key start
LH: loop header
LB: loop body
LE: loop exit
PB: predicated region body
PF: predicated region fallthrough
CT: control target
= control target key end

     0   :  { %s908_s21 = smov 0   ;;  %s1069_s0 = inlined_call_operand.vmem [shape: bf16[32,256], index: 0, kind: input, shape index: {}]   ;;  %s1070_s1 = inlined_call_operand.vmem [shape: f32[1,256], index: 1, kind: input, shape index: {}]   ;;  %s1071_s2 = inlined_call_operand.vmem [shape: f32[1,256], index: 2, kind: input, shape index: {}]   ;;  %s1072_s3 = inlined_call_operand.vmem [shape: bf16[256,160], index: 3, kind: input, shape index: {}]   ;;  %s1073_s4 = inlined_call_operand.vmem [shape: f32[1,160], index: 4, kind: input, shape index: {}]   ;;  %s1074_s5 = inlined_call_operand.vmem [shape: bf16[32,160], index: 5, kind: output, shape index: {0}]   ;;  %s1075_s6 = inlined_call_operand.vmem [shape: f32[2,2,160], index: 6, kind: output, shape index: {1}]  }
   0x1 LB: > { %s914_s22 = sadd.s32 4294967295, %s870_s21   ;;  %p756_p0 = scmp.ge.s32.totalorder %s870_s21, 1  ;;  %s870_s21 = sphi %s908_s21, %s17_s21  }
   0x2   : > { %p217_p1 = scmp.lt.s32.totalorder %s870_s21, 3 }
   0x4   : > { %p218_p2 = pnand %p756_p0, %p217_p1 }
   0x5   : > { %v816_v0 = vld [vmem:[%s1072_s3 + $0x4] ss:$8 sps:$4 sm:$0xff] (!%p218_p2)   ;;  %v818_v1 = vld [vmem:[%s1072_s3] ss:$8 sps:$4 sm:$0xff] (!%p218_p2)   ;;  %v819_v2 = vld [vmem:[%s1072_s3 + $0x14] ss:$8 sps:$4 sm:$0xff] (!%p218_p2)   ;;  %v281_v8 = vlaneseq (!%p218_p2) }
   0x6   : > { %221 = sbr.rel (%p218_p2) target bundleno = 311 (0x137), region = 40  ;;  %521 = vmatprep.subr.bf16.mxu0 (!%p218_p2), %v816_v0  ;;  %v821_v3 = vld [vmem:[%s1072_s3 + $0x10] ss:$8 sps:$4 sm:$0xff] (!%p218_p2)   ;;  %v822_v4 = vld [vmem:[%s1072_s3 + $0x24] ss:$8 sps:$4 sm:$0xff] (!%p218_p2)   ;;  %s757_s9 = sshll.u32 (!%p218_p2), %s914_s22, 1 }
   0x7   : > { %522 = vmatpush1.bf16.msra.mxu0 (!%p218_p2), %v818_v1  ;;  %v824_v5 = vld [vmem:[%s1072_s3 + $0x20] ss:$8 sps:$4 sm:$0xff] (!%p218_p2)   ;;  %p255_p3 = scmp.lt.s32.totalorder (!%p218_p2), %s757_s9, 3  ;;  %v825_v6 = vld [vmem:[%s1072_s3 + $0x34] ss:$8 sps:$4 sm:$0xff] (!%p218_p2)   ;;  %v953_v11 = vshrl.u32 (!%p218_p2), %v281_v8, 7 }
   0x8   : > { %523 = vmatprep.subr.bf16.mxu0 (!%p218_p2), %v819_v2  ;;  %v827_v7 = vld [vmem:[%s1072_s3 + $0x30] ss:$8 sps:$4 sm:$0xff] (!%p218_p2)   ;;  %v828_v9 = vld [vmem:[%s1072_s3 + $0x44] ss:$8 sps:$4 sm:$0xff] (!%p218_p2)   ;;  %v830_v10 = vld [vmem:[%s1072_s3 + $0x40] ss:$8 sps:$4 sm:$0xff] (!%p218_p2)  }
   0x9   : > { %v831_v12 = vld [vmem:[%s1072_s3 + $0x54] ss:$8 sps:$4 sm:$0xff] (!%p218_p2)   ;;  %v833_v13 = vld [vmem:[%s1072_s3 + $0x50] ss:$8 sps:$4 sm:$0xff] (!%p218_p2)   ;;  %v967_v14 = vsub.s32 (!%p218_p2), 1, %v953_v11  ;;  %v283_v41 = vsub.s32 (!%p218_p2), 0, %v953_v11 }
   0xa   : > { %v834_v15 = vld [vmem:[%s1072_s3 + $0x64] ss:$8 sps:$4 sm:$0xff] (!%p218_p2)   ;;  %v279_v20 = vld [vmem:[%s1070_s1] sm:$0x3] (!%p218_p2)  ;;  %v837_v25 = vld [vmem:[%s1072_s3 + $0x74] ss:$8 sps:$4 sm:$0xff] (!%p218_p2)  }
   0xb   : > { %524 = vmatpush1.bf16.msra.mxu0 (!%p218_p2), %v821_v3  ;;  %v295_v21 = vld [vmem:[%s1071_s2] sm:$0x3] (!%p218_p2)  ;;  %v288_v23 = vrot.slane (!%p218_p2), %v279_v20, %v967_v14  ;;  %v839_v28 = vld [vmem:[%s1072_s3 + $0x70] ss:$8 sps:$4 sm:$0xff] (!%p218_p2)   ;;  %v840_v31 = vld [vmem:[%s1072_s3 + $0x84] ss:$8 sps:$4 sm:$0xff] (!%p218_p2)   ;;  %v284_v46 = vrot.slane (!%p218_p2), %v279_v20, %v283_v41 }
   0xc   : > { %525 = vmatprep.subr.bf16.mxu0 (!%p218_p2), %v822_v4  ;;  %v836_v22 = vld [vmem:[%s1072_s3 + $0x60] ss:$8 sps:$4 sm:$0xff] (!%p218_p2)   ;;  %v304_v24 = vrot.slane (!%p218_p2), %v295_v21, %v967_v14  ;;  %v843_v36 = vld [vmem:[%s1072_s3 + $0x94] ss:$8 sps:$4 sm:$0xff] (!%p218_p2)   ;;  %v845_v37 = vld [vmem:[%s1072_s3 + $0x90] ss:$8 sps:$4 sm:$0xff] (!%p218_p2)   ;;  %v300_v49 = vrot.slane (!%p218_p2), %v295_v21, %v283_v41 }
   0xd   : > { %s1079_s9 = smov (!%p255_p3, %s757_s9), 3  ;;  %v842_v34 = vld [vmem:[%s1072_s3 + $0x80] ss:$8 sps:$4 sm:$0xff]   ;;  %v846_v38 = vld [vmem:[%s1072_s3 + $0xa4] ss:$8 sps:$4 sm:$0xff]   ;;  %vm656_vm0 = vcmask 1043456  }
   0xe   : > { %s802_s20 = sshll.u32 %s1079_s9, 3  ;;  %v848_v39 = vld [vmem:[%s1072_s3 + $0xa0] ss:$8 sps:$4 sm:$0xff]   ;;  %v849_v40 = vld [vmem:[%s1072_s3 + $0xb4] ss:$8 sps:$4 sm:$0xff]   ;;  %vm657_vm1 = vcmask 261124  }
   0xf   : > { %526 = vmatpush1.bf16.msra.mxu0 %v824_v5  ;;  %s259_s27 = scalar_lea.vmem %s1069_s0, %s802_s20  ;;  %v851_v42 = vld [vmem:[%s1072_s3 + $0xb0] ss:$8 sps:$4 sm:$0xff]   ;;  %v852_v43 = vld [vmem:[%s1072_s3 + $0xc4] ss:$8 sps:$4 sm:$0xff]   ;;  %v854_v47 = vld [vmem:[%s1072_s3 + $0xc0] ss:$8 sps:$4 sm:$0xff]   ;;  %s266_s15 = scalar_lea.vmem %s1074_s5, %s802_s20 }
  0x10   : > { %527 = vmatprep.subr.bf16.mxu0 %v825_v6  ;;  %v273_v16 = vld [vmem:[%s259_s27] sm:$0xff]  ;;  %v274_v17 = vld [vmem:[%s259_s27 + $0x8] sm:$0xff]  ;;  %v855_v48 = vld [vmem:[%s1072_s3 + $0xd4] ss:$8 sps:$4 sm:$0xff]   ;;  %vm571_vm2 = vcmask 261120   ;;  %p268_p4 = scmp.lt.s32.totalorder %s914_s22, 1 }
  0x11   : > { %v276_v18 = vunpack.c.h.bf16 %v273_v16  ;;  %v278_v19 = vunpack.c.h.bf16 %v274_v17  ;;  %v275_v44 = vunpack.c.l.bf16 %v273_v16  ;;  %v277_v45 = vunpack.c.l.bf16 %v274_v17  ;;  %v857_v52 = vld [vmem:[%s1072_s3 + $0xd0] ss:$8 sps:$4 sm:$0xff]   ;;  %v858_v53 = vld [vmem:[%s1072_s3 + $0xe4] ss:$8 sps:$4 sm:$0xff]   ;;  %v860_v56 = vld [vmem:[%s1072_s3 + $0xe0] ss:$8 sps:$4 sm:$0xff]  }
  0x12   : > { %v861_v57 = vld [vmem:[%s1072_s3 + $0xf4] ss:$8 sps:$4 sm:$0xff]   ;;  %v863_v60 = vld [vmem:[%s1072_s3 + $0xf0] ss:$8 sps:$4 sm:$0xff]   ;;  %v349_v62 = vld [vmem:[%s1073_s4] sm:$0x3] }
  0x13   : > { %528 = vmatpush1.bf16.msra.mxu0 %v827_v7  ;;  %v292_v26 = vmul.f32 %v288_v23, %v276_v18  ;;  %v294_v27 = vmul.f32 %v288_v23, %v278_v19  ;;  %v291_v50 = vmul.f32 %v284_v46, %v275_v44  ;;  %v293_v51 = vmul.f32 %v284_v46, %v277_v45  ;;  %vm1047_vm3 = vmor %vm657_vm1, %vm656_vm0  ;;  %s1081_s22 = smov (!%p268_p4, %s914_s22), 1 }
  0x14   : > { %529 = vmatprep.subr.bf16.mxu0 %v828_v9  ;;  %v354_v63 = vrot.slane %v349_v62, %v283_v41  ;;  %v358_v0 = vrot.slane %v349_v62, %v967_v14  ;;  %s804_s9 = sshll.u32 %s1081_s22, 2  ;;  %vm601_vm4 = vcmp.lt.s32.totalorder %v281_v8, 160 }
  0x15   : > { %v308_v29 = vadd.f32 %v304_v24, %v292_v26  ;;  %v310_v30 = vadd.f32 %v304_v24, %v294_v27  ;;  %v307_v54 = vadd.f32 %v300_v49, %v291_v50  ;;  %v309_v55 = vadd.f32 %v300_v49, %v293_v51  ;;  %s272_s17 = scalar_lea.vmem %s1075_s6, %s804_s9 }
  0x17   : > { %530 = vmatpush1.bf16.msra.mxu0 %v830_v10  ;;  %v312_v32 = vmax.f32 %v308_v29, 0.0  ;;  %v314_v33 = vmax.f32 %v310_v30, 0.0  ;;  %v311_v58 = vmax.f32 %v307_v54, 0.0  ;;  %v313_v59 = vmax.f32 %v309_v55, 0.0 }
  0x18   : > { %531 = vmatprep.subr.bf16.mxu0 %v831_v12  ;;  %v872_v30 = vmov 1966171168  }
  0x19   : > { %v316_v35 = vpack.c.bf16 %v314_v33, %v312_v32  ;;  %v315_v61 = vpack.c.bf16 %v313_v59, %v311_v58 }
  0x1b   : > { %532 = vmatpush1.bf16.msra.mxu0 %v833_v13  ;;  %553 = vmatprep.mubr.bf16.mxu0 %v316_v35 }
  0x1c   : > { %533 = vmatprep.subr.bf16.mxu0 %v834_v15 }
  0x1f   : > { %534 = vmatpush1.bf16.msra.mxu0 %v836_v22 }
  0x20   : > { %535 = vmatprep.subr.bf16.mxu0 %v837_v25 }
  0x23   : > { %536 = vmatpush1.bf16.msra.mxu0 %v839_v28 }
  0x24   : > { %537 = vmatprep.subr.bf16.mxu0 %v840_v31  ;;  %v585_v31 = vunpack.c.l.s4 %v872_v30 }
  0x27   : > { %538 = vmatpush1.bf16.msra.mxu0 %v842_v34 }
  0x28   : > { %539 = vmatprep.subr.bf16.mxu0 %v843_v36 }
  0x2b   : > { %540 = vmatpush1.bf16.msra.mxu0 %v845_v37 }
  0x2c   : > { %541 = vmatprep.subr.bf16.mxu0 %v846_v38 }
  0x2f   : > { %542 = vmatpush1.bf16.msra.mxu0 %v848_v39 }
  0x30   : > { %543 = vmatprep.subr.bf16.mxu0 %v849_v40  ;;  %v586_v40 = vunpack.c.0.s8 %v585_v31 }
  0x33   : > { %544 = vmatpush1.bf16.msra.mxu0 %v851_v42 }
  0x34   : > { %545 = vmatprep.subr.bf16.mxu0 %v852_v43 }
  0x37   : > { %546 = vmatpush1.bf16.msra.mxu0 %v854_v47 }
  0x38   : > { %547 = vmatprep.subr.bf16.mxu0 %v855_v48  ;;  %v589_v48 = vsub.s32 %v586_v40, %v953_v11 }
  0x3b   : > { %548 = vmatpush1.bf16.msra.mxu0 %v857_v52 }
  0x3c   : > { %549 = vmatprep.subr.bf16.mxu0 %v858_v53 }
  0x3f   : > { %550 = vmatpush1.bf16.msra.mxu0 %v860_v56 }
  0x40   : > { %551 = vmatprep.subr.bf16.mxu0 %v861_v57 }
  0x43   : > { %552 = vmatpush1.bf16.msra.mxu0 %v863_v60 }
  0x46   : > { %554 = vmatmul.mubr.bf16.vlgmr.msra.gmra.mrb[0].mxu0 %v315_v61 }
 0x119   : > { %v555_v1 = vpop.f32.mrb[0].mxu0 }
 0x11a   : > { %v556_v2 = vadd.f32 %v555_v1, %v354_v63  ;;  %v557_v3 = vpop.f32.mrb[1].mxu0 }
 0x11b   : > { %v558_v4 = vadd.f32 %v557_v3, %v358_v0  ;;  %v559_v5 = vpop.f32.mrb[2].mxu0 }
 0x11c   : > { %v560_v7 = vadd.f32 %v559_v5, %v354_v63  ;;  %v561_v9 = vpop.f32.mrb[3].mxu0  ;;  %v604_v14 = vmul.f32 %v556_v2, %v556_v2 }
 0x11d   : > { %v605_v10 = vmul.f32 %v558_v4, %v558_v4  ;;  %v805_v12 = vpack.c.bf16 %v558_v4, %v556_v2  ;;  %v562_v13 = vadd.f32 %v561_v9, %v358_v0  ;;  %v572_v17 = vsel %vm571_vm2, %v558_v4, 0.0 }
 0x11e   : > { %v564_v15 = vadd.f32 %v560_v7, %v556_v2  ;;  %v606_v16 = vmul.f32 %v560_v7, %v560_v7 }
 0x11f   : > { %659 = vst.msk [vmem:[%s266_s15] sm:$0xff] %vm1047_vm3, %v805_v12  ;;  %v573_v18 = vsel %vm571_vm2, %v562_v13, 0.0  ;;  %v607_v19 = vmul.f32 %v562_v13, %v562_v13  ;;  %v806_v20 = vpack.c.bf16 %v562_v13, %v560_v7  ;;  %v615_v24 = vsel %vm571_vm2, %v605_v10, 0.0 }
 0x120   : > { %v565_v21 = vrot.slane %v564_v15, 4  ;;  %v608_v22 = vadd.f32 %v606_v16, %v604_v14  ;;  %v574_v23 = vadd.f32 %v573_v18, %v572_v17 }
 0x121   : > { %v616_v25 = vsel %vm571_vm2, %v607_v19, 0.0  ;;  %660 = vst.msk [vmem:[%s266_s15 + $0x8] sm:$0xff] %vm1047_vm3, %v806_v20 }
 0x122   : > { %v566_v26 = vadd.f32 %v565_v21, %v564_v15  ;;  %v609_v27 = vrot.slane %v608_v22, 4  ;;  %v575_v28 = vrot.slane %v574_v23, 4  ;;  %v617_v29 = vadd.f32 %v616_v25, %v615_v24 }
 0x124   : > { %v567_v32 = vrot.slane %v566_v26, 2  ;;  %v610_v33 = vadd.f32 %v609_v27, %v608_v22  ;;  %v576_v34 = vadd.f32 %v575_v28, %v574_v23  ;;  %v618_v35 = vrot.slane %v617_v29, 4 }
 0x126   : > { %v568_v36 = vadd.f32 %v567_v32, %v566_v26  ;;  %v611_v37 = vrot.slane %v610_v33, 2  ;;  %v577_v38 = vrot.slane %v576_v34, 2  ;;  %v619_v39 = vadd.f32 %v618_v35, %v617_v29 }
 0x128   : > { %v569_v41 = vrot.slane %v568_v36, 1  ;;  %v612_v42 = vadd.f32 %v611_v37, %v610_v33  ;;  %v578_v43 = vadd.f32 %v577_v38, %v576_v34  ;;  %v620_v44 = vrot.slane %v619_v39, 2 }
 0x12a   : > { %v613_v45 = vrot.slane %v612_v42, 1  ;;  %v579_v46 = vrot.slane %v578_v43, 1  ;;  %v621_v47 = vadd.f32 %v620_v44, %v619_v39  ;;  %v570_v49 = vadd.f32 %v569_v41, %v568_v36 }
 0x12c   : > { %v580_v50 = vadd.f32 %v579_v46, %v578_v43  ;;  %v622_v51 = vrot.slane %v621_v47, 1  ;;  %v614_v52 = vadd.f32 %v613_v45, %v612_v42 }
 0x12e   : > { %v583_v53 = vcombine.low %v570_v49, %v580_v50  ;;  %v623_v54 = vadd.f32 %v622_v51, %v621_v47 }
 0x130   : > { %v590_v55 = vrot.slane %v583_v53, %v589_v48  ;;  %v626_v56 = vcombine.low %v614_v52, %v623_v54 }
 0x132   : > { %v597_v57 = vrot.slane %v590_v55, %v589_v48  ;;  %v633_v58 = vrot.slane %v626_v56, %v589_v48 }
 0x134   : > { %603 = vst.msk [vmem:[%s272_s17] ss:$2 sm:$0x3] %vm601_vm4, %v597_v57  ;;  %v640_v59 = vrot.slane %v633_v58, %v589_v48 }
 0x136   : > { %797 = vst.msk [vmem:[%s272_s17 + $0x1] ss:$2 sm:$0x3] %vm601_vm4, %v640_v59 }
 0x137 PF: > { %s17_s21 = sadd.s32 1, %s870_s21  }
 0x138   : > { %p14_p5 = scmp.ge.s32.totalorder %s17_s21, 4  }
 0x13a   :  { %16 = sbr.rel (!%p14_p5) target bundleno = 1 (0x1), region = 83 }

// kernel: squeeze.25
= control target key start
LH: loop header
LB: loop body
LE: loop exit
PB: predicated region body
PF: predicated region fallthrough
CT: control target
= control target key end

     0   :  { %s85_s0 = inlined_call_operand.vmem [shape: f32[32], index: 0, kind: input, shape index: {}]   ;;  %s86_s1 = inlined_call_operand.hbm [shape: f32[2,16], index: 1, kind: output, shape index: {}]  }
   0x1   :  { %v5_v0 = vld [vmem:[%s85_s0] sm:$0x1] }
   0x2   :  { %2 = vsyncpa [#allocation1], 0  ;;  %6 = vst [vmem:[#allocation3] sm:$0x1] %v5_v0  ;;  %vm8_vm0 = vcmask 130048   ;;  %s58_s0 = smov 112  }
   0x3   :  { %s59_s8 = smov [#allocation0]  }
   0x4   :  { %s26_s9 = sshll.u32 %s59_s8, 4  ;;  %s27_s9 = int_to_ptr.vmem [resolvable:$true] %s26_s9 }
   0x5   :  { %s34_s10 = scalar_lea.vmem %s27_s9, 32  ;;  %p39_p1 = scmp.lt.s32.totalorder %s27_s9, %s27_s9 }
   0x6   :  { %p35_p0 = scmp.ne.s32.totalorder %s27_s9, %s34_s10  ;;  %p40_p2 = scmp.lt.s32.totalorder %s34_s10, %s34_s10 }
   0x8   :  { %p41_p3 = por %p40_p2, %p39_p1 }
   0x9   :  { %v10_v1 = vld [vmem:[#allocation3] sm:$0x1]  }
   0xa   :  { %v7_v2 = vld [vmem:[#allocation3] sm:$0x1]   ;;  %11 = vrot.lane.b32.xlu0 %v10_v1, %s58_s0  ;;  %p42_p4 = pnand %p41_p3, %p35_p0 }
   0xb   :  { %9 = vst.msk [vmem:[#allocation2] sm:$0x1] %vm8_vm0, %v7_v2  }
  0x7c   :  { %v12_v3 = vpop.permute.xlu0 %11  }
  0x7d   :  { %15 = vst.msk [vmem:[#allocation2 + $0x1] sm:$0x1] %vm8_vm0, %v12_v3  }
  0x84   :  { %v19_v4 = vld [vmem:[#allocation2] sm:$0x3] }
  0x85   :  { %21 = vst [vmem:[#allocation0] sm:$0x3] %v19_v4 }
  0x86   :  { %45 = shalt.err (!%p42_p4)
}
  0x87   :  { %s46_s13 = scalar_lea.hbm %s86_s1, 32 }
  0x88   :  { %p47_p5 = scmp.ne.s32.totalorder %s86_s1, %s46_s13  ;;  %p50_p6 = scmp.lt.u32.totalorder %s46_s13, %s86_s1 }
  0x8a   :  { %p52_p7 = pnand %p50_p6, %p47_p5 }
  0x8c   :  { %55 = shalt.err (!%p52_p7)
}
  0x8d   :  { %29 = dma.vmem_to_hbm [thread:$0]  %s27_s9, 32, %s86_s1, [#allocation1]  }
  0x8e   :  { %56 = dma.done.wait [#allocation1], 32  }
  0x8f   :  { %57 = vsyncadd [#allocation1], 4294967264 }
  0x90   :  { %31 = vsyncpa [#allocation1], 1 }

// kernel: generator_f0.13
= control target key start
LH: loop header
LB: loop body
LE: loop exit
PB: predicated region body
PF: predicated region fallthrough
CT: control target
= control target key end

     0   :  { %s431_s20 = smov 0   ;;  %s464_s0 = inlined_call_operand.vmem [shape: bf16[32,160], index: 0, kind: input, shape index: {}]   ;;  %s465_s1 = inlined_call_operand.vmem [shape: f32[1,160], index: 1, kind: input, shape index: {}]   ;;  %s466_s2 = inlined_call_operand.vmem [shape: f32[1,160], index: 2, kind: input, shape index: {}]   ;;  %s467_s3 = inlined_call_operand.vmem [shape: f32[1,160], index: 3, kind: input, shape index: {}]   ;;  %s468_s4 = inlined_call_operand.<no memory space> [shape: f32[1,1], index: 4, kind: input, shape index: {}]   ;;  %s469_s5 = inlined_call_operand.vmem [shape: f32[32,1], index: 5, kind: output, shape index: {}]  }
   0x1   :  { %v10_v0 = vstv %s468_s4 }
   0x2   :  { %11 = vst [vmem:[#allocation2] sm:$0x1] %v10_v0 }
   0x3 LB: > { %s368_s21 = sadd.s32 4294967295, %s396_s20   ;;  %p372_p0 = scmp.ge.s32.totalorder %s396_s20, 1  ;;  %s396_s20 = sphi %s431_s20, %s17_s20  }
   0x4   : > { %p191_p1 = scmp.lt.s32.totalorder %s396_s20, 3 }
   0x6   : > { %p192_p2 = pnand %p372_p0, %p191_p1 }
   0x7   : > { %s373_s22 = sshll.u32 (!%p192_p2), %s368_s21, 1  ;;  %v241_v1 = vlaneseq (!%p192_p2)  ;;  %v239_v3 = vld [vmem:[%s465_s1] sm:$0x3] (!%p192_p2)  ;;  %vm291_vm0 = vcmask (!%p192_p2), 261120   ;;  %vm309_vm1 = vcmask (!%p192_p2), 7168  }
   0x8   : > { %195 = sbr.rel (%p192_p2) target bundleno = 181 (0xb5), region = 40  ;;  %p221_p3 = scmp.lt.s32.totalorder (!%p192_p2), %s373_s22, 3  ;;  %v255_v6 = vld [vmem:[%s466_s2] sm:$0x3] (!%p192_p2) }
   0x9   : > { %v242_v2 = vshrl.u32 (!%p192_p2), %v241_v1, 7  ;;  %v275_v15 = vld [vmem:[%s467_s3] sm:$0x3] (!%p192_p2) }
   0xa   : > { %v378_v40 = vld [vmem:[#allocation2] ss:$0 sm:$0xff] (!%p192_p2) }
   0xb   : > { %v243_v4 = vsub.s32 (!%p192_p2), 0, %v242_v2  ;;  %v247_v5 = vsub.s32 (!%p192_p2), 1, %v242_v2 }
   0xd   : > { %v244_v7 = vrot.slane (!%p192_p2), %v239_v3, %v243_v4  ;;  %v248_v8 = vrot.slane (!%p192_p2), %v239_v3, %v247_v5  ;;  %v260_v10 = vrot.slane (!%p192_p2), %v255_v6, %v243_v4  ;;  %v264_v11 = vrot.slane (!%p192_p2), %v255_v6, %v247_v5 }
   0xe   : > { %v280_v22 = vrot.slane (!%p192_p2), %v275_v15, %v243_v4  ;;  %v284_v23 = vrot.slane (!%p192_p2), %v275_v15, %v247_v5 }
   0xf   : > { %s471_s22 = smov (!%p221_p3, %s373_s22), 3 }
  0x10   : > { %s381_s26 = sshll.u32 %s471_s22, 3 }
  0x11   : > { %s225_s29 = scalar_lea.vmem %s464_s0, %s381_s26  ;;  %s231_s9 = scalar_lea.vmem %s469_s5, %s381_s26 }
  0x12   : > { %v233_v9 = vld [vmem:[%s225_s29] sm:$0xff]  ;;  %v234_v12 = vld [vmem:[%s225_s29 + $0x8] sm:$0xff] }
  0x13   : > { %v235_v13 = vunpack.c.l.bf16 %v233_v9  ;;  %v236_v14 = vunpack.c.h.bf16 %v233_v9  ;;  %v237_v16 = vunpack.c.l.bf16 %v234_v12  ;;  %v238_v17 = vunpack.c.h.bf16 %v234_v12 }
  0x15   : > { %v251_v18 = vmul.f32 %v244_v7, %v235_v13  ;;  %v252_v19 = vmul.f32 %v248_v8, %v236_v14  ;;  %v253_v20 = vmul.f32 %v244_v7, %v237_v16  ;;  %v254_v21 = vmul.f32 %v248_v8, %v238_v17 }
  0x17   : > { %v267_v24 = vadd.f32 %v260_v10, %v251_v18  ;;  %v268_v25 = vadd.f32 %v264_v11, %v252_v19  ;;  %v269_v26 = vadd.f32 %v260_v10, %v253_v20  ;;  %v270_v27 = vadd.f32 %v264_v11, %v254_v21 }
  0x19   : > { %v271_v28 = vmax.f32 %v267_v24, 0.0  ;;  %v272_v29 = vmax.f32 %v268_v25, 0.0  ;;  %v273_v30 = vmax.f32 %v269_v26, 0.0  ;;  %v274_v31 = vmax.f32 %v270_v27, 0.0 }
  0x1b   : > { %v287_v32 = vmul.f32 %v280_v22, %v271_v28  ;;  %v288_v33 = vmul.f32 %v284_v23, %v272_v29  ;;  %v290_v34 = vmul.f32 %v284_v23, %v274_v31  ;;  %v289_v35 = vmul.f32 %v280_v22, %v273_v30 }
  0x1d   : > { %v292_v36 = vsel %vm291_vm0, %v288_v33, 0.0  ;;  %v296_v37 = vsel %vm291_vm0, %v290_v34, 0.0 }
  0x1e   : > { %v293_v38 = vadd.f32 %v292_v36, %v287_v32  ;;  %v297_v39 = vadd.f32 %v296_v37, %v289_v35 }
  0x20   : > { %294 = vadd.xlane.f32.xlu0 %v293_v38 }
  0x24   : > { %298 = vadd.xlane.f32.xlu0 %v297_v39 }
  0xad   : > { %v295_v41 = vpop.xlane.xlu0 %294 }
  0xae   : > { %v307_v42 = vadd.f32 %v378_v40, %v295_v41 }
  0xb0   : > { %310 = vst.msk [vmem:[%s231_s9] sm:$0xff] %vm309_vm1, %v307_v42 }
  0xb1   : > { %v299_v43 = vpop.xlane.xlu0 %298 }
  0xb2   : > { %v308_v44 = vadd.f32 %v378_v40, %v299_v43 }
  0xb4   : > { %311 = vst.msk [vmem:[%s231_s9 + $0x8] sm:$0xff] %vm309_vm1, %v308_v44 }
  0xb5 PF: > { %s17_s20 = sadd.s32 1, %s396_s20  }
  0xb6   : > { %p14_p4 = scmp.ge.s32.totalorder %s17_s20, 4  }
  0xb8   :  { %16 = sbr.rel (!%p14_p4) target bundleno = 3 (0x3), region = 70 }

</bundles_post_ra>
